<compile_context>
chip_gen: v6e
topology: v6e:2x2x1
jax: 0.10.0
libtpu: 0.0.40
codegen_flags: <defaults>
</compile_context>

<pallas_src>
import functools
import math

import jax
import jax.numpy as jnp
from jax.experimental import pallas as pl
from jax.experimental.pallas import tpu as pltpu

LN_EPS = 1e-5


def _layer_norm(x, gamma, beta):
    mean = jnp.mean(x, axis=-1, keepdims=True)
    var = jnp.mean((x - mean) ** 2, axis=-1, keepdims=True)
    return (x - mean) * jax.lax.rsqrt(var + LN_EPS) * gamma + beta


def layer1_kernel(num_heads,
                  x_ref,
                  wqkv_ref, bqkv_ref,
                  wo_ref,
                  w1_ref, b1_ref, w2_ref,
                  vec_ref,
                  o_ref,
                  attn_scr):
    Bblk, S, E = x_ref.shape
    H = num_heads
    Dh = E // H
    rows = Bblk * S

    # Packed (1, E) vectors: bo, ln1_gamma, ln1_beta, b2, ln2_gamma, ln2_beta.
    vecs = vec_ref[...]
    bo, g1, be1, b2, g2, be2 = (vecs[i:i + 1, :] for i in range(6))

    # Read x once: bf16 copy for the MXU, one residual copy in f32.
    x2 = x_ref[...].reshape(rows, E)
    x_res = x2.astype(jnp.float32)
    x_mxu = x2.astype(jnp.bfloat16)

    # ---- Fused QKV projection: one (rows, E) @ (E, 3E) matmul --------------
    # 1/sqrt(Dh) is pre-folded into the Wq/bq third of wqkv/bqkv on the host.
    qkv = jnp.dot(x_mxu, wqkv_ref[...],
                  preferred_element_type=jnp.float32) + bqkv_ref[...]

    # ---- Per-sequence, per-head attention ----------------------------------
    # Static Dh-wide lane slices for the split; per-head outputs are stored
    # into a VMEM scratch with lane-slice writes (no concatenates, no
    # lane->sublane reshape/transpose relayouts).
    for h in range(H):
        def head(col0, _h=h):
            sl = qkv[:, col0 + _h * Dh: col0 + (_h + 1) * Dh]
            return sl.reshape(Bblk, S, Dh).astype(jnp.bfloat16)

        qh, kh, vh = head(0), head(E), head(2 * E)
        s = jnp.einsum("bqd,bkd->bqk", qh, kh,
                       preferred_element_type=jnp.float32)       # (Bblk, S, S)
        s = s - jnp.max(s, axis=-1, keepdims=True)
        p = jnp.exp(s)
        p = p * pl.reciprocal(jnp.sum(p, axis=-1, keepdims=True), approx=True)
        oh = jnp.einsum("bqk,bkd->bqd", p.astype(jnp.bfloat16), vh,
                        preferred_element_type=jnp.float32)      # (Bblk, S, Dh)
        attn_scr[:, :, h * Dh:(h + 1) * Dh] = oh

    attn = attn_scr[...].reshape(rows, E)
    attn = jnp.dot(attn.astype(jnp.bfloat16), wo_ref[...],
                   preferred_element_type=jnp.float32) + bo

    # ---- Residual 1 + LayerNorm 1 (dropout = identity, eval mode) ----------
    y = _layer_norm(x_res + attn, g1, be1)

    # ---- Feed-forward network ----------------------------------------------
    hdn = jnp.dot(y.astype(jnp.bfloat16), w1_ref[...],
                  preferred_element_type=jnp.float32) + b1_ref[...]
    hdn = jnp.maximum(hdn, 0.0)                                   # ReLU
    ffn = jnp.dot(hdn.astype(jnp.bfloat16), w2_ref[...],
                  preferred_element_type=jnp.float32) + b2

    # ---- Residual 2 + LayerNorm 2 ------------------------------------------
    z = _layer_norm(y + ffn, g2, be2)
    o_ref[...] = z.reshape(Bblk, S, E).astype(o_ref.dtype)


def _tpu_vmem_info():
    """Return (per-core VMEM bytes, multi-TensorCore-chip?) with safe fallback."""
    cap = None
    try:
        cap = int(pltpu.get_tpu_info().vmem_capacity_bytes)
    except Exception:
        cap = None
    if not cap or cap <= 0:
        cap = 64 * 1024 * 1024          # conservative default (v7x per-core size)
    # v7x-class chips: 64 MiB VMEM per TC and 2 TCs sharing the grid.
    # v5e / v6e: 128 MiB and a single TC.
    multi_core = cap <= 64 * 1024 * 1024
    return cap, multi_core


def _pick_seq_per_block(batch, seq_len, num_heads, embed, hidden,
                        vmem_budget, multi_core, target_rows=512):
    """Pack sequences per grid step so the matmul M dim approaches target_rows.

    Single TC chips (v5e/v6e): use the largest slab that fits (fewest steps,
    biggest MXU M tiles).  Multi-TC chips (v7x): keep >= 2 parallel steps so
    both TensorCores get work, within the (smaller) VMEM budget.
    """
    divisors = [d for d in range(1, batch + 1) if batch % d == 0]

    def step_bytes(bb):
        rows = bb * seq_len
        w = 2 * (embed * 3 * embed + embed * embed + 2 * embed * hidden)  # bf16 weights
        acts = 2 * 2 * rows * embed * 4            # x/out blocks, double-buffered f32
        interm = rows * (4 * embed + hidden) * 4   # qkv / attn / ffn f32 intermediates
        scores = bb * seq_len * seq_len * 4        # one head's f32 scores live at a time
        scratch = rows * embed * 4                 # attention-merge scratch
        return w + acts + interm + scores + scratch

    cands = [d for d in divisors
             if d * seq_len <= target_rows and step_bytes(d) <= vmem_budget]
    if not cands:
        cands = [1]
    bblk = max(cands)
    if multi_core:
        two_step = [d for d in cands if batch // d >= 2]
        if two_step:
            bblk = max(two_step)
    return bblk


def layer1_forward(x, params, num_heads, *, seq_per_block=None,
                   compute_dtype=jnp.bfloat16):
    B, S, E = x.shape
    Hd = params["w1"].shape[1]                     # FFN hidden dim
    Dh = E // num_heads
    scale = 1.0 / math.sqrt(Dh)

    vmem_cap, multi_core = _tpu_vmem_info()
    vmem_budget = vmem_cap - max(8 * 1024 * 1024, vmem_cap // 8)   # leave headroom

    if seq_per_block is None:
        seq_per_block = _pick_seq_per_block(B, S, num_heads, E, Hd,
                                            vmem_budget, multi_core)
    assert B % seq_per_block == 0
    Bblk = seq_per_block
    grid = (B // Bblk,)

    # Host-side weight prep:
    #  * Wq|Wk|Wv fused into one (E, 3E) bf16 matrix, biases into (1, 3E),
    #    with the 1/sqrt(Dh) softmax scale folded into the Wq/bq third.
    #  * The six (1, E) biases / LN params packed into one (6, E) f32 operand.
    wqkv = jnp.concatenate([params["wq"] * scale, params["wk"], params["wv"]],
                           axis=1).astype(compute_dtype)
    bqkv = jnp.concatenate([params["bq"] * scale, params["bk"], params["bv"]],
                           axis=1).astype(jnp.float32)
    wo = params["wo"].astype(compute_dtype)
    w1 = params["w1"].astype(compute_dtype)
    w2 = params["w2"].astype(compute_dtype)
    b1 = params["b1"].astype(jnp.float32)
    vecs = jnp.concatenate([params["bo"], params["ln1_g"], params["ln1_b"],
                            params["b2"], params["ln2_g"], params["ln2_b"]],
                           axis=0).astype(jnp.float32)             # (6, E)

    # Advisory cost estimate so XLA schedules surrounding ops around the call.
    rows_total = B * S
    flops = (2 * rows_total * E * 3 * E            # fused QKV
             + 4 * rows_total * S * E              # scores + P@V (all heads)
             + 2 * rows_total * E * E              # Wo
             + 4 * rows_total * E * Hd)            # FFN (two matmuls)
    cost = pl.CostEstimate(
        flops=int(flops),
        transcendentals=int(B * num_heads * S * S),
        bytes_accessed=int(x.size * x.dtype.itemsize + rows_total * E * 4
                           + 2 * (wqkv.size + wo.size + w1.size + w2.size)
                           + 4 * (bqkv.size + b1.size + vecs.size)))

    def run(single_buffer_weights):
        def inv(shape):
            idx = lambda b: (0,) * len(shape)
            if single_buffer_weights and hasattr(pl, "Buffered"):
                # Grid-invariant operands: double-buffering buys nothing and
                # doubles their resident VMEM (matters on v7x's 64 MiB).
                return pl.BlockSpec(shape, idx, pipeline_mode=pl.Buffered(1))
            return pl.BlockSpec(shape, idx)

        in_specs = [
            pl.BlockSpec((Bblk, S, E), lambda b: (b, 0, 0)),   # x
            inv((E, 3 * E)), inv((1, 3 * E)),                  # Wqkv, bqkv
            inv((E, E)),                                       # Wo
            inv((E, Hd)), inv((1, Hd)), inv((Hd, E)),          # W1, b1, W2
            inv((6, E)),                                       # bo / LN1 / b2 / LN2
        ]
        return pl.pallas_call(
            functools.partial(layer1_kernel, num_heads),
            out_shape=jax.ShapeDtypeStruct((B, S, E), x.dtype),
            grid=grid,
            in_specs=in_specs,
            out_specs=pl.BlockSpec((Bblk, S, E), lambda b: (b, 0, 0)),
            scratch_shapes=[pltpu.VMEM((Bblk, S, E), jnp.float32)],
            compiler_params=pltpu.CompilerParams(
                dimension_semantics=("parallel",),
                vmem_limit_bytes=int(vmem_budget)),
            cost_estimate=cost,
        )(x, wqkv, bqkv, wo, w1, b1, w2, vecs)

    # Single-buffered invariant weights when supported; fall back to default
    # double-buffering if this jax/libtpu build rejects pipeline_mode.
    try:
        return run(True)
    except Exception:
        return run(False)


def reference_forward(x, p, num_heads):
    """Plain-JAX f32 reference (original PyTorch module semantics, eval mode)."""
    B, S, E = x.shape
    Dh = E // num_heads
    q = x @ p["wq"] + p["bq"]
    k = x @ p["wk"] + p["bk"]
    v = x @ p["wv"] + p["bv"]
    q = q.reshape(B, S, num_heads, Dh).transpose(0, 2, 1, 3)
    k = k.reshape(B, S, num_heads, Dh).transpose(0, 2, 1, 3)
    v = v.reshape(B, S, num_heads, Dh).transpose(0, 2, 1, 3)
    s = jnp.einsum("bhqd,bhkd->bhqk", q, k) / jnp.sqrt(jnp.float32(Dh))
    a = jax.nn.softmax(s, axis=-1)
    o = jnp.einsum("bhqk,bhkd->bhqd", a, v).transpose(0, 2, 1, 3).reshape(B, S, E)
    attn = o @ p["wo"] + p["bo"]

    def ln(t, g, b):
        m = t.mean(-1, keepdims=True)
        var = ((t - m) ** 2).mean(-1, keepdims=True)
        return (t - m) / jnp.sqrt(var + LN_EPS) * g + b

    y = ln(x + attn, p["ln1_g"], p["ln1_b"])
    f = jnp.maximum(y @ p["w1"] + p["b1"], 0.0) @ p["w2"] + p["b2"]
    return ln(y + f, p["ln2_g"], p["ln2_b"])


def init_params(key, embed_dim, hidden_dim):
    ks = jax.random.split(key, 8)
    sE = 1.0 / jnp.sqrt(jnp.float32(embed_dim))
    sH = 1.0 / jnp.sqrt(jnp.float32(hidden_dim))
    return {
        "wq": jax.random.normal(ks[0], (embed_dim, embed_dim), jnp.float32) * sE,
        "wk": jax.random.normal(ks[1], (embed_dim, embed_dim), jnp.float32) * sE,
        "wv": jax.random.normal(ks[2], (embed_dim, embed_dim), jnp.float32) * sE,
        "wo": jax.random.normal(ks[3], (embed_dim, embed_dim), jnp.float32) * sE,
        "w1": jax.random.normal(ks[4], (embed_dim, hidden_dim), jnp.float32) * sE,
        "w2": jax.random.normal(ks[5], (hidden_dim, embed_dim), jnp.float32) * sH,
        "bq": jnp.zeros((1, embed_dim), jnp.float32),
        "bk": jnp.zeros((1, embed_dim), jnp.float32),
        "bv": jnp.zeros((1, embed_dim), jnp.float32),
        "bo": jnp.zeros((1, embed_dim), jnp.float32),
        "b1": jnp.zeros((1, hidden_dim), jnp.float32),
        "b2": jnp.zeros((1, embed_dim), jnp.float32),
        "ln1_g": jnp.ones((1, embed_dim), jnp.float32),
        "ln1_b": jnp.zeros((1, embed_dim), jnp.float32),
        "ln2_g": jnp.ones((1, embed_dim), jnp.float32),
        "ln2_b": jnp.zeros((1, embed_dim), jnp.float32),
    }


if __name__ == "__main__":
    # Lane-dense small config: E and hidden multiples of 128, S multiple of 8.
    B, S, embed_dim, hidden_dim, num_heads = 4, 16, 128, 256, 4
    key = jax.random.PRNGKey(0)
    kx, kp = jax.random.split(key)
    x = jax.random.normal(kx, (B, S, embed_dim), jnp.float32)
    params = init_params(kp, embed_dim, hidden_dim)

    out = layer1_forward(x, params, num_heads)
    out = jax.block_until_ready(out)

    ref = reference_forward(x, params, num_heads)
    assert out.shape == (B, S, embed_dim)
    # bf16 MXU operands (f32 accumulation) + approximate softmax reciprocal
    # => tolerance vs the pure-f32 reference is deliberately wider than 1e-4.
    # A head-relayout bug would produce O(1) errors, well outside this band.
    err = jnp.max(jnp.abs(out - ref))
    assert jnp.allclose(out, ref, atol=5e-2, rtol=5e-2), f"mismatch vs reference (max |err|={err})"

    print("KERNEL_OK")
</pallas_src>

<mosaic_0001>
module attributes {stable_mosaic.version = 11 : i64} {
  func.func @layer1_kernel(%arg0: i32, %arg1: memref<2x16x128xf32, #tpu.memory_space<vmem>>, %arg2: memref<128x384xbf16, #tpu.memory_space<vmem>>, %arg3: memref<1x384xf32, #tpu.memory_space<vmem>>, %arg4: memref<128x128xbf16, #tpu.memory_space<vmem>>, %arg5: memref<128x256xbf16, #tpu.memory_space<vmem>>, %arg6: memref<1x256xf32, #tpu.memory_space<vmem>>, %arg7: memref<256x128xbf16, #tpu.memory_space<vmem>>, %arg8: memref<6x128xf32, #tpu.memory_space<vmem>>, %arg9: memref<2x16x128xf32, #tpu.memory_space<vmem>>, %arg10: memref<2x16x128xf32, #tpu.memory_space<vmem>>) attributes {dimension_semantics = [#tpu.dimension_semantics<parallel>], iteration_bounds = array<i64: 2>, scalar_prefetch = 0 : i64, scratch_operands = 1 : i64, tpu.core_type = #tpu.core_type<tc>, window_params = [{transform_indices = @transform_0, window_bounds = array<i64: 2, 16, 128>}, {pipeline_mode = #tpu.pipeline_mode<synchronous>, transform_indices = @transform_1, window_bounds = array<i64: 128, 384>}, {pipeline_mode = #tpu.pipeline_mode<synchronous>, transform_indices = @transform_2, window_bounds = array<i64: 1, 384>}, {pipeline_mode = #tpu.pipeline_mode<synchronous>, transform_indices = @transform_3, window_bounds = array<i64: 128, 128>}, {pipeline_mode = #tpu.pipeline_mode<synchronous>, transform_indices = @transform_4, window_bounds = array<i64: 128, 256>}, {pipeline_mode = #tpu.pipeline_mode<synchronous>, transform_indices = @transform_5, window_bounds = array<i64: 1, 256>}, {pipeline_mode = #tpu.pipeline_mode<synchronous>, transform_indices = @transform_6, window_bounds = array<i64: 256, 128>}, {pipeline_mode = #tpu.pipeline_mode<synchronous>, transform_indices = @transform_7, window_bounds = array<i64: 6, 128>}, {transform_indices = @transform_8, window_bounds = array<i64: 2, 16, 128>}]} {
    %c0 = arith.constant 0 : index
    %c0_0 = arith.constant 0 : index
    %0 = vector.load %arg8[%c0, %c0_0] : memref<6x128xf32, #tpu.memory_space<vmem>>, vector<6x128xf32>
    %1 = vector.extract_strided_slice %0 {offsets = [0, 0], sizes = [1, 128], strides = [1, 1]} : vector<6x128xf32> to vector<1x128xf32>
    %2 = vector.extract_strided_slice %0 {offsets = [1, 0], sizes = [1, 128], strides = [1, 1]} : vector<6x128xf32> to vector<1x128xf32>
    %3 = vector.extract_strided_slice %0 {offsets = [2, 0], sizes = [1, 128], strides = [1, 1]} : vector<6x128xf32> to vector<1x128xf32>
    %4 = vector.extract_strided_slice %0 {offsets = [3, 0], sizes = [1, 128], strides = [1, 1]} : vector<6x128xf32> to vector<1x128xf32>
    %5 = vector.extract_strided_slice %0 {offsets = [4, 0], sizes = [1, 128], strides = [1, 1]} : vector<6x128xf32> to vector<1x128xf32>
    %6 = vector.extract_strided_slice %0 {offsets = [5, 0], sizes = [1, 128], strides = [1, 1]} : vector<6x128xf32> to vector<1x128xf32>
    %c0_1 = arith.constant 0 : index
    %c0_2 = arith.constant 0 : index
    %c0_3 = arith.constant 0 : index
    %7 = vector.load %arg1[%c0_1, %c0_2, %c0_3] : memref<2x16x128xf32, #tpu.memory_space<vmem>>, vector<2x16x128xf32>
    %8 = vector.shape_cast %7 : vector<2x16x128xf32> to vector<32x128xf32>
    %9 = arith.truncf %8 : vector<32x128xf32> to vector<32x128xbf16>
    %c0_4 = arith.constant 0 : index
    %c0_5 = arith.constant 0 : index
    %10 = vector.load %arg2[%c0_4, %c0_5] : memref<128x384xbf16, #tpu.memory_space<vmem>>, vector<128x384xbf16>
    %cst = arith.constant dense<0.000000e+00> : vector<32x384xf32>
    %11 = tpu.matmul %9, %10, %cst {dimension_numbers = #tpu.dot_dimension_numbers<[1], [0], [0], [1], [0, 0, 1, 1], [], []>} : vector<32x128xbf16>, vector<128x384xbf16>, vector<32x384xf32> -> vector<32x384xf32>
    %c0_6 = arith.constant 0 : index
    %c0_7 = arith.constant 0 : index
    %12 = vector.load %arg3[%c0_6, %c0_7] : memref<1x384xf32, #tpu.memory_space<vmem>>, vector<1x384xf32>
    %13 = vector.broadcast %12 : vector<1x384xf32> to vector<32x384xf32>
    %14 = arith.addf %11, %13 : vector<32x384xf32>
    %15 = vector.extract_strided_slice %14 {offsets = [0, 0], sizes = [32, 32], strides = [1, 1]} : vector<32x384xf32> to vector<32x32xf32>
    %16 = vector.shape_cast %15 : vector<32x32xf32> to vector<2x16x32xf32>
    %17 = arith.truncf %16 : vector<2x16x32xf32> to vector<2x16x32xbf16>
    %18 = vector.extract_strided_slice %14 {offsets = [0, 128], sizes = [32, 32], strides = [1, 1]} : vector<32x384xf32> to vector<32x32xf32>
    %19 = vector.shape_cast %18 : vector<32x32xf32> to vector<2x16x32xf32>
    %20 = arith.truncf %19 : vector<2x16x32xf32> to vector<2x16x32xbf16>
    %21 = vector.extract_strided_slice %14 {offsets = [0, 256], sizes = [32, 32], strides = [1, 1]} : vector<32x384xf32> to vector<32x32xf32>
    %22 = vector.shape_cast %21 : vector<32x32xf32> to vector<2x16x32xf32>
    %23 = arith.truncf %22 : vector<2x16x32xf32> to vector<2x16x32xbf16>
    "tpu.trace_start"() <{level = 10 : i32, message = "bqd,bkd->bqk"}> : () -> ()
    %cst_8 = arith.constant dense<0.000000e+00> : vector<2x16x16xf32>
    %24 = tpu.matmul %17, %20, %cst_8 {dimension_numbers = #tpu.dot_dimension_numbers<[2], [2], [1], [1], [0, 0, 0, 1, 1, 1], [0], [0]>} : vector<2x16x32xbf16>, vector<2x16x32xbf16>, vector<2x16x16xf32> -> vector<2x16x16xf32>
    "tpu.trace_stop"() : () -> ()
    %cst_9 = arith.constant dense<0xFF800000> : vector<2x16xf32>
    %25 = vector.multi_reduction <maximumf>, %24, %cst_9 [2] : vector<2x16x16xf32> to vector<2x16xf32>
    %26 = vector.shape_cast %25 : vector<2x16xf32> to vector<2x16x1xf32>
    %27 = vector.broadcast %26 : vector<2x16x1xf32> to vector<2x16x16xf32>
    %28 = arith.subf %24, %27 : vector<2x16x16xf32>
    %29 = math.exp %28 : vector<2x16x16xf32>
    %cst_10 = arith.constant dense<0.000000e+00> : vector<2x16xf32>
    %30 = vector.multi_reduction <add>, %29, %cst_10 [2] : vector<2x16x16xf32> to vector<2x16xf32>
    %31 = vector.shape_cast %30 : vector<2x16xf32> to vector<2x16x1xf32>
    %32 = tpu.reciprocal %31 {approx = true} : vector<2x16x1xf32> -> vector<2x16x1xf32>
    %33 = vector.broadcast %32 : vector<2x16x1xf32> to vector<2x16x16xf32>
    %34 = arith.mulf %29, %33 : vector<2x16x16xf32>
    %35 = arith.truncf %34 : vector<2x16x16xf32> to vector<2x16x16xbf16>
    "tpu.trace_start"() <{level = 10 : i32, message = "bqk,bkd->bqd"}> : () -> ()
    %cst_11 = arith.constant dense<0.000000e+00> : vector<2x16x32xf32>
    %36 = tpu.matmul %35, %23, %cst_11 {dimension_numbers = #tpu.dot_dimension_numbers<[2], [1], [1], [2], [0, 0, 0, 1, 1, 2], [0], [0]>} : vector<2x16x16xbf16>, vector<2x16x32xbf16>, vector<2x16x32xf32> -> vector<2x16x32xf32>
    "tpu.trace_stop"() : () -> ()
    %c0_12 = arith.constant 0 : index
    %c0_13 = arith.constant 0 : index
    %c0_14 = arith.constant 0 : index
    %37 = vector.load %arg10[%c0_12, %c0_13, %c0_14] : memref<2x16x128xf32, #tpu.memory_space<vmem>>, vector<2x16x32xf32>
    tpu.vector_store %arg10[%c0_12, %c0_13, %c0_14], %36 {strides = array<i32>} : memref<2x16x128xf32, #tpu.memory_space<vmem>>, vector<2x16x32xf32>,
    %38 = vector.extract_strided_slice %14 {offsets = [0, 32], sizes = [32, 32], strides = [1, 1]} : vector<32x384xf32> to vector<32x32xf32>
    %39 = vector.shape_cast %38 : vector<32x32xf32> to vector<2x16x32xf32>
    %40 = arith.truncf %39 : vector<2x16x32xf32> to vector<2x16x32xbf16>
    %41 = vector.extract_strided_slice %14 {offsets = [0, 160], sizes = [32, 32], strides = [1, 1]} : vector<32x384xf32> to vector<32x32xf32>
    %42 = vector.shape_cast %41 : vector<32x32xf32> to vector<2x16x32xf32>
    %43 = arith.truncf %42 : vector<2x16x32xf32> to vector<2x16x32xbf16>
    %44 = vector.extract_strided_slice %14 {offsets = [0, 288], sizes = [32, 32], strides = [1, 1]} : vector<32x384xf32> to vector<32x32xf32>
    %45 = vector.shape_cast %44 : vector<32x32xf32> to vector<2x16x32xf32>
    %46 = arith.truncf %45 : vector<2x16x32xf32> to vector<2x16x32xbf16>
    "tpu.trace_start"() <{level = 10 : i32, message = "bqd,bkd->bqk"}> : () -> ()
    %cst_15 = arith.constant dense<0.000000e+00> : vector<2x16x16xf32>
    %47 = tpu.matmul %40, %43, %cst_15 {dimension_numbers = #tpu.dot_dimension_numbers<[2], [2], [1], [1], [0, 0, 0, 1, 1, 1], [0], [0]>} : vector<2x16x32xbf16>, vector<2x16x32xbf16>, vector<2x16x16xf32> -> vector<2x16x16xf32>
    "tpu.trace_stop"() : () -> ()
    %cst_16 = arith.constant dense<0xFF800000> : vector<2x16xf32>
    %48 = vector.multi_reduction <maximumf>, %47, %cst_16 [2] : vector<2x16x16xf32> to vector<2x16xf32>
    %49 = vector.shape_cast %48 : vector<2x16xf32> to vector<2x16x1xf32>
    %50 = vector.broadcast %49 : vector<2x16x1xf32> to vector<2x16x16xf32>
    %51 = arith.subf %47, %50 : vector<2x16x16xf32>
    %52 = math.exp %51 : vector<2x16x16xf32>
    %cst_17 = arith.constant dense<0.000000e+00> : vector<2x16xf32>
    %53 = vector.multi_reduction <add>, %52, %cst_17 [2] : vector<2x16x16xf32> to vector<2x16xf32>
    %54 = vector.shape_cast %53 : vector<2x16xf32> to vector<2x16x1xf32>
    %55 = tpu.reciprocal %54 {approx = true} : vector<2x16x1xf32> -> vector<2x16x1xf32>
    %56 = vector.broadcast %55 : vector<2x16x1xf32> to vector<2x16x16xf32>
    %57 = arith.mulf %52, %56 : vector<2x16x16xf32>
    %58 = arith.truncf %57 : vector<2x16x16xf32> to vector<2x16x16xbf16>
    "tpu.trace_start"() <{level = 10 : i32, message = "bqk,bkd->bqd"}> : () -> ()
    %cst_18 = arith.constant dense<0.000000e+00> : vector<2x16x32xf32>
    %59 = tpu.matmul %58, %46, %cst_18 {dimension_numbers = #tpu.dot_dimension_numbers<[2], [1], [1], [2], [0, 0, 0, 1, 1, 2], [0], [0]>} : vector<2x16x16xbf16>, vector<2x16x32xbf16>, vector<2x16x32xf32> -> vector<2x16x32xf32>
    "tpu.trace_stop"() : () -> ()
    %c0_19 = arith.constant 0 : index
    %c0_20 = arith.constant 0 : index
    %c32 = arith.constant 32 : index
    %60 = vector.load %arg10[%c0_19, %c0_20, %c32] : memref<2x16x128xf32, #tpu.memory_space<vmem>>, vector<2x16x32xf32>
    tpu.vector_store %arg10[%c0_19, %c0_20, %c32], %59 {strides = array<i32>} : memref<2x16x128xf32, #tpu.memory_space<vmem>>, vector<2x16x32xf32>,
    %61 = vector.extract_strided_slice %14 {offsets = [0, 64], sizes = [32, 32], strides = [1, 1]} : vector<32x384xf32> to vector<32x32xf32>
    %62 = vector.shape_cast %61 : vector<32x32xf32> to vector<2x16x32xf32>
    %63 = arith.truncf %62 : vector<2x16x32xf32> to vector<2x16x32xbf16>
    %64 = vector.extract_strided_slice %14 {offsets = [0, 192], sizes = [32, 32], strides = [1, 1]} : vector<32x384xf32> to vector<32x32xf32>
    %65 = vector.shape_cast %64 : vector<32x32xf32> to vector<2x16x32xf32>
    %66 = arith.truncf %65 : vector<2x16x32xf32> to vector<2x16x32xbf16>
    %67 = vector.extract_strided_slice %14 {offsets = [0, 320], sizes = [32, 32], strides = [1, 1]} : vector<32x384xf32> to vector<32x32xf32>
    %68 = vector.shape_cast %67 : vector<32x32xf32> to vector<2x16x32xf32>
    %69 = arith.truncf %68 : vector<2x16x32xf32> to vector<2x16x32xbf16>
    "tpu.trace_start"() <{level = 10 : i32, message = "bqd,bkd->bqk"}> : () -> ()
    %cst_21 = arith.constant dense<0.000000e+00> : vector<2x16x16xf32>
    %70 = tpu.matmul %63, %66, %cst_21 {dimension_numbers = #tpu.dot_dimension_numbers<[2], [2], [1], [1], [0, 0, 0, 1, 1, 1], [0], [0]>} : vector<2x16x32xbf16>, vector<2x16x32xbf16>, vector<2x16x16xf32> -> vector<2x16x16xf32>
    "tpu.trace_stop"() : () -> ()
    %cst_22 = arith.constant dense<0xFF800000> : vector<2x16xf32>
    %71 = vector.multi_reduction <maximumf>, %70, %cst_22 [2] : vector<2x16x16xf32> to vector<2x16xf32>
    %72 = vector.shape_cast %71 : vector<2x16xf32> to vector<2x16x1xf32>
    %73 = vector.broadcast %72 : vector<2x16x1xf32> to vector<2x16x16xf32>
    %74 = arith.subf %70, %73 : vector<2x16x16xf32>
    %75 = math.exp %74 : vector<2x16x16xf32>
    %cst_23 = arith.constant dense<0.000000e+00> : vector<2x16xf32>
    %76 = vector.multi_reduction <add>, %75, %cst_23 [2] : vector<2x16x16xf32> to vector<2x16xf32>
    %77 = vector.shape_cast %76 : vector<2x16xf32> to vector<2x16x1xf32>
    %78 = tpu.reciprocal %77 {approx = true} : vector<2x16x1xf32> -> vector<2x16x1xf32>
    %79 = vector.broadcast %78 : vector<2x16x1xf32> to vector<2x16x16xf32>
    %80 = arith.mulf %75, %79 : vector<2x16x16xf32>
    %81 = arith.truncf %80 : vector<2x16x16xf32> to vector<2x16x16xbf16>
    "tpu.trace_start"() <{level = 10 : i32, message = "bqk,bkd->bqd"}> : () -> ()
    %cst_24 = arith.constant dense<0.000000e+00> : vector<2x16x32xf32>
    %82 = tpu.matmul %81, %69, %cst_24 {dimension_numbers = #tpu.dot_dimension_numbers<[2], [1], [1], [2], [0, 0, 0, 1, 1, 2], [0], [0]>} : vector<2x16x16xbf16>, vector<2x16x32xbf16>, vector<2x16x32xf32> -> vector<2x16x32xf32>
    "tpu.trace_stop"() : () -> ()
    %c0_25 = arith.constant 0 : index
    %c0_26 = arith.constant 0 : index
    %c64 = arith.constant 64 : index
    %83 = vector.load %arg10[%c0_25, %c0_26, %c64] : memref<2x16x128xf32, #tpu.memory_space<vmem>>, vector<2x16x32xf32>
    tpu.vector_store %arg10[%c0_25, %c0_26, %c64], %82 {strides = array<i32>} : memref<2x16x128xf32, #tpu.memory_space<vmem>>, vector<2x16x32xf32>,
    %84 = vector.extract_strided_slice %14 {offsets = [0, 96], sizes = [32, 32], strides = [1, 1]} : vector<32x384xf32> to vector<32x32xf32>
    %85 = vector.shape_cast %84 : vector<32x32xf32> to vector<2x16x32xf32>
    %86 = arith.truncf %85 : vector<2x16x32xf32> to vector<2x16x32xbf16>
    %87 = vector.extract_strided_slice %14 {offsets = [0, 224], sizes = [32, 32], strides = [1, 1]} : vector<32x384xf32> to vector<32x32xf32>
    %88 = vector.shape_cast %87 : vector<32x32xf32> to vector<2x16x32xf32>
    %89 = arith.truncf %88 : vector<2x16x32xf32> to vector<2x16x32xbf16>
    %90 = vector.extract_strided_slice %14 {offsets = [0, 352], sizes = [32, 32], strides = [1, 1]} : vector<32x384xf32> to vector<32x32xf32>
    %91 = vector.shape_cast %90 : vector<32x32xf32> to vector<2x16x32xf32>
    %92 = arith.truncf %91 : vector<2x16x32xf32> to vector<2x16x32xbf16>
    "tpu.trace_start"() <{level = 10 : i32, message = "bqd,bkd->bqk"}> : () -> ()
    %cst_27 = arith.constant dense<0.000000e+00> : vector<2x16x16xf32>
    %93 = tpu.matmul %86, %89, %cst_27 {dimension_numbers = #tpu.dot_dimension_numbers<[2], [2], [1], [1], [0, 0, 0, 1, 1, 1], [0], [0]>} : vector<2x16x32xbf16>, vector<2x16x32xbf16>, vector<2x16x16xf32> -> vector<2x16x16xf32>
    "tpu.trace_stop"() : () -> ()
    %cst_28 = arith.constant dense<0xFF800000> : vector<2x16xf32>
    %94 = vector.multi_reduction <maximumf>, %93, %cst_28 [2] : vector<2x16x16xf32> to vector<2x16xf32>
    %95 = vector.shape_cast %94 : vector<2x16xf32> to vector<2x16x1xf32>
    %96 = vector.broadcast %95 : vector<2x16x1xf32> to vector<2x16x16xf32>
    %97 = arith.subf %93, %96 : vector<2x16x16xf32>
    %98 = math.exp %97 : vector<2x16x16xf32>
    %cst_29 = arith.constant dense<0.000000e+00> : vector<2x16xf32>
    %99 = vector.multi_reduction <add>, %98, %cst_29 [2] : vector<2x16x16xf32> to vector<2x16xf32>
    %100 = vector.shape_cast %99 : vector<2x16xf32> to vector<2x16x1xf32>
    %101 = tpu.reciprocal %100 {approx = true} : vector<2x16x1xf32> -> vector<2x16x1xf32>
    %102 = vector.broadcast %101 : vector<2x16x1xf32> to vector<2x16x16xf32>
    %103 = arith.mulf %98, %102 : vector<2x16x16xf32>
    %104 = arith.truncf %103 : vector<2x16x16xf32> to vector<2x16x16xbf16>
    "tpu.trace_start"() <{level = 10 : i32, message = "bqk,bkd->bqd"}> : () -> ()
    %cst_30 = arith.constant dense<0.000000e+00> : vector<2x16x32xf32>
    %105 = tpu.matmul %104, %92, %cst_30 {dimension_numbers = #tpu.dot_dimension_numbers<[2], [1], [1], [2], [0, 0, 0, 1, 1, 2], [0], [0]>} : vector<2x16x16xbf16>, vector<2x16x32xbf16>, vector<2x16x32xf32> -> vector<2x16x32xf32>
    "tpu.trace_stop"() : () -> ()
    %c0_31 = arith.constant 0 : index
    %c0_32 = arith.constant 0 : index
    %c96 = arith.constant 96 : index
    %106 = vector.load %arg10[%c0_31, %c0_32, %c96] : memref<2x16x128xf32, #tpu.memory_space<vmem>>, vector<2x16x32xf32>
    tpu.vector_store %arg10[%c0_31, %c0_32, %c96], %105 {strides = array<i32>} : memref<2x16x128xf32, #tpu.memory_space<vmem>>, vector<2x16x32xf32>,
    %c0_33 = arith.constant 0 : index
    %c0_34 = arith.constant 0 : index
    %c0_35 = arith.constant 0 : index
    %107 = vector.load %arg10[%c0_33, %c0_34, %c0_35] : memref<2x16x128xf32, #tpu.memory_space<vmem>>, vector<2x16x128xf32>
    %108 = vector.shape_cast %107 : vector<2x16x128xf32> to vector<32x128xf32>
    %109 = arith.truncf %108 : vector<32x128xf32> to vector<32x128xbf16>
    %c0_36 = arith.constant 0 : index
    %c0_37 = arith.constant 0 : index
    %110 = vector.load %arg4[%c0_36, %c0_37] : memref<128x128xbf16, #tpu.memory_space<vmem>>, vector<128x128xbf16>
    %cst_38 = arith.constant dense<0.000000e+00> : vector<32x128xf32>
    %111 = tpu.matmul %109, %110, %cst_38 {dimension_numbers = #tpu.dot_dimension_numbers<[1], [0], [0], [1], [0, 0, 1, 1], [], []>} : vector<32x128xbf16>, vector<128x128xbf16>, vector<32x128xf32> -> vector<32x128xf32>
    %112 = vector.broadcast %1 : vector<1x128xf32> to vector<32x128xf32>
    %113 = arith.addf %111, %112 : vector<32x128xf32>
    %114 = arith.addf %8, %113 : vector<32x128xf32>
    %cst_39 = arith.constant dense<0.000000e+00> : vector<32xf32>
    %115 = vector.multi_reduction <add>, %114, %cst_39 [1] : vector<32x128xf32> to vector<32xf32>
    %116 = vector.shape_cast %115 : vector<32xf32> to vector<32x1xf32>
    %cst_40 = arith.constant 1.280000e+02 : f32
    %117 = vector.broadcast %cst_40 : f32 to vector<32x1xf32>
    %118 = arith.divf %116, %117 : vector<32x1xf32>
    %119 = vector.broadcast %118 : vector<32x1xf32> to vector<32x128xf32>
    %120 = arith.subf %114, %119 : vector<32x128xf32>
    %121 = arith.mulf %120, %120 : vector<32x128xf32>
    %cst_41 = arith.constant dense<0.000000e+00> : vector<32xf32>
    %122 = vector.multi_reduction <add>, %121, %cst_41 [1] : vector<32x128xf32> to vector<32xf32>
    %123 = vector.shape_cast %122 : vector<32xf32> to vector<32x1xf32>
    %cst_42 = arith.constant 1.280000e+02 : f32
    %124 = vector.broadcast %cst_42 : f32 to vector<32x1xf32>
    %125 = arith.divf %123, %124 : vector<32x1xf32>
    %126 = vector.broadcast %118 : vector<32x1xf32> to vector<32x128xf32>
    %127 = arith.subf %114, %126 : vector<32x128xf32>
    %cst_43 = arith.constant 9.99999974E-6 : f32
    %128 = vector.broadcast %cst_43 : f32 to vector<32x1xf32>
    %129 = arith.addf %125, %128 : vector<32x1xf32>
    %130 = math.rsqrt %129 : vector<32x1xf32>
    %131 = vector.broadcast %130 : vector<32x1xf32> to vector<32x128xf32>
    %132 = arith.mulf %127, %131 : vector<32x128xf32>
    %133 = vector.broadcast %2 : vector<1x128xf32> to vector<32x128xf32>
    %134 = arith.mulf %132, %133 : vector<32x128xf32>
    %135 = vector.broadcast %3 : vector<1x128xf32> to vector<32x128xf32>
    %136 = arith.addf %134, %135 : vector<32x128xf32>
    %137 = arith.truncf %136 : vector<32x128xf32> to vector<32x128xbf16>
    %c0_44 = arith.constant 0 : index
    %c0_45 = arith.constant 0 : index
    %138 = vector.load %arg5[%c0_44, %c0_45] : memref<128x256xbf16, #tpu.memory_space<vmem>>, vector<128x256xbf16>
    %cst_46 = arith.constant dense<0.000000e+00> : vector<32x256xf32>
    %139 = tpu.matmul %137, %138, %cst_46 {dimension_numbers = #tpu.dot_dimension_numbers<[1], [0], [0], [1], [0, 0, 1, 1], [], []>} : vector<32x128xbf16>, vector<128x256xbf16>, vector<32x256xf32> -> vector<32x256xf32>
    %c0_47 = arith.constant 0 : index
    %c0_48 = arith.constant 0 : index
    %140 = vector.load %arg6[%c0_47, %c0_48] : memref<1x256xf32, #tpu.memory_space<vmem>>, vector<1x256xf32>
    %141 = vector.broadcast %140 : vector<1x256xf32> to vector<32x256xf32>
    %142 = arith.addf %139, %141 : vector<32x256xf32>
    %cst_49 = arith.constant 0.000000e+00 : f32
    %143 = vector.broadcast %cst_49 : f32 to vector<32x256xf32>
    %144 = arith.maximumf %142, %143 : vector<32x256xf32>
    %145 = arith.truncf %144 : vector<32x256xf32> to vector<32x256xbf16>
    %c0_50 = arith.constant 0 : index
    %c0_51 = arith.constant 0 : index
    %146 = vector.load %arg7[%c0_50, %c0_51] : memref<256x128xbf16, #tpu.memory_space<vmem>>, vector<256x128xbf16>
    %cst_52 = arith.constant dense<0.000000e+00> : vector<32x128xf32>
    %147 = tpu.matmul %145, %146, %cst_52 {dimension_numbers = #tpu.dot_dimension_numbers<[1], [0], [0], [1], [0, 0, 1, 1], [], []>} : vector<32x256xbf16>, vector<256x128xbf16>, vector<32x128xf32> -> vector<32x128xf32>
    %148 = vector.broadcast %4 : vector<1x128xf32> to vector<32x128xf32>
    %149 = arith.addf %147, %148 : vector<32x128xf32>
    %150 = arith.addf %136, %149 : vector<32x128xf32>
    %cst_53 = arith.constant dense<0.000000e+00> : vector<32xf32>
    %151 = vector.multi_reduction <add>, %150, %cst_53 [1] : vector<32x128xf32> to vector<32xf32>
    %152 = vector.shape_cast %151 : vector<32xf32> to vector<32x1xf32>
    %cst_54 = arith.constant 1.280000e+02 : f32
    %153 = vector.broadcast %cst_54 : f32 to vector<32x1xf32>
    %154 = arith.divf %152, %153 : vector<32x1xf32>
    %155 = vector.broadcast %154 : vector<32x1xf32> to vector<32x128xf32>
    %156 = arith.subf %150, %155 : vector<32x128xf32>
    %157 = arith.mulf %156, %156 : vector<32x128xf32>
    %cst_55 = arith.constant dense<0.000000e+00> : vector<32xf32>
    %158 = vector.multi_reduction <add>, %157, %cst_55 [1] : vector<32x128xf32> to vector<32xf32>
    %159 = vector.shape_cast %158 : vector<32xf32> to vector<32x1xf32>
    %cst_56 = arith.constant 1.280000e+02 : f32
    %160 = vector.broadcast %cst_56 : f32 to vector<32x1xf32>
    %161 = arith.divf %159, %160 : vector<32x1xf32>
    %162 = vector.broadcast %154 : vector<32x1xf32> to vector<32x128xf32>
    %163 = arith.subf %150, %162 : vector<32x128xf32>
    %cst_57 = arith.constant 9.99999974E-6 : f32
    %164 = vector.broadcast %cst_57 : f32 to vector<32x1xf32>
    %165 = arith.addf %161, %164 : vector<32x1xf32>
    %166 = math.rsqrt %165 : vector<32x1xf32>
    %167 = vector.broadcast %166 : vector<32x1xf32> to vector<32x128xf32>
    %168 = arith.mulf %163, %167 : vector<32x128xf32>
    %169 = vector.broadcast %5 : vector<1x128xf32> to vector<32x128xf32>
    %170 = arith.mulf %168, %169 : vector<32x128xf32>
    %171 = vector.broadcast %6 : vector<1x128xf32> to vector<32x128xf32>
    %172 = arith.addf %170, %171 : vector<32x128xf32>
    %173 = vector.shape_cast %172 : vector<32x128xf32> to vector<2x16x128xf32>
    %c0_58 = arith.constant 0 : index
    %c0_59 = arith.constant 0 : index
    %c0_60 = arith.constant 0 : index
    %174 = vector.load %arg9[%c0_58, %c0_59, %c0_60] : memref<2x16x128xf32, #tpu.memory_space<vmem>>, vector<2x16x128xf32>
    tpu.vector_store %arg9[%c0_58, %c0_59, %c0_60], %173 {strides = array<i32>} : memref<2x16x128xf32, #tpu.memory_space<vmem>>, vector<2x16x128xf32>,
    return
  }
  func.func @transform_0(%arg0: i32) -> (i32, i32, i32) {
    %c0_i32 = arith.constant 0 : i32
    %c0_i32_0 = arith.constant 0 : i32
    %c0_i32_1 = arith.constant 0 : i32
    return %arg0, %c0_i32, %c0_i32_0 : i32, i32, i32
  }
  func.func @transform_1(%arg0: i32) -> (i32, i32) {
    %c0_i32 = arith.constant 0 : i32
    %c0_i32_0 = arith.constant 0 : i32
    %c0_i32_1 = arith.constant 0 : i32
    return %c0_i32, %c0_i32_0 : i32, i32
  }
  func.func @transform_2(%arg0: i32) -> (i32, i32) {
    %c0_i32 = arith.constant 0 : i32
    %c0_i32_0 = arith.constant 0 : i32
    %c0_i32_1 = arith.constant 0 : i32
    return %c0_i32, %c0_i32_0 : i32, i32
  }
  func.func @transform_3(%arg0: i32) -> (i32, i32) {
    %c0_i32 = arith.constant 0 : i32
    %c0_i32_0 = arith.constant 0 : i32
    %c0_i32_1 = arith.constant 0 : i32
    return %c0_i32, %c0_i32_0 : i32, i32
  }
  func.func @transform_4(%arg0: i32) -> (i32, i32) {
    %c0_i32 = arith.constant 0 : i32
    %c0_i32_0 = arith.constant 0 : i32
    %c0_i32_1 = arith.constant 0 : i32
    return %c0_i32, %c0_i32_0 : i32, i32
  }
  func.func @transform_5(%arg0: i32) -> (i32, i32) {
    %c0_i32 = arith.constant 0 : i32
    %c0_i32_0 = arith.constant 0 : i32
    %c0_i32_1 = arith.constant 0 : i32
    return %c0_i32, %c0_i32_0 : i32, i32
  }
  func.func @transform_6(%arg0: i32) -> (i32, i32) {
    %c0_i32 = arith.constant 0 : i32
    %c0_i32_0 = arith.constant 0 : i32
    %c0_i32_1 = arith.constant 0 : i32
    return %c0_i32, %c0_i32_0 : i32, i32
  }
  func.func @transform_7(%arg0: i32) -> (i32, i32) {
    %c0_i32 = arith.constant 0 : i32
    %c0_i32_0 = arith.constant 0 : i32
    %c0_i32_1 = arith.constant 0 : i32
    return %c0_i32, %c0_i32_0 : i32, i32
  }
  func.func @transform_8(%arg0: i32) -> (i32, i32, i32) {
    %c0_i32 = arith.constant 0 : i32
    %c0_i32_0 = arith.constant 0 : i32
    %c0_i32_1 = arith.constant 0 : i32
    return %arg0, %c0_i32, %c0_i32_0 : i32, i32, i32
  }
}

module attributes {stable_mosaic.version = 11 : i64} {
  func.func @layer1_kernel(%arg0: i32, %arg1: memref<2x16x128xf32, #tpu.memory_space<vmem>>, %arg2: memref<128x384xbf16, #tpu.memory_space<vmem>>, %arg3: memref<1x384xf32, #tpu.memory_space<vmem>>, %arg4: memref<128x128xbf16, #tpu.memory_space<vmem>>, %arg5: memref<128x256xbf16, #tpu.memory_space<vmem>>, %arg6: memref<1x256xf32, #tpu.memory_space<vmem>>, %arg7: memref<256x128xbf16, #tpu.memory_space<vmem>>, %arg8: memref<6x128xf32, #tpu.memory_space<vmem>>, %arg9: memref<2x16x128xf32, #tpu.memory_space<vmem>>, %arg10: memref<2x16x128xf32, #tpu.memory_space<vmem>>) attributes {dimension_semantics = [#tpu.dimension_semantics<parallel>], iteration_bounds = array<i64: 2>, scalar_prefetch = 0 : i64, scratch_operands = 1 : i64, tpu.core_type = #tpu.core_type<tc>, window_params = [{transform_indices = @transform_0, window_bounds = array<i64: 2, 16, 128>}, {pipeline_mode = #tpu.pipeline_mode<synchronous>, transform_indices = @transform_1, window_bounds = array<i64: 128, 384>}, {pipeline_mode = #tpu.pipeline_mode<synchronous>, transform_indices = @transform_2, window_bounds = array<i64: 1, 384>}, {pipeline_mode = #tpu.pipeline_mode<synchronous>, transform_indices = @transform_3, window_bounds = array<i64: 128, 128>}, {pipeline_mode = #tpu.pipeline_mode<synchronous>, transform_indices = @transform_4, window_bounds = array<i64: 128, 256>}, {pipeline_mode = #tpu.pipeline_mode<synchronous>, transform_indices = @transform_5, window_bounds = array<i64: 1, 256>}, {pipeline_mode = #tpu.pipeline_mode<synchronous>, transform_indices = @transform_6, window_bounds = array<i64: 256, 128>}, {pipeline_mode = #tpu.pipeline_mode<synchronous>, transform_indices = @transform_7, window_bounds = array<i64: 6, 128>}, {transform_indices = @transform_8, window_bounds = array<i64: 2, 16, 128>}]} {
    %c0 = arith.constant 0 : index
    %c0_0 = arith.constant 0 : index
    %0 = vector.load %arg8[%c0, %c0_0] : memref<6x128xf32, #tpu.memory_space<vmem>>, vector<6x128xf32>
    %1 = vector.extract_strided_slice %0 {offsets = [0, 0], sizes = [1, 128], strides = [1, 1]} : vector<6x128xf32> to vector<1x128xf32>
    %2 = vector.extract_strided_slice %0 {offsets = [1, 0], sizes = [1, 128], strides = [1, 1]} : vector<6x128xf32> to vector<1x128xf32>
    %3 = vector.extract_strided_slice %0 {offsets = [2, 0], sizes = [1, 128], strides = [1, 1]} : vector<6x128xf32> to vector<1x128xf32>
    %4 = vector.extract_strided_slice %0 {offsets = [3, 0], sizes = [1, 128], strides = [1, 1]} : vector<6x128xf32> to vector<1x128xf32>
    %5 = vector.extract_strided_slice %0 {offsets = [4, 0], sizes = [1, 128], strides = [1, 1]} : vector<6x128xf32> to vector<1x128xf32>
    %6 = vector.extract_strided_slice %0 {offsets = [5, 0], sizes = [1, 128], strides = [1, 1]} : vector<6x128xf32> to vector<1x128xf32>
    %c0_1 = arith.constant 0 : index
    %c0_2 = arith.constant 0 : index
    %c0_3 = arith.constant 0 : index
    %7 = vector.load %arg1[%c0_1, %c0_2, %c0_3] : memref<2x16x128xf32, #tpu.memory_space<vmem>>, vector<2x16x128xf32>
    %8 = vector.shape_cast %7 : vector<2x16x128xf32> to vector<32x128xf32>
    %9 = arith.truncf %8 : vector<32x128xf32> to vector<32x128xbf16>
    %c0_4 = arith.constant 0 : index
    %c0_5 = arith.constant 0 : index
    %10 = vector.load %arg2[%c0_4, %c0_5] : memref<128x384xbf16, #tpu.memory_space<vmem>>, vector<128x384xbf16>
    %cst = arith.constant dense<0.000000e+00> : vector<32x384xf32>
    %11 = tpu.matmul %9, %10, %cst {dimension_numbers = #tpu.dot_dimension_numbers<[1], [0], [0], [1], [0, 0, 1, 1], [], []>} : vector<32x128xbf16>, vector<128x384xbf16>, vector<32x384xf32> -> vector<32x384xf32>
    %c0_6 = arith.constant 0 : index
    %c0_7 = arith.constant 0 : index
    %12 = vector.load %arg3[%c0_6, %c0_7] : memref<1x384xf32, #tpu.memory_space<vmem>>, vector<1x384xf32>
    %13 = vector.broadcast %12 : vector<1x384xf32> to vector<32x384xf32>
    %14 = arith.addf %11, %13 : vector<32x384xf32>
    %15 = vector.extract_strided_slice %14 {offsets = [0, 0], sizes = [32, 32], strides = [1, 1]} : vector<32x384xf32> to vector<32x32xf32>
    %16 = vector.shape_cast %15 : vector<32x32xf32> to vector<2x16x32xf32>
    %17 = arith.truncf %16 : vector<2x16x32xf32> to vector<2x16x32xbf16>
    %18 = vector.extract_strided_slice %14 {offsets = [0, 128], sizes = [32, 32], strides = [1, 1]} : vector<32x384xf32> to vector<32x32xf32>
    %19 = vector.shape_cast %18 : vector<32x32xf32> to vector<2x16x32xf32>
    %20 = arith.truncf %19 : vector<2x16x32xf32> to vector<2x16x32xbf16>
    %21 = vector.extract_strided_slice %14 {offsets = [0, 256], sizes = [32, 32], strides = [1, 1]} : vector<32x384xf32> to vector<32x32xf32>
    %22 = vector.shape_cast %21 : vector<32x32xf32> to vector<2x16x32xf32>
    %23 = arith.truncf %22 : vector<2x16x32xf32> to vector<2x16x32xbf16>
    "tpu.trace_start"() <{level = 10 : i32, message = "bqd,bkd->bqk"}> : () -> ()
    %cst_8 = arith.constant dense<0.000000e+00> : vector<2x16x16xf32>
    %24 = tpu.matmul %17, %20, %cst_8 {dimension_numbers = #tpu.dot_dimension_numbers<[2], [2], [1], [1], [0, 0, 0, 1, 1, 1], [0], [0]>} : vector<2x16x32xbf16>, vector<2x16x32xbf16>, vector<2x16x16xf32> -> vector<2x16x16xf32>
    "tpu.trace_stop"() : () -> ()
    %cst_9 = arith.constant dense<0xFF800000> : vector<2x16xf32>
    %25 = vector.multi_reduction <maximumf>, %24, %cst_9 [2] : vector<2x16x16xf32> to vector<2x16xf32>
    %26 = vector.shape_cast %25 : vector<2x16xf32> to vector<2x16x1xf32>
    %27 = vector.broadcast %26 : vector<2x16x1xf32> to vector<2x16x16xf32>
    %28 = arith.subf %24, %27 : vector<2x16x16xf32>
    %29 = math.exp %28 : vector<2x16x16xf32>
    %cst_10 = arith.constant dense<0.000000e+00> : vector<2x16xf32>
    %30 = vector.multi_reduction <add>, %29, %cst_10 [2] : vector<2x16x16xf32> to vector<2x16xf32>
    %31 = vector.shape_cast %30 : vector<2x16xf32> to vector<2x16x1xf32>
    %32 = tpu.reciprocal %31 {approx = true} : vector<2x16x1xf32> -> vector<2x16x1xf32>
    %33 = vector.broadcast %32 : vector<2x16x1xf32> to vector<2x16x16xf32>
    %34 = arith.mulf %29, %33 : vector<2x16x16xf32>
    %35 = arith.truncf %34 : vector<2x16x16xf32> to vector<2x16x16xbf16>
    "tpu.trace_start"() <{level = 10 : i32, message = "bqk,bkd->bqd"}> : () -> ()
    %cst_11 = arith.constant dense<0.000000e+00> : vector<2x16x32xf32>
    %36 = tpu.matmul %35, %23, %cst_11 {dimension_numbers = #tpu.dot_dimension_numbers<[2], [1], [1], [2], [0, 0, 0, 1, 1, 2], [0], [0]>} : vector<2x16x16xbf16>, vector<2x16x32xbf16>, vector<2x16x32xf32> -> vector<2x16x32xf32>
    "tpu.trace_stop"() : () -> ()
    %c0_12 = arith.constant 0 : index
    %c0_13 = arith.constant 0 : index
    %c0_14 = arith.constant 0 : index
    %37 = vector.load %arg10[%c0_12, %c0_13, %c0_14] : memref<2x16x128xf32, #tpu.memory_space<vmem>>, vector<2x16x32xf32>
    tpu.vector_store %arg10[%c0_12, %c0_13, %c0_14], %36 {strides = array<i32>} : memref<2x16x128xf32, #tpu.memory_space<vmem>>, vector<2x16x32xf32>,
    %38 = vector.extract_strided_slice %14 {offsets = [0, 32], sizes = [32, 32], strides = [1, 1]} : vector<32x384xf32> to vector<32x32xf32>
    %39 = vector.shape_cast %38 : vector<32x32xf32> to vector<2x16x32xf32>
    %40 = arith.truncf %39 : vector<2x16x32xf32> to vector<2x16x32xbf16>
    %41 = vector.extract_strided_slice %14 {offsets = [0, 160], sizes = [32, 32], strides = [1, 1]} : vector<32x384xf32> to vector<32x32xf32>
    %42 = vector.shape_cast %41 : vector<32x32xf32> to vector<2x16x32xf32>
    %43 = arith.truncf %42 : vector<2x16x32xf32> to vector<2x16x32xbf16>
    %44 = vector.extract_strided_slice %14 {offsets = [0, 288], sizes = [32, 32], strides = [1, 1]} : vector<32x384xf32> to vector<32x32xf32>
    %45 = vector.shape_cast %44 : vector<32x32xf32> to vector<2x16x32xf32>
    %46 = arith.truncf %45 : vector<2x16x32xf32> to vector<2x16x32xbf16>
    "tpu.trace_start"() <{level = 10 : i32, message = "bqd,bkd->bqk"}> : () -> ()
    %cst_15 = arith.constant dense<0.000000e+00> : vector<2x16x16xf32>
    %47 = tpu.matmul %40, %43, %cst_15 {dimension_numbers = #tpu.dot_dimension_numbers<[2], [2], [1], [1], [0, 0, 0, 1, 1, 1], [0], [0]>} : vector<2x16x32xbf16>, vector<2x16x32xbf16>, vector<2x16x16xf32> -> vector<2x16x16xf32>
    "tpu.trace_stop"() : () -> ()
    %cst_16 = arith.constant dense<0xFF800000> : vector<2x16xf32>
    %48 = vector.multi_reduction <maximumf>, %47, %cst_16 [2] : vector<2x16x16xf32> to vector<2x16xf32>
    %49 = vector.shape_cast %48 : vector<2x16xf32> to vector<2x16x1xf32>
    %50 = vector.broadcast %49 : vector<2x16x1xf32> to vector<2x16x16xf32>
    %51 = arith.subf %47, %50 : vector<2x16x16xf32>
    %52 = math.exp %51 : vector<2x16x16xf32>
    %cst_17 = arith.constant dense<0.000000e+00> : vector<2x16xf32>
    %53 = vector.multi_reduction <add>, %52, %cst_17 [2] : vector<2x16x16xf32> to vector<2x16xf32>
    %54 = vector.shape_cast %53 : vector<2x16xf32> to vector<2x16x1xf32>
    %55 = tpu.reciprocal %54 {approx = true} : vector<2x16x1xf32> -> vector<2x16x1xf32>
    %56 = vector.broadcast %55 : vector<2x16x1xf32> to vector<2x16x16xf32>
    %57 = arith.mulf %52, %56 : vector<2x16x16xf32>
    %58 = arith.truncf %57 : vector<2x16x16xf32> to vector<2x16x16xbf16>
    "tpu.trace_start"() <{level = 10 : i32, message = "bqk,bkd->bqd"}> : () -> ()
    %cst_18 = arith.constant dense<0.000000e+00> : vector<2x16x32xf32>
    %59 = tpu.matmul %58, %46, %cst_18 {dimension_numbers = #tpu.dot_dimension_numbers<[2], [1], [1], [2], [0, 0, 0, 1, 1, 2], [0], [0]>} : vector<2x16x16xbf16>, vector<2x16x32xbf16>, vector<2x16x32xf32> -> vector<2x16x32xf32>
    "tpu.trace_stop"() : () -> ()
    %c0_19 = arith.constant 0 : index
    %c0_20 = arith.constant 0 : index
    %c32 = arith.constant 32 : index
    %60 = vector.load %arg10[%c0_19, %c0_20, %c32] : memref<2x16x128xf32, #tpu.memory_space<vmem>>, vector<2x16x32xf32>
    tpu.vector_store %arg10[%c0_19, %c0_20, %c32], %59 {strides = array<i32>} : memref<2x16x128xf32, #tpu.memory_space<vmem>>, vector<2x16x32xf32>,
    %61 = vector.extract_strided_slice %14 {offsets = [0, 64], sizes = [32, 32], strides = [1, 1]} : vector<32x384xf32> to vector<32x32xf32>
    %62 = vector.shape_cast %61 : vector<32x32xf32> to vector<2x16x32xf32>
    %63 = arith.truncf %62 : vector<2x16x32xf32> to vector<2x16x32xbf16>
    %64 = vector.extract_strided_slice %14 {offsets = [0, 192], sizes = [32, 32], strides = [1, 1]} : vector<32x384xf32> to vector<32x32xf32>
    %65 = vector.shape_cast %64 : vector<32x32xf32> to vector<2x16x32xf32>
    %66 = arith.truncf %65 : vector<2x16x32xf32> to vector<2x16x32xbf16>
    %67 = vector.extract_strided_slice %14 {offsets = [0, 320], sizes = [32, 32], strides = [1, 1]} : vector<32x384xf32> to vector<32x32xf32>
    %68 = vector.shape_cast %67 : vector<32x32xf32> to vector<2x16x32xf32>
    %69 = arith.truncf %68 : vector<2x16x32xf32> to vector<2x16x32xbf16>
    "tpu.trace_start"() <{level = 10 : i32, message = "bqd,bkd->bqk"}> : () -> ()
    %cst_21 = arith.constant dense<0.000000e+00> : vector<2x16x16xf32>
    %70 = tpu.matmul %63, %66, %cst_21 {dimension_numbers = #tpu.dot_dimension_numbers<[2], [2], [1], [1], [0, 0, 0, 1, 1, 1], [0], [0]>} : vector<2x16x32xbf16>, vector<2x16x32xbf16>, vector<2x16x16xf32> -> vector<2x16x16xf32>
    "tpu.trace_stop"() : () -> ()
    %cst_22 = arith.constant dense<0xFF800000> : vector<2x16xf32>
    %71 = vector.multi_reduction <maximumf>, %70, %cst_22 [2] : vector<2x16x16xf32> to vector<2x16xf32>
    %72 = vector.shape_cast %71 : vector<2x16xf32> to vector<2x16x1xf32>
    %73 = vector.broadcast %72 : vector<2x16x1xf32> to vector<2x16x16xf32>
    %74 = arith.subf %70, %73 : vector<2x16x16xf32>
    %75 = math.exp %74 : vector<2x16x16xf32>
    %cst_23 = arith.constant dense<0.000000e+00> : vector<2x16xf32>
    %76 = vector.multi_reduction <add>, %75, %cst_23 [2] : vector<2x16x16xf32> to vector<2x16xf32>
    %77 = vector.shape_cast %76 : vector<2x16xf32> to vector<2x16x1xf32>
    %78 = tpu.reciprocal %77 {approx = true} : vector<2x16x1xf32> -> vector<2x16x1xf32>
    %79 = vector.broadcast %78 : vector<2x16x1xf32> to vector<2x16x16xf32>
    %80 = arith.mulf %75, %79 : vector<2x16x16xf32>
    %81 = arith.truncf %80 : vector<2x16x16xf32> to vector<2x16x16xbf16>
    "tpu.trace_start"() <{level = 10 : i32, message = "bqk,bkd->bqd"}> : () -> ()
    %cst_24 = arith.constant dense<0.000000e+00> : vector<2x16x32xf32>
    %82 = tpu.matmul %81, %69, %cst_24 {dimension_numbers = #tpu.dot_dimension_numbers<[2], [1], [1], [2], [0, 0, 0, 1, 1, 2], [0], [0]>} : vector<2x16x16xbf16>, vector<2x16x32xbf16>, vector<2x16x32xf32> -> vector<2x16x32xf32>
    "tpu.trace_stop"() : () -> ()
    %c0_25 = arith.constant 0 : index
    %c0_26 = arith.constant 0 : index
    %c64 = arith.constant 64 : index
    %83 = vector.load %arg10[%c0_25, %c0_26, %c64] : memref<2x16x128xf32, #tpu.memory_space<vmem>>, vector<2x16x32xf32>
    tpu.vector_store %arg10[%c0_25, %c0_26, %c64], %82 {strides = array<i32>} : memref<2x16x128xf32, #tpu.memory_space<vmem>>, vector<2x16x32xf32>,
    %84 = vector.extract_strided_slice %14 {offsets = [0, 96], sizes = [32, 32], strides = [1, 1]} : vector<32x384xf32> to vector<32x32xf32>
    %85 = vector.shape_cast %84 : vector<32x32xf32> to vector<2x16x32xf32>
    %86 = arith.truncf %85 : vector<2x16x32xf32> to vector<2x16x32xbf16>
    %87 = vector.extract_strided_slice %14 {offsets = [0, 224], sizes = [32, 32], strides = [1, 1]} : vector<32x384xf32> to vector<32x32xf32>
    %88 = vector.shape_cast %87 : vector<32x32xf32> to vector<2x16x32xf32>
    %89 = arith.truncf %88 : vector<2x16x32xf32> to vector<2x16x32xbf16>
    %90 = vector.extract_strided_slice %14 {offsets = [0, 352], sizes = [32, 32], strides = [1, 1]} : vector<32x384xf32> to vector<32x32xf32>
    %91 = vector.shape_cast %90 : vector<32x32xf32> to vector<2x16x32xf32>
    %92 = arith.truncf %91 : vector<2x16x32xf32> to vector<2x16x32xbf16>
    "tpu.trace_start"() <{level = 10 : i32, message = "bqd,bkd->bqk"}> : () -> ()
    %cst_27 = arith.constant dense<0.000000e+00> : vector<2x16x16xf32>
    %93 = tpu.matmul %86, %89, %cst_27 {dimension_numbers = #tpu.dot_dimension_numbers<[2], [2], [1], [1], [0, 0, 0, 1, 1, 1], [0], [0]>} : vector<2x16x32xbf16>, vector<2x16x32xbf16>, vector<2x16x16xf32> -> vector<2x16x16xf32>
    "tpu.trace_stop"() : () -> ()
    %cst_28 = arith.constant dense<0xFF800000> : vector<2x16xf32>
    %94 = vector.multi_reduction <maximumf>, %93, %cst_28 [2] : vector<2x16x16xf32> to vector<2x16xf32>
    %95 = vector.shape_cast %94 : vector<2x16xf32> to vector<2x16x1xf32>
    %96 = vector.broadcast %95 : vector<2x16x1xf32> to vector<2x16x16xf32>
    %97 = arith.subf %93, %96 : vector<2x16x16xf32>
    %98 = math.exp %97 : vector<2x16x16xf32>
    %cst_29 = arith.constant dense<0.000000e+00> : vector<2x16xf32>
    %99 = vector.multi_reduction <add>, %98, %cst_29 [2] : vector<2x16x16xf32> to vector<2x16xf32>
    %100 = vector.shape_cast %99 : vector<2x16xf32> to vector<2x16x1xf32>
    %101 = tpu.reciprocal %100 {approx = true} : vector<2x16x1xf32> -> vector<2x16x1xf32>
    %102 = vector.broadcast %101 : vector<2x16x1xf32> to vector<2x16x16xf32>
    %103 = arith.mulf %98, %102 : vector<2x16x16xf32>
    %104 = arith.truncf %103 : vector<2x16x16xf32> to vector<2x16x16xbf16>
    "tpu.trace_start"() <{level = 10 : i32, message = "bqk,bkd->bqd"}> : () -> ()
    %cst_30 = arith.constant dense<0.000000e+00> : vector<2x16x32xf32>
    %105 = tpu.matmul %104, %92, %cst_30 {dimension_numbers = #tpu.dot_dimension_numbers<[2], [1], [1], [2], [0, 0, 0, 1, 1, 2], [0], [0]>} : vector<2x16x16xbf16>, vector<2x16x32xbf16>, vector<2x16x32xf32> -> vector<2x16x32xf32>
    "tpu.trace_stop"() : () -> ()
    %c0_31 = arith.constant 0 : index
    %c0_32 = arith.constant 0 : index
    %c96 = arith.constant 96 : index
    %106 = vector.load %arg10[%c0_31, %c0_32, %c96] : memref<2x16x128xf32, #tpu.memory_space<vmem>>, vector<2x16x32xf32>
    tpu.vector_store %arg10[%c0_31, %c0_32, %c96], %105 {strides = array<i32>} : memref<2x16x128xf32, #tpu.memory_space<vmem>>, vector<2x16x32xf32>,
    %c0_33 = arith.constant 0 : index
    %c0_34 = arith.constant 0 : index
    %c0_35 = arith.constant 0 : index
    %107 = vector.load %arg10[%c0_33, %c0_34, %c0_35] : memref<2x16x128xf32, #tpu.memory_space<vmem>>, vector<2x16x128xf32>
    %108 = vector.shape_cast %107 : vector<2x16x128xf32> to vector<32x128xf32>
    %109 = arith.truncf %108 : vector<32x128xf32> to vector<32x128xbf16>
    %c0_36 = arith.constant 0 : index
    %c0_37 = arith.constant 0 : index
    %110 = vector.load %arg4[%c0_36, %c0_37] : memref<128x128xbf16, #tpu.memory_space<vmem>>, vector<128x128xbf16>
    %cst_38 = arith.constant dense<0.000000e+00> : vector<32x128xf32>
    %111 = tpu.matmul %109, %110, %cst_38 {dimension_numbers = #tpu.dot_dimension_numbers<[1], [0], [0], [1], [0, 0, 1, 1], [], []>} : vector<32x128xbf16>, vector<128x128xbf16>, vector<32x128xf32> -> vector<32x128xf32>
    %112 = vector.broadcast %1 : vector<1x128xf32> to vector<32x128xf32>
    %113 = arith.addf %111, %112 : vector<32x128xf32>
    %114 = arith.addf %8, %113 : vector<32x128xf32>
    %cst_39 = arith.constant dense<0.000000e+00> : vector<32xf32>
    %115 = vector.multi_reduction <add>, %114, %cst_39 [1] : vector<32x128xf32> to vector<32xf32>
    %116 = vector.shape_cast %115 : vector<32xf32> to vector<32x1xf32>
    %cst_40 = arith.constant 1.280000e+02 : f32
    %117 = vector.broadcast %cst_40 : f32 to vector<32x1xf32>
    %118 = arith.divf %116, %117 : vector<32x1xf32>
    %119 = vector.broadcast %118 : vector<32x1xf32> to vector<32x128xf32>
    %120 = arith.subf %114, %119 : vector<32x128xf32>
    %121 = arith.mulf %120, %120 : vector<32x128xf32>
    %cst_41 = arith.constant dense<0.000000e+00> : vector<32xf32>
    %122 = vector.multi_reduction <add>, %121, %cst_41 [1] : vector<32x128xf32> to vector<32xf32>
    %123 = vector.shape_cast %122 : vector<32xf32> to vector<32x1xf32>
    %cst_42 = arith.constant 1.280000e+02 : f32
    %124 = vector.broadcast %cst_42 : f32 to vector<32x1xf32>
    %125 = arith.divf %123, %124 : vector<32x1xf32>
    %126 = vector.broadcast %118 : vector<32x1xf32> to vector<32x128xf32>
    %127 = arith.subf %114, %126 : vector<32x128xf32>
    %cst_43 = arith.constant 9.99999974E-6 : f32
    %128 = vector.broadcast %cst_43 : f32 to vector<32x1xf32>
    %129 = arith.addf %125, %128 : vector<32x1xf32>
    %130 = math.rsqrt %129 : vector<32x1xf32>
    %131 = vector.broadcast %130 : vector<32x1xf32> to vector<32x128xf32>
    %132 = arith.mulf %127, %131 : vector<32x128xf32>
    %133 = vector.broadcast %2 : vector<1x128xf32> to vector<32x128xf32>
    %134 = arith.mulf %132, %133 : vector<32x128xf32>
    %135 = vector.broadcast %3 : vector<1x128xf32> to vector<32x128xf32>
    %136 = arith.addf %134, %135 : vector<32x128xf32>
    %137 = arith.truncf %136 : vector<32x128xf32> to vector<32x128xbf16>
    %c0_44 = arith.constant 0 : index
    %c0_45 = arith.constant 0 : index
    %138 = vector.load %arg5[%c0_44, %c0_45] : memref<128x256xbf16, #tpu.memory_space<vmem>>, vector<128x256xbf16>
    %cst_46 = arith.constant dense<0.000000e+00> : vector<32x256xf32>
    %139 = tpu.matmul %137, %138, %cst_46 {dimension_numbers = #tpu.dot_dimension_numbers<[1], [0], [0], [1], [0, 0, 1, 1], [], []>} : vector<32x128xbf16>, vector<128x256xbf16>, vector<32x256xf32> -> vector<32x256xf32>
    %c0_47 = arith.constant 0 : index
    %c0_48 = arith.constant 0 : index
    %140 = vector.load %arg6[%c0_47, %c0_48] : memref<1x256xf32, #tpu.memory_space<vmem>>, vector<1x256xf32>
    %141 = vector.broadcast %140 : vector<1x256xf32> to vector<32x256xf32>
    %142 = arith.addf %139, %141 : vector<32x256xf32>
    %cst_49 = arith.constant 0.000000e+00 : f32
    %143 = vector.broadcast %cst_49 : f32 to vector<32x256xf32>
    %144 = arith.maximumf %142, %143 : vector<32x256xf32>
    %145 = arith.truncf %144 : vector<32x256xf32> to vector<32x256xbf16>
    %c0_50 = arith.constant 0 : index
    %c0_51 = arith.constant 0 : index
    %146 = vector.load %arg7[%c0_50, %c0_51] : memref<256x128xbf16, #tpu.memory_space<vmem>>, vector<256x128xbf16>
    %cst_52 = arith.constant dense<0.000000e+00> : vector<32x128xf32>
    %147 = tpu.matmul %145, %146, %cst_52 {dimension_numbers = #tpu.dot_dimension_numbers<[1], [0], [0], [1], [0, 0, 1, 1], [], []>} : vector<32x256xbf16>, vector<256x128xbf16>, vector<32x128xf32> -> vector<32x128xf32>
    %148 = vector.broadcast %4 : vector<1x128xf32> to vector<32x128xf32>
    %149 = arith.addf %147, %148 : vector<32x128xf32>
    %150 = arith.addf %136, %149 : vector<32x128xf32>
    %cst_53 = arith.constant dense<0.000000e+00> : vector<32xf32>
    %151 = vector.multi_reduction <add>, %150, %cst_53 [1] : vector<32x128xf32> to vector<32xf32>
    %152 = vector.shape_cast %151 : vector<32xf32> to vector<32x1xf32>
    %cst_54 = arith.constant 1.280000e+02 : f32
    %153 = vector.broadcast %cst_54 : f32 to vector<32x1xf32>
    %154 = arith.divf %152, %153 : vector<32x1xf32>
    %155 = vector.broadcast %154 : vector<32x1xf32> to vector<32x128xf32>
    %156 = arith.subf %150, %155 : vector<32x128xf32>
    %157 = arith.mulf %156, %156 : vector<32x128xf32>
    %cst_55 = arith.constant dense<0.000000e+00> : vector<32xf32>
    %158 = vector.multi_reduction <add>, %157, %cst_55 [1] : vector<32x128xf32> to vector<32xf32>
    %159 = vector.shape_cast %158 : vector<32xf32> to vector<32x1xf32>
    %cst_56 = arith.constant 1.280000e+02 : f32
    %160 = vector.broadcast %cst_56 : f32 to vector<32x1xf32>
    %161 = arith.divf %159, %160 : vector<32x1xf32>
    %162 = vector.broadcast %154 : vector<32x1xf32> to vector<32x128xf32>
    %163 = arith.subf %150, %162 : vector<32x128xf32>
    %cst_57 = arith.constant 9.99999974E-6 : f32
    %164 = vector.broadcast %cst_57 : f32 to vector<32x1xf32>
    %165 = arith.addf %161, %164 : vector<32x1xf32>
    %166 = math.rsqrt %165 : vector<32x1xf32>
    %167 = vector.broadcast %166 : vector<32x1xf32> to vector<32x128xf32>
    %168 = arith.mulf %163, %167 : vector<32x128xf32>
    %169 = vector.broadcast %5 : vector<1x128xf32> to vector<32x128xf32>
    %170 = arith.mulf %168, %169 : vector<32x128xf32>
    %171 = vector.broadcast %6 : vector<1x128xf32> to vector<32x128xf32>
    %172 = arith.addf %170, %171 : vector<32x128xf32>
    %173 = vector.shape_cast %172 : vector<32x128xf32> to vector<2x16x128xf32>
    %c0_58 = arith.constant 0 : index
    %c0_59 = arith.constant 0 : index
    %c0_60 = arith.constant 0 : index
    %174 = vector.load %arg9[%c0_58, %c0_59, %c0_60] : memref<2x16x128xf32, #tpu.memory_space<vmem>>, vector<2x16x128xf32>
    tpu.vector_store %arg9[%c0_58, %c0_59, %c0_60], %173 {strides = array<i32>} : memref<2x16x128xf32, #tpu.memory_space<vmem>>, vector<2x16x128xf32>,
    return
  }
  func.func @transform_0(%arg0: i32) -> (i32, i32, i32) {
    %c0_i32 = arith.constant 0 : i32
    %c0_i32_0 = arith.constant 0 : i32
    %c0_i32_1 = arith.constant 0 : i32
    return %arg0, %c0_i32, %c0_i32_0 : i32, i32, i32
  }
  func.func @transform_1(%arg0: i32) -> (i32, i32) {
    %c0_i32 = arith.constant 0 : i32
    %c0_i32_0 = arith.constant 0 : i32
    %c0_i32_1 = arith.constant 0 : i32
    return %c0_i32, %c0_i32_0 : i32, i32
  }
  func.func @transform_2(%arg0: i32) -> (i32, i32) {
    %c0_i32 = arith.constant 0 : i32
    %c0_i32_0 = arith.constant 0 : i32
    %c0_i32_1 = arith.constant 0 : i32
    return %c0_i32, %c0_i32_0 : i32, i32
  }
  func.func @transform_3(%arg0: i32) -> (i32, i32) {
    %c0_i32 = arith.constant 0 : i32
    %c0_i32_0 = arith.constant 0 : i32
    %c0_i32_1 = arith.constant 0 : i32
    return %c0_i32, %c0_i32_0 : i32, i32
  }
  func.func @transform_4(%arg0: i32) -> (i32, i32) {
    %c0_i32 = arith.constant 0 : i32
    %c0_i32_0 = arith.constant 0 : i32
    %c0_i32_1 = arith.constant 0 : i32
    return %c0_i32, %c0_i32_0 : i32, i32
  }
  func.func @transform_5(%arg0: i32) -> (i32, i32) {
    %c0_i32 = arith.constant 0 : i32
    %c0_i32_0 = arith.constant 0 : i32
    %c0_i32_1 = arith.constant 0 : i32
    return %c0_i32, %c0_i32_0 : i32, i32
  }
  func.func @transform_6(%arg0: i32) -> (i32, i32) {
    %c0_i32 = arith.constant 0 : i32
    %c0_i32_0 = arith.constant 0 : i32
    %c0_i32_1 = arith.constant 0 : i32
    return %c0_i32, %c0_i32_0 : i32, i32
  }
  func.func @transform_7(%arg0: i32) -> (i32, i32) {
    %c0_i32 = arith.constant 0 : i32
    %c0_i32_0 = arith.constant 0 : i32
    %c0_i32_1 = arith.constant 0 : i32
    return %c0_i32, %c0_i32_0 : i32, i32
  }
  func.func @transform_8(%arg0: i32) -> (i32, i32, i32) {
    %c0_i32 = arith.constant 0 : i32
    %c0_i32_0 = arith.constant 0 : i32
    %c0_i32_1 = arith.constant 0 : i32
    return %arg0, %c0_i32, %c0_i32_0 : i32, i32, i32
  }
}

</mosaic_0001>

<bundles_post_ra>
// kernel: tpu_custom_call.1
= control target key start
LH: loop header
LB: loop body
LE: loop exit
PB: predicated region body
PF: predicated region fallthrough
CT: control target
= control target key end

     0   :  { %s3903_s0 = inlined_call_operand.hbm [shape: f32[4,16,128], index: 0, kind: input, shape index: {}]   ;;  %s3904_s1 = inlined_call_operand.hbm [shape: bf16[128,384], index: 1, kind: input, shape index: {}]   ;;  %s3905_s2 = inlined_call_operand.vmem [shape: f32[1,384], index: 2, kind: input, shape index: {}]   ;;  %s3906_s3 = inlined_call_operand.hbm [shape: bf16[128,128], index: 3, kind: input, shape index: {}]   ;;  %s3907_s4 = inlined_call_operand.hbm [shape: bf16[128,256], index: 4, kind: input, shape index: {}]   ;;  %s3908_s5 = inlined_call_operand.hbm [shape: f32[1,256], index: 5, kind: input, shape index: {}]   ;;  %s3909_s6 = inlined_call_operand.hbm [shape: bf16[256,128], index: 6, kind: input, shape index: {}]   ;;  %s3910_s7 = inlined_call_operand.vmem [shape: f32[6,128], index: 7, kind: input, shape index: {}]   ;;  %s3911_s8 = inlined_call_operand.hbm [shape: f32[4,16,128], index: 8, kind: output, shape index: {}]  }
   0x1   :  { %3918 = sst [smem:[#allocation20_spill]] %s3904_s1 }
   0x2   :  { %3919 = sst [smem:[#allocation21_spill]] %s3906_s3 }
   0x3   :  { %13 = vsyncpa [#allocation4], 0 }
   0x4   :  { %15 = vsyncpa [#allocation4 + $0x1], 0 }
   0x5   :  { %16 = vsyncpa [#allocation7], 0 }
   0x6   :  { %17 = vsyncpa [#allocation10], 0 }
   0x7   :  { %18 = vsyncpa [#allocation13], 0 }
   0x8   :  { %19 = vsyncpa [#allocation5], 0 }
   0x9   :  { %21 = vsyncpa [#allocation5 + $0x1], 0  ;;  %s3371_s27 = smov 0   ;;  %s3373_s28 = smov 0  }
   0xa   :  { %s3375_s29 = smov 0   ;;  %s3377_s30 = smov 0  }
   0xb LB: > { %s3305_s9 = smov [#allocation6]   ;;  %s3392_s11 = sadd.s32 4294967295, %s3303_s30   ;;  %s3303_s30 = sphi %s3377_s30, %s3946_s30   ;;  %s3299_s29 = sphi %s3375_s29, %s3945_s29   ;;  %s3295_s28 = sphi %s3373_s28, %s3944_s28   ;;  %s3291_s27 = sphi %s3371_s27, %s3943_s27  }
   0xc   : > { %s243_s10 = sshll.u32 %s3305_s9, 4  ;;  %p2469_p0 = scmp.ge.s32.totalorder %s3303_s30, 1  ;;  %s244_s10 = int_to_ptr.vmem [resolvable:$true] %s243_s10 }
   0xd   : > { %p3912_p1 = scmp.eq.s32.totalorder %s3392_s11, 0  ;;  %p231_p2 = scmp.lt.s32.totalorder %s3303_s30, 3 }
   0xe   : > { %s3306_s13 = smov [#allocation9]   ;;  %s3307_s16 = smov [#allocation8]  }
   0xf   : > { %p3397_p3 = pnand %p2469_p0, %p231_p2  ;;  %s272_s14 = sshll.u32 %s3306_s13, 4  ;;  %s3410_s14 = int_to_ptr.vmem [resolvable:$true] %s272_s14 }
  0x10   : > { %s3412_s17 = sshll.u32 %s3307_s16, 4  ;;  %s3080_s19 = scalar_lea.vmem %s244_s10, 3072  ;;  %s260_s17 = int_to_ptr.vmem [resolvable:$true] %s3412_s17 }
  0x11   : > { %s3920_s12 = scalar_select %p3397_p3, 1, 0 }
  0x12   : > { %p2818_p5 = pneg %p3397_p3  ;;  %p3081_p8 = scmp.ne.s32.totalorder %s244_s10, %s3080_s19 }
  0x13   : > { %p3088_p11 = scmp.lt.s32.totalorder %s244_s10, %s244_s10  ;;  %p3089_p12 = scmp.lt.s32.totalorder %s3080_s19, %s3080_s19 }
  0x14   : > { %p3406_p6 = pnand %p2818_p5, %p3912_p1 }
  0x15   : > { %p3090_p13 = por %p3089_p12, %p3088_p11 }
  0x16   : > { %p3416_p7 = pneg %p3406_p6 }
  0x18   : > { %p3083_p9 = pnand %p3081_p8, %p3416_p7 }
  0x1a   : > { %p3084_p10 = pneg %p3083_p9 }
  0x1c   : > { %p3091_p0 = pnand %p3090_p13, %p3084_p10 }
  0x1e   : > { %3094 = shalt.err (!%p3091_p0)
}
  0x1f   : > { %s3308_s20 = smov 192   ;;  %s3309_s21 = smov 12  }
  0x20   : > { %s3923_s1 = sld [smem:[#allocation20_spill]]  ;;  %s3106_s24 = scalar_lea.vmem %s3410_s14, 2048 }
  0x21   : > { %p3107_p2 = scmp.ne.s32.totalorder %s3410_s14, %s3106_s24  ;;  %p3114_p9 = scmp.lt.s32.totalorder %s3410_s14, %s3410_s14 }
  0x22   : > { %p3115_p10 = scmp.lt.s32.totalorder %s3106_s24, %s3106_s24 }
  0x23   : > { %p3109_p5 = pnand %p3107_p2, %p3416_p7 }
  0x24   : > { %p3116_p11 = por %p3115_p10, %p3114_p9 }
  0x25   : > { %p3110_p8 = pneg %p3109_p5 }
  0x26   : > { %2821 = dma.hbm_to_vmem [thread:$0]  (!%p3406_p6), %s3923_s1, 3072, %s244_s10, [#allocation7], %s3308_s20, %s3308_s20, %s3309_s21  }
  0x27   : > { %p3117_p12 = pnand %p3116_p11, %p3110_p8 }
  0x29   : > { %3120 = shalt.err (!%p3117_p12)
}
  0x2a   : > { %s3914_s25 = smov 128   ;;  %s3915_s26 = smov 8  }
  0x2b   : > { %2827 = dma.hbm_to_vmem [thread:$0]  (!%p3406_p6), %s3907_s4, 2048, %s3410_s14, [#allocation10], %s3914_s25, %s3914_s25, %s3915_s26  }
  0x2c   : > { %s3132_s13 = scalar_lea.vmem %s260_s17, 1024  ;;  %p3140_p5 = scmp.lt.s32.totalorder %s260_s17, %s260_s17 }
  0x2d   : > { %p3133_p13 = scmp.ne.s32.totalorder %s260_s17, %s3132_s13  ;;  %p3141_p8 = scmp.lt.s32.totalorder %s3132_s13, %s3132_s13 }
  0x2f   : > { %p3135_p0 = pnand %p3133_p13, %p3416_p7  ;;  %p3142_p9 = por %p3141_p8, %p3140_p5 }
  0x31   : > { %p3136_p2 = pneg %p3135_p0 }
  0x33   : > { %p3143_p10 = pnand %p3142_p9, %p3136_p2 }
  0x35   : > { %3146 = shalt.err (!%p3143_p10)
}
  0x36   : > { %s3312_s16 = smov 64   ;;  %s3313_s19 = smov 4  }
  0x37   : > { %s3924_s3 = sld [smem:[#allocation21_spill]]  ;;  %s3314_s21 = smov [#allocation11]  }
  0x38   : > { %s286_s22 = sshll.u32 %s3314_s21, 4  ;;  %s3315_s23 = smov [#allocation12]   ;;  %s287_s22 = int_to_ptr.vmem [resolvable:$true] %s286_s22 }
  0x39   : > { %s296_s24 = sshll.u32 %s3315_s23, 4  ;;  %s3158_s9 = scalar_lea.vmem %s287_s22, 32  ;;  %s297_s24 = int_to_ptr.vmem [resolvable:$true] %s296_s24 }
  0x3a   : > { %p3159_p11 = scmp.ne.s32.totalorder %s287_s22, %s3158_s9  ;;  %p3166_p0 = scmp.lt.s32.totalorder %s287_s22, %s287_s22 }
  0x3b   : > { %p3167_p2 = scmp.lt.s32.totalorder %s3158_s9, %s3158_s9 }
  0x3c   : > { %p3161_p12 = pnand %p3159_p11, %p3416_p7 }
  0x3d   : > { %2824 = dma.hbm_to_vmem [thread:$0]  (!%p3406_p6), %s3924_s3, 1024, %s260_s17, [#allocation7], %s3312_s16, %s3312_s16, %s3313_s19  }
  0x3e   : > { %p3162_p13 = pneg %p3161_p12  ;;  %p3168_p5 = por %p3167_p2, %p3166_p0 }
  0x40   : > { %p3169_p8 = pnand %p3168_p5, %p3162_p13 }
  0x42   : > { %3172 = shalt.err (!%p3169_p8)
}
  0x43   : > { %2830 = dma.hbm_to_vmem [thread:$0]  (!%p3406_p6), %s3908_s5, 32, %s287_s22, [#allocation10]  }
  0x44   : > { %s3184_s17 = scalar_lea.vmem %s297_s24, 2048  ;;  %p3192_p11 = scmp.lt.s32.totalorder %s297_s24, %s297_s24 }
  0x45   : > { %p3185_p9 = scmp.ne.s32.totalorder %s297_s24, %s3184_s17  ;;  %p3193_p12 = scmp.lt.s32.totalorder %s3184_s17, %s3184_s17 }
  0x47   : > { %p3187_p10 = pnand %p3185_p9, %p3416_p7  ;;  %p3194_p1 = por %p3193_p12, %p3192_p11 }
  0x49   : > { %p3188_p4 = pneg %p3187_p10 }
  0x4b   : > { %p3195_p3 = pnand %p3194_p1, %p3188_p4 }
  0x4d   : > { %3198 = shalt.err (!%p3195_p3)
}
  0x4e   : > { %2833 = dma.hbm_to_vmem [thread:$0]  (!%p3406_p6), %s3909_s6, 2048, %s297_s24, [#allocation13], %s3312_s16, %s3312_s16, %s3313_s19  }
  0x4f   : > { %s2468_s15 = sadd.s32 4294967294, %s3303_s30   ;;  %s3472_s18 = sadd.s32 1, %s3303_s30  }
  0x50   : > { %s34_s21 = sadd.s32 1, %s3299_s29  ;;  %s31_s22 = ssub.s32 %s3303_s30, %s3472_s18 }
  0x51   : > { %p41_p1 = scmp.ne.s32.totalorder %s3299_s29, %s3295_s28  ;;  %p32_p3 = scmp.eq.s32.totalorder %s31_s22, 0 }
  0x52   : > { %p42_p4 = scmp.eq.s32.totalorder %s3303_s30, 0  ;;  %p47_p7 = scmp.ne.s32.totalorder %s3295_s28, %s3291_s27 }
  0x53   : > { %p218_p13 = scmp.eq.s32.totalorder %s3392_s11, 1  ;;  %p3925_p2 = scmp.eq.s32.totalorder %s3392_s11, 0 }
  0x54   : > { %s3484_s23 = scalar_select %p32_p3, %s3299_s29, %s34_s21  }
  0x55   : > { %p43_p0 = por %p42_p4, %p41_p1  ;;  %p3488_p5 = por %p3925_p2, %p47_p7 }
  0x56   : > { %p3492_p6 = por %p218_p13, %p41_p1  ;;  %p224_p8 = scmp.eq.s32.totalorder %s2468_s15, 1 }
  0x57   : > { %s3926_s9 = scalar_select %p3488_p5, 1, 0 }
  0x58   : > { %s3927_s16 = scalar_select %p3492_p6, 1, 0 }
  0x59   : > { %p2847_p9 = scmp.lt.s32.totalorder %s3303_s30, 2  ;;  %s313_s19 = sand.u32 1, %s3299_s29  }
  0x5a   : > { %p3498_p10 = por %p224_p8, %p47_p7  ;;  %s2476_s10 = sshll.u32 %s313_s19, 5 }
  0x5b   : > { %s2575_s13 = sshll.u32 %s3303_s30, 9  ;;  %s317_s21 = scalar_lea.vmem [#allocation3], %s2476_s10 }
  0x5c   : > { %s3928_s24 = scalar_select %p3498_p10, 1, 0 }
  0x5d   : > { %s3506_s20 = scalar_lea.hbm %s3903_s0, %s2575_s13  ;;  %s325_s22 = sshll.u32 %s317_s21, 4  ;;  %s3512_s22 = int_to_ptr.vmem [resolvable:$true] %s325_s22 }
  0x5e   : > { %p3508_p11 = pnand %p2847_p9, %p43_p0  ;;  %s3514_s25 = scalar_lea.sflag [#allocation4], %s313_s19 }
  0x5f   : > { %s3199_s26 = scalar_lea.hbm %s3506_s20, 512  ;;  %s3204_s10 = scalar_lea.hbm %s3903_s0, 1024 }
  0x60   : > { %p3200_p12 = scmp.ne.s32.totalorder %s3506_s20, %s3199_s26  ;;  %p3201_p1 = pneg %p3508_p11 }
  0x61   : > { %p3205_p7 = scmp.lt.s32.totalorder %s3506_s20, %s3903_s0  ;;  %p3206_p13 = scmp.lt.s32.totalorder %s3204_s10, %s3199_s26 }
  0x62   : > { %p3202_p3 = pnand %p3201_p1, %p3200_p12 }
  0x63   : > { %p3207_p0 = por %p3206_p13, %p3205_p7 }
  0x64   : > { %p3203_p4 = pneg %p3202_p3 }
  0x66   : > { %p3208_p2 = pnand %p3207_p0, %p3203_p4 }
  0x68   : > { %3211 = shalt.err (!%p3208_p2)
}
  0x69   : > { %s3212_s19 = scalar_lea.vmem %s3512_s22, 512  ;;  %s3316_s1 = smov [#allocation3]  }
  0x6a   : > { %p3213_p8 = scmp.ne.s32.totalorder %s3512_s22, %s3212_s19  ;;  %s3217_s3 = sshll.u32 %s3316_s1, 4  ;;  %s3218_s3 = int_to_ptr.vmem [resolvable:$false] %s3217_s3 }
  0x6b   : > { %s3219_s13 = scalar_lea.vmem %s3218_s3, 1024  ;;  %p3220_p3 = scmp.lt.s32.totalorder %s3512_s22, %s3218_s3 }
  0x6c   : > { %p3215_p9 = pnand %p3213_p8, %p3201_p1  ;;  %p3221_p10 = scmp.lt.s32.totalorder %s3219_s13, %s3212_s19 }
  0x6e   : > { %p3216_p12 = pneg %p3215_p9  ;;  %p3222_p6 = por %p3221_p10, %p3220_p3 }
  0x70   : > { %p3223_p5 = pnand %p3222_p6, %p3216_p12 }
  0x72   : > { %3226 = shalt.err (!%p3223_p5)
}
  0x73   : > { %s3930_s26 = smov 8   ;;  %s3931_s17 = smov 128  }
  0x74   : > { %2837 = dma.hbm_to_vmem [thread:$0]  (!%p3508_p11), %s3506_s20, 512, %s3512_s22, %s3514_s25, %s3931_s17, %s3931_s17, %s3930_s26  }
  0x75   : > { %p3932_p1 = scmp.ne.s32.totalorder %s3920_s12, 0 }
  0x76   : > { %s3541_s1 = sand.u32 (!%p3932_p1), 1, %s3295_s28   ;;  %p3933_p5 = scmp.ne.s32.totalorder (!%p3932_p1), %s3926_s9, 0 }
  0x77   : > { %337 = sbr.rel (%p3932_p1) target bundleno = 4114 (0x1012), region = 52  ;;  %s2481_s3 = sshll.u32 (!%p3932_p1), %s3541_s1, 5 }
  0x78   : > { %s340_s10 = scalar_lea.sflag (!%p3932_p1), [#allocation4], %s3541_s1  ;;  %s3547_s15 = scalar_lea.vmem (!%p3932_p1), [#allocation3], %s2481_s3 }
  0x7c   : > { %3270 = dma.done.wait (%p3933_p5), %s340_s10, 512  }
  0x7d   : > { %3272 = vsyncadd (%p3933_p5), %s340_s10, 4294966784  ;;  %p3934_p6 = scmp.eq.s32.totalorder %s3392_s11, 0 }
  0x7f   : > { %3274 = dma.done.wait (%p3934_p6), [#allocation7], 4096   ;;  %p3935_p10 = pmov %p3934_p6 }
  0x80   : > { %p3936_p11 = pmov %p3934_p6 }
  0x81   : > { %3276 = vsyncadd (%p3935_p10), [#allocation7], 4294963200 }
  0x82   : > { %3278 = dma.done.wait (%p3936_p11), [#allocation10], 2080   ;;  %p3937_p4 = pmov %p3934_p6 }
  0x84   : > { %3280 = vsyncadd (%p3937_p4), [#allocation10], 4294965216  ;;  %p3938_p7 = pmov %p3937_p4 }
  0x85   : > { %p3939_p13 = pmov %p3937_p4 }
  0x86   : > { %3282 = dma.done.wait (%p3938_p7), [#allocation13], 2048  }
  0x87   : > { %3284 = vsyncadd (%p3939_p13), [#allocation13], 4294965248  ;;  %v3317_v0 = vmov 0   ;;  %v2905_v1 = vld [vmem:[#allocation6 + $0xac] ss:$12 sps:$4 sm:$0xff]   ;;  %v400_v8 = vld [vmem:[%s3547_s15] sm:$0xff]  ;;  %v440_v24 = vlaneseq }
  0x88   : > { %615 = vmatprep.mubr.bf16.mxu0 %v3317_v0  ;;  %v2907_v2 = vld [vmem:[#allocation6 + $0xa8] ss:$12 sps:$4 sm:$0xff]   ;;  %583 = vmatprep.subr.bf16.mxu0 %v2905_v1  ;;  %v2910_v4 = vld [vmem:[#allocation6 + $0x90] ss:$12 sps:$4 sm:$0xff]   ;;  %v2913_v6 = vld [vmem:[#allocation6 + $0x78] ss:$12 sps:$4 sm:$0xff]  }
  0x89   : > { %v2908_v3 = vld [vmem:[#allocation6 + $0x94] ss:$12 sps:$4 sm:$0xff]   ;;  %584 = vmatpush1.bf16.msra.mxu0 %v2907_v2  ;;  %v2911_v5 = vld [vmem:[#allocation6 + $0x7c] ss:$12 sps:$4 sm:$0xff]   ;;  %v2914_v7 = vld [vmem:[#allocation6 + $0x64] ss:$12 sps:$4 sm:$0xff]  }
  0x8a   : > { %585 = vmatprep.subr.bf16.mxu0 %v2908_v3  ;;  %v2916_v9 = vld [vmem:[#allocation6 + $0x60] ss:$12 sps:$4 sm:$0xff]   ;;  %v2919_v13 = vld [vmem:[#allocation6 + $0x48] ss:$12 sps:$4 sm:$0xff]   ;;  %v2922_v15 = vld [vmem:[#allocation6 + $0x30] ss:$12 sps:$4 sm:$0xff]  }
  0x8b   : > { %v401_v10 = vld [vmem:[%s3547_s15 + $0x8] sm:$0xff]  ;;  %v2920_v14 = vld [vmem:[#allocation6 + $0x34] ss:$12 sps:$4 sm:$0xff]   ;;  %v2925_v17 = vld [vmem:[#allocation6 + $0x18] ss:$12 sps:$4 sm:$0xff]   ;;  %v3318_v23 = vmov 0.0  }
  0x8c   : > { %v2917_v11 = vld [vmem:[#allocation6 + $0x4c] ss:$12 sps:$4 sm:$0xff]   ;;  %v404_v12 = vpack.c.bf16 %v401_v10, %v400_v8  ;;  %v2923_v16 = vld [vmem:[#allocation6 + $0x1c] ss:$12 sps:$4 sm:$0xff]   ;;  %v2926_v18 = vld [vmem:[#allocation6 + $0x4] ss:$12 sps:$4 sm:$0xff]  }
  0x8d   : > { %586 = vmatpush1.bf16.msra.mxu0 %v2910_v4  ;;  %v2928_v19 = vld [vmem:[#allocation6] ss:$12 sps:$4 sm:$0xff]   ;;  %v402_v20 = vld [vmem:[%s3547_s15 + $0x10] sm:$0xff]  ;;  %v403_v21 = vld [vmem:[%s3547_s15 + $0x18] sm:$0xff]  ;;  %vm3319_vm0 = vmmov 0   ;;  %v3577_v25 = vshrl.u32 %v440_v24, 7 }
  0x8e   : > { %587 = vmatprep.subr.bf16.mxu0 %v2911_v5  ;;  %2674 = vmatprep.mubr.bf16.mxu1 %v404_v12  ;;  %v3571_v22 = vpack.c.bf16 %v403_v21, %v402_v20  ;;  %v3585_v28 = vld [vmem:[%s3905_s2] sm:$0x7]  ;;  %vm691_vm1 = vcmask 261120   ;;  %v2929_v53 = vld [vmem:[#allocation6 + $0xb0] ss:$12 sps:$4 sm:$0xff]   ;;  %vm786_vm2 = vcmask 130048  }
  0x8f   : > { %v3580_v26 = vsub.s32 1, %v3577_v25  ;;  %v3590_v33 = vsub.s32 0, %v3577_v25  ;;  %v2930_v54 = vld [vmem:[#allocation6 + $0x98] ss:$12 sps:$4 sm:$0xff]   ;;  %2658 = vmatprep.subr.bf16.mxu1 %v2929_v53  ;;  %v2931_v55 = vld [vmem:[#allocation6 + $0x80] ss:$12 sps:$4 sm:$0xff]  }
  0x90   : > { %2659 = vmatpush3.bf16.msra.mxu1 %v2929_v53  ;;  %v2932_v56 = vld [vmem:[#allocation6 + $0x68] ss:$12 sps:$4 sm:$0xff]   ;;  %v2933_v57 = vld [vmem:[#allocation6 + $0x50] ss:$12 sps:$4 sm:$0xff]   ;;  %v2934_v58 = vld [vmem:[#allocation6 + $0x38] ss:$12 sps:$4 sm:$0xff]  }
  0x91   : > { %588 = vmatpush1.bf16.msra.mxu0 %v2913_v6  ;;  %v447_v30 = vrot.slane %v3585_v28, %v3580_v26  ;;  %v443_v39 = vrot.slane %v3585_v28, %v3590_v33  ;;  %2660 = vmatprep.subr.bf16.mxu1 %v2930_v54  ;;  %v2935_v59 = vld [vmem:[#allocation6 + $0x20] ss:$12 sps:$4 sm:$0xff]   ;;  %v2936_v60 = vld [vmem:[#allocation6 + $0x8] ss:$12 sps:$4 sm:$0xff]   ;;  %s3320_s9 = smov 96   ;;  %s3321_s20 = smov 64  }
  0x92   : > { %589 = vmatprep.subr.bf16.mxu0 %v2914_v7  ;;  %s3322_s22 = smov 32   ;;  %vm1189_vm3 = vcmask 523520   ;;  %vm1452_vm4 = vcmask 785920   ;;  %vm1715_vm5 = vcmask 1048320   ;;  %s395_s19 = scalar_lea.vmem [#allocation14], %s2481_s3 }
  0x93   : > { %s2577_s13 = sshll.u32 %s3392_s11, 9  ;;  %s2347_s26 = sshll.u32 %s395_s19, 4  ;;  %s3860_s26 = int_to_ptr.vmem [resolvable:$true] %s2347_s26 }
  0x94   : > { %2661 = vmatpush3.bf16.msra.mxu1 %v2930_v54  ;;  %s3858_s3 = scalar_lea.hbm %s3911_s8, %s2577_s13  ;;  %s3227_s12 = scalar_lea.vmem %s3860_s26, 512 }
  0x95   : > { %590 = vmatpush1.bf16.msra.mxu0 %v2916_v9  ;;  %2662 = vmatprep.subr.bf16.mxu1 %v2931_v55  ;;  %p3228_p0 = scmp.ne.s32.totalorder %s3860_s26, %s3227_s12  ;;  %p3940_p2 = scmp.ne.s32.totalorder %s3927_s16, 0 }
  0x96   : > { %591 = vmatprep.subr.bf16.mxu0 %v2917_v11  ;;  %s3323_s11 = smov [#allocation14]  }
  0x97   : > { %p3229_p8 = pnand %p3228_p0, %p3940_p2  ;;  %s3231_s25 = sshll.u32 %s3323_s11, 4  ;;  %s3232_s25 = int_to_ptr.vmem [resolvable:$false] %s3231_s25 }
  0x98   : > { %2663 = vmatpush3.bf16.msra.mxu1 %v2931_v55  ;;  %p3234_p12 = scmp.lt.s32.totalorder %s3860_s26, %s3232_s25 }
  0x99   : > { %592 = vmatpush1.bf16.msra.mxu0 %v2919_v13  ;;  %2664 = vmatprep.subr.bf16.mxu1 %v2932_v56  ;;  %p3230_p9 = pneg %p3229_p8 }
  0x9a   : > { %593 = vmatprep.subr.bf16.mxu0 %v2920_v14 }
  0x9c   : > { %2665 = vmatpush3.bf16.msra.mxu1 %v2932_v56 }
  0x9d   : > { %594 = vmatpush1.bf16.msra.mxu0 %v2922_v15  ;;  %2666 = vmatprep.subr.bf16.mxu1 %v2933_v57 }
  0x9e   : > { %595 = vmatprep.subr.bf16.mxu0 %v2923_v16 }
  0xa0   : > { %2667 = vmatpush3.bf16.msra.mxu1 %v2933_v57 }
  0xa1   : > { %596 = vmatpush1.bf16.msra.mxu0 %v2925_v17  ;;  %2668 = vmatprep.subr.bf16.mxu1 %v2934_v58 }
  0xa2   : > { %597 = vmatprep.subr.bf16.mxu0 %v2926_v18 }
  0xa4   : > { %2669 = vmatpush3.bf16.msra.mxu1 %v2934_v58 }
  0xa5   : > { %598 = vmatpush1.bf16.msra.mxu0 %v2928_v19  ;;  %2670 = vmatprep.subr.bf16.mxu1 %v2935_v59 }
  0xa6   : > { %2678 = vmatprep.subr.bf16.mxu0 %v3318_v23 }
  0xa8   : > { %616 = vmatmul.mubr.bf16.vlgmr.msra.gmra.mxu0 %v404_v12  ;;  %2671 = vmatpush3.bf16.msra.mxu1 %v2935_v59 }
  0xa9   : > { %625 = vmatprep.mubr.bf16.mxu0 %v3317_v0  ;;  %2672 = vmatprep.subr.bf16.mxu1 %v2936_v60 }
  0xac   : > { %2673 = vmatpush3.bf16.msra.mxu1 %v2936_v60 }
  0xad   : > { %2690 = vmatprep.subr.bf16.mxu1 %v3318_v23 }
  0xaf   : > { %2675 = vmatmul.mubr.bf16.vlgmr.msra.gmra.mxu1 %v3571_v22 }
  0xb0   : > { %626 = vmatmul.mubr.bf16.gmra.mxu0 %v3571_v22  ;;  %2692 = vmatprep.mubr.msk.bf16.mxu1 %vm3319_vm0, %v3318_v23 }
  0xb1   : > { %2680 = vmatprep.mubr.msk.bf16.mxu0 %vm3319_vm0, %v3318_v23 }
 0x168   : > { %v617_v27 = vpop.f32.mrf.mxu0 }
 0x169   : > { %v618_v45 = vadd.f32 %v617_v27, %v443_v39 }
 0x16a   : > { %v619_v29 = vpop.f32.mrf.mxu0 }
 0x16b   : > { %v620_v34 = vadd.f32 %v619_v29, %v447_v30  ;;  %v450_v29 = vsub.s32 2, %v3577_v25 }
 0x16c   : > { %v621_v31 = vpop.f32.mrf.mxu0 }
 0x16d   : > { %v622_v42 = vadd.f32 %v621_v31, %v443_v39  ;;  %v451_v31 = vrot.slane %v3585_v28, %v450_v29 }
 0x16e   : > { %v623_v32 = vpop.f32.mrf.mxu0 }
 0x16f   : > { %v624_v35 = vadd.f32 %v623_v32, %v447_v30  ;;  %v3599_v47 = vpack.c.bf16 %v622_v42, %v618_v45 }
 0x170   : > { %v627_v36 = vpop.f32.mrf.mxu0 }
 0x171   : > { %v3592_v37 = vpack.c.bf16 %v624_v35, %v620_v34  ;;  %v628_v49 = vadd.f32 %v627_v36, %v443_v39 }
 0x172   : > { %v629_v38 = vpop.f32.mrf.mxu0 }
 0x173   : > { %v696_v40 = vsel %vm691_vm1, %v3592_v37, 0  ;;  %v630_v43 = vadd.f32 %v629_v38, %v447_v30 }
 0x174   : > { %v631_v41 = vpop.f32.mrf.mxu0  ;;  %2679 = vmatpush3.bf16.xpose.msra.mxu0 %v696_v40 }
 0x175   : > { %2684 = vmatprep.subr.bf16.mxu0 %v3318_v23  ;;  %v632_v50 = vadd.f32 %v631_v41, %v443_v39 }
 0x176   : > { %v633_v44 = vpop.f32.mrf.mxu0 }
 0x177   : > { %v634_v46 = vadd.f32 %v633_v44, %v447_v30  ;;  %v3610_v52 = vpack.c.bf16 %v632_v50, %v628_v49  ;;  %v2676_v30 = vpop.f32.mrf.mxu1 }
 0x178   : > { %v679_v34 = vadd.f32 %v2676_v30, %v451_v31 }
 0x179   : > { %v3601_v48 = vpack.c.bf16 %v634_v46, %v630_v43  ;;  %v670_v32 = vpop.f32.mrf.mxu1 }
 0x17a   : > { %v671_v36 = vadd.f32 %v670_v32, %v451_v31 }
 0x17b   : > { %2681 = vmatmul.mubr.msk.bf16.vlgmr.msra.gmra.mxu0 %vm691_vm1, %v3599_v47  ;;  %v743_v51 = vsel %vm691_vm1, %v3601_v48, 0  ;;  %v2677_v35 = vpop.f32.mrf.mxu1 }
 0x17c   : > { %2685 = vmatpush3.bf16.xpose.msra.mxu0 %v743_v51  ;;  %2686 = vmatprep.mubr.msk.bf16.mxu0 %vm3319_vm0, %v3318_v23  ;;  %v682_v38 = vadd.f32 %v2677_v35, %v451_v31 }
 0x17d   : > { %2696 = vmatprep.subr.bf16.mxu0 %v3318_v23  ;;  %v673_v39 = vpop.f32.mrf.mxu1 }
 0x17e   : > { %v3633_v40 = vpack.c.bf16 %v682_v38, %v679_v34  ;;  %v674_v41 = vadd.f32 %v673_v39, %v451_v31 }
 0x180   : > { %v3635_v42 = vpack.c.bf16 %v674_v41, %v671_v36 }
 0x182   : > { %2691 = vmatpush3.bf16.msra.mxu1 %v3635_v42 }
 0x183   : > { %2687 = vmatmul.mubr.msk.bf16.vlgmr.msra.gmra.mxu0 %vm691_vm1, %v3610_v52  ;;  %2702 = vmatprep.subr.bf16.mxu1 %v3318_v23 }
 0x184   : > { %2698 = vmatprep.mubr.msk.bf16.mxu0 %vm3319_vm0, %v3318_v23  ;;  %2697 = vmatpush3.bf16.msra.mxu0 %v3633_v40 }
 0x185   : > { %2708 = vmatprep.subr.bf16.mxu0 %v3318_v23 }
 0x23b   : > { %v732_v61 = vpop.f32.mrf.mxu0 }
 0x23c   : > { %v787_v62 = vsel %vm786_vm2, %v732_v61, -inf }
 0x23d   : > { %788 = vmax.xlane.f32.xlu0 %v787_v62  ;;  %v2682_v63 = vpop.f32.mrf.mxu0 }
 0x23f   : > { %v735_v1 = vpop.f32.mrf.mxu0 }
 0x240   : > { %v790_v2 = vsel %vm786_vm2, %v735_v1, -inf }
 0x241   : > { %791 = vmax.xlane.f32.xlu0 %v790_v2  ;;  %v2683_v3 = vpop.f32.mrf.mxu0 }
 0x243   : > { %v779_v4 = vpop.f32.mrf.mxu0 }
 0x244   : > { %v793_v5 = vsel %vm786_vm2, %v779_v4, -inf }
 0x245   : > { %794 = vmax.xlane.f32.xlu1 %v793_v5  ;;  %v2688_v6 = vpop.f32.mrf.mxu0 }
 0x247   : > { %v782_v7 = vpop.f32.mrf.mxu0 }
 0x248   : > { %v796_v8 = vsel %vm786_vm2, %v782_v7, -inf }
 0x249   : > { %797 = vmax.xlane.f32.xlu1 %v796_v8  ;;  %v2689_v9 = vpop.f32.mrf.mxu0 }
 0x2c6   : > { %v789_v10 = vpop.xlane.xlu0 %788 }
 0x2c7   : > { %v799_v11 = vsub.f32 %v732_v61, %v789_v10 }
 0x2c9   : > { %v803_v12 = vmul.f32 1.442695, %v799_v11 }
 0x2ca   : > { %v792_v13 = vpop.xlane.xlu0 %791 }
 0x2cb   : > { %2985 = vpow2.f32 %v803_v12  ;;  %v800_v14 = vsub.f32 %v735_v1, %v792_v13 }
 0x2cd   : > { %v805_v15 = vmul.f32 1.442695, %v800_v14 }
 0x2ce   : > { %v795_v16 = vpop.xlane.xlu1 %794 }
 0x2cf   : > { %2987 = vpow2.f32 %v805_v15  ;;  %v801_v17 = vsub.f32 %v779_v4, %v795_v16 }
 0x2d1   : > { %v807_v18 = vmul.f32 1.442695, %v801_v17 }
 0x2d2   : > { %v798_v28 = vpop.xlane.xlu1 %797 }
 0x2d3   : > { %2989 = vpow2.f32 %v807_v18  ;;  %v802_v43 = vsub.f32 %v782_v7, %v798_v28 }
 0x2d5   : > { %v809_v44 = vmul.f32 1.442695, %v802_v43 }
 0x2d7   : > { %2991 = vpow2.f32 %v809_v44 }
 0x2d8   : > { %v2986_v19 = vpop.eup %2985 }
 0x2d9   : > { %v811_v20 = vsel %vm786_vm2, %v2986_v19, 0.0 }
 0x2da   : > { %812 = vadd.xlane.f32.xlu0 %v811_v20 }
 0x2dc   : > { %v2988_v21 = vpop.eup %2987 }
 0x2dd   : > { %v814_v22 = vsel %vm786_vm2, %v2988_v21, 0.0 }
 0x2de   : > { %815 = vadd.xlane.f32.xlu1 %v814_v22 }
 0x2e0   : > { %v2990_v24 = vpop.eup %2989 }
 0x2e1   : > { %v817_v27 = vsel %vm786_vm2, %v2990_v24, 0.0 }
 0x2e2   : > { %818 = vadd.xlane.f32.xlu0 %v817_v27 }
 0x2e4   : > { %v2992_v45 = vpop.eup %2991 }
 0x2e5   : > { %v820_v46 = vsel %vm786_vm2, %v2992_v45, 0.0 }
 0x2ef   : > { %982 = vrot.lane.b32.xlu1 %v3601_v48, %s3320_s9 }
 0x2f8   : > { %929 = vrot.lane.b32.xlu0 %v3592_v37, %s3320_s9 }
 0x313   : > { %821 = vadd.xlane.f32.xlu1 %v820_v46 }
 0x324   : > { %926 = vrot.lane.b32.xlu1 %v3599_v47, %s3320_s9 }
 0x328   : > { %979 = vrot.lane.b32.xlu1 %v3610_v52, %s3320_s9 }
 0x363   : > { %v813_v49 = vpop.xlane.xlu0 %812 }
 0x364   : > { %2993 = vrcp.f32 %v813_v49 }
 0x367   : > { %v816_v50 = vpop.xlane.xlu1 %815 }
 0x368   : > { %2995 = vrcp.f32 %v816_v50 }
 0x36b   : > { %v819_v51 = vpop.xlane.xlu0 %818  ;;  %v983_v60 = vpop.permute.xlu1 %982 }
 0x36c   : > { %2997 = vrcp.f32 %v819_v51  ;;  %v988_v5 = vsel %vm691_vm1, %v983_v60, 0 }
 0x36f   : > { %v930_v57 = vpop.permute.xlu0 %929 }
 0x370   : > { %v935_v59 = vsel %vm691_vm1, %v930_v57, 0 }
 0x371   : > { %v2994_v53 = vpop.eup %2993 }
 0x372   : > { %v827_v55 = vmul.f32 %v2994_v53, %v2986_v19 }
 0x375   : > { %v2996_v54 = vpop.eup %2995 }
 0x376   : > { %v828_v56 = vmul.f32 %v2996_v54, %v2988_v21 }
 0x378   : > { %v831_v58 = vpack.c.bf16 %v828_v56, %v827_v55 }
 0x379   : > { %v2998_v63 = vpop.eup %2997 }
 0x37a   : > { %2693 = vmatmul.mubr.msk.bf16.vlgmr.msra.gmra.mxu1 %vm786_vm2, %v831_v58  ;;  %v829_v2 = vmul.f32 %v2998_v63, %v2990_v24 }
 0x37b   : > { %2703 = vmatpush3.bf16.xpose.msra.mxu1 %v935_v59  ;;  %2704 = vmatprep.mubr.msk.bf16.mxu1 %vm3319_vm0, %v3318_v23 }
 0x37c   : > { %2714 = vmatprep.subr.bf16.mxu1 %v3318_v23 }
 0x39c   : > { %v822_v61 = vpop.xlane.xlu1 %821 }
 0x39d   : > { %2999 = vrcp.f32 %v822_v61 }
 0x3a0   : > { %v927_v62 = vpop.permute.xlu1 %926 }
 0x3a1   : > { %2705 = vmatmul.mubr.msk.bf16.vlgmr.msra.gmra.mxu1 %vm691_vm1, %v927_v62 }
 0x3a2   : > { %2716 = vmatprep.mubr.msk.bf16.mxu1 %vm3319_vm0, %v3318_v23 }
 0x3a4   : > { %v980_v6 = vpop.permute.xlu1 %979 }
 0x3aa   : > { %v3000_v1 = vpop.eup %2999 }
 0x3ab   : > { %v830_v3 = vmul.f32 %v3000_v1, %v2992_v45 }
 0x3ad   : > { %v832_v4 = vpack.c.bf16 %v830_v3, %v829_v2 }
 0x3af   : > { %2699 = vmatmul.mubr.msk.bf16.vlgmr.msra.gmra.mxu0 %vm786_vm2, %v832_v4 }
 0x3b0   : > { %2709 = vmatpush3.bf16.xpose.msra.mxu0 %v988_v5  ;;  %2710 = vmatprep.mubr.msk.bf16.mxu0 %vm3319_vm0, %v3318_v23 }
 0x3b1   : > { %2720 = vmatprep.subr.bf16.mxu0 %v3318_v23 }
 0x3b7   : > { %2711 = vmatmul.mubr.msk.bf16.vlgmr.msra.gmra.mxu0 %vm691_vm1, %v980_v6 }
 0x3b8   : > { %2722 = vmatprep.mubr.msk.bf16.mxu0 %vm3319_vm0, %v3318_v23 }
 0x43a   : > { %v870_v7 = vpop.f32.mrf.mxu1 }
 0x43b   : > { %921 = vst.msk [vmem:[#allocation2] sm:$0xff] %vm691_vm1, %v870_v7 }
 0x43c   : > { %v2694_v8 = vpop.f32.mrf.mxu1 }
 0x43e   : > { %v873_v9 = vpop.f32.mrf.mxu1 }
 0x43f   : > { %922 = vst.msk [vmem:[#allocation2 + $0x8] sm:$0xff] %vm691_vm1, %v873_v9 }
 0x440   : > { %v2695_v10 = vpop.f32.mrf.mxu1 }
 0x461   : > { %v971_v11 = vpop.f32.mrf.mxu1 }
 0x462   : > { %v1031_v12 = vsel %vm786_vm2, %v971_v11, -inf }
 0x463   : > { %1032 = vmax.xlane.f32.xlu0 %v1031_v12  ;;  %v2706_v13 = vpop.f32.mrf.mxu1 }
 0x465   : > { %v974_v14 = vpop.f32.mrf.mxu1 }
 0x466   : > { %v1034_v15 = vsel %vm786_vm2, %v974_v14, -inf }
 0x467   : > { %1035 = vmax.xlane.f32.xlu1 %v1034_v15  ;;  %v2707_v16 = vpop.f32.mrf.mxu1 }
 0x46f   : > { %v914_v17 = vpop.f32.mrf.mxu0 }
 0x470   : > { %923 = vst.msk [vmem:[#allocation2 + $0x10] sm:$0xff] %vm691_vm1, %v914_v17 }
 0x471   : > { %v2700_v18 = vpop.f32.mrf.mxu0 }
 0x473   : > { %v917_v19 = vpop.f32.mrf.mxu0 }
 0x474   : > { %924 = vst.msk [vmem:[#allocation2 + $0x18] sm:$0xff] %vm691_vm1, %v917_v19 }
 0x475   : > { %v2701_v20 = vpop.f32.mrf.mxu0 }
 0x477   : > { %v1024_v21 = vpop.f32.mrf.mxu0 }
 0x478   : > { %v1037_v22 = vsel %vm786_vm2, %v1024_v21, -inf }
 0x479   : > { %1038 = vmax.xlane.f32.xlu0 %v1037_v22  ;;  %v2712_v24 = vpop.f32.mrf.mxu0 }
 0x47b   : > { %v1027_v27 = vpop.f32.mrf.mxu0 }
 0x47c   : > { %v1040_v30 = vsel %vm786_vm2, %v1027_v27, -inf }
 0x47d   : > { %1041 = vmax.xlane.f32.xlu0 %v1040_v30  ;;  %v2713_v31 = vpop.f32.mrf.mxu0 }
 0x4ec   : > { %v1033_v32 = vpop.xlane.xlu0 %1032 }
 0x4ed   : > { %v1043_v34 = vsub.f32 %v971_v11, %v1033_v32 }
 0x4ef   : > { %v1047_v35 = vmul.f32 1.442695, %v1043_v34 }
 0x4f0   : > { %v1036_v36 = vpop.xlane.xlu1 %1035 }
 0x4f1   : > { %3001 = vpow2.f32 %v1047_v35  ;;  %v1044_v38 = vsub.f32 %v974_v14, %v1036_v36 }
 0x4f3   : > { %v1049_v39 = vmul.f32 1.442695, %v1044_v38 }
 0x4f5   : > { %3003 = vpow2.f32 %v1049_v39 }
 0x4fe   : > { %v3002_v41 = vpop.eup %3001 }
 0x4ff   : > { %v1055_v28 = vsel %vm786_vm2, %v3002_v41, 0.0 }
 0x500   : > { %1056 = vadd.xlane.f32.xlu0 %v1055_v28 }
 0x502   : > { %v3004_v43 = vpop.eup %3003  ;;  %v1039_v44 = vpop.xlane.xlu0 %1038 }
 0x503   : > { %v1045_v45 = vsub.f32 %v1024_v21, %v1039_v44  ;;  %v1058_v46 = vsel %vm786_vm2, %v3004_v43, 0.0 }
 0x504   : > { %1059 = vadd.xlane.f32.xlu1 %v1058_v46 }
 0x505   : > { %v1051_v49 = vmul.f32 1.442695, %v1045_v45 }
 0x506   : > { %v1042_v53 = vpop.xlane.xlu0 %1041 }
 0x507   : > { %3005 = vpow2.f32 %v1051_v49  ;;  %v1046_v54 = vsub.f32 %v1027_v27, %v1042_v53 }
 0x509   : > { %v1053_v55 = vmul.f32 1.442695, %v1046_v54 }
 0x50b   : > { %3007 = vpow2.f32 %v1053_v55 }
 0x514   : > { %v3006_v50 = vpop.eup %3005 }
 0x515   : > { %1126 = vrot.lane.b32.xlu1 %v3633_v40, %s3320_s9  ;;  %v1061_v51 = vsel %vm786_vm2, %v3006_v50, 0.0 }
 0x516   : > { %1062 = vadd.xlane.f32.xlu0 %v1061_v51 }
 0x518   : > { %v3008_v56 = vpop.eup %3007 }
 0x519   : > { %1196 = vrot.lane.b32.xlu1 %v3592_v37, %s3321_s20  ;;  %v1064_v57 = vsel %vm786_vm2, %v3008_v56, 0.0 }
 0x52c   : > { %1078 = vrot.lane.b32.xlu0 %v3635_v42, %s3320_s9 }
 0x530   : > { %1194 = vrot.lane.b32.xlu0 %v3599_v47, %s3321_s20 }
 0x53d   : > { %1065 = vadd.xlane.f32.xlu1 %v1064_v57 }
 0x54e   : > { %1247 = vrot.lane.b32.xlu1 %v3601_v48, %s3321_s20 }
 0x552   : > { %1245 = vrot.lane.b32.xlu1 %v3610_v52, %s3321_s20 }
 0x589   : > { %v1057_v59 = vpop.xlane.xlu0 %1056 }
 0x58d   : > { %v1060_v58 = vpop.xlane.xlu1 %1059 }
 0x58e   : > { %3009 = vrcp.f32 %v1060_v58 }
 0x58f   : > { %3011 = vrcp.f32 %v1057_v59 }
 0x591   : > { %v1127_v60 = vpop.permute.xlu1 %1126 }
 0x592   : > { %2721 = vmatpush3.bf16.msra.mxu0 %v1127_v60 }
 0x593   : > { %2732 = vmatprep.subr.bf16.mxu0 %v3318_v23 }
 0x595   : > { %v1197_v4 = vpop.permute.xlu1 %1196 }
 0x596   : > { %v1202_v6 = vsel %vm691_vm1, %v1197_v4, 0 }
 0x59b   : > { %v3010_v61 = vpop.eup %3009 }
 0x59c   : > { %v3012_v63 = vpop.eup %3011  ;;  %v1072_v1 = vmul.f32 %v3010_v61, %v3004_v43 }
 0x59d   : > { %v1071_v3 = vmul.f32 %v3012_v63, %v3002_v41 }
 0x59f   : > { %v1063_v62 = vpop.xlane.xlu0 %1062  ;;  %v1075_v5 = vpack.c.bf16 %v1072_v1, %v1071_v3 }
 0x5a0   : > { %3013 = vrcp.f32 %v1063_v62 }
 0x5a3   : > { %v1079_v2 = vpop.permute.xlu0 %1078 }
 0x5a4   : > { %2715 = vmatpush3.bf16.msra.mxu1 %v1079_v2 }
 0x5a5   : > { %2726 = vmatprep.subr.bf16.mxu1 %v3318_v23 }
 0x5a7   : > { %2717 = vmatmul.mubr.msk.bf16.vlgmr.msra.gmra.mxu1 %vm786_vm2, %v1075_v5  ;;  %v1195_v7 = vpop.permute.xlu0 %1194 }
 0x5a8   : > { %2727 = vmatpush3.bf16.xpose.msra.mxu1 %v1202_v6  ;;  %2728 = vmatprep.mubr.msk.bf16.mxu1 %vm3319_vm0, %v3318_v23 }
 0x5a9   : > { %2738 = vmatprep.subr.bf16.mxu1 %v3318_v23 }
 0x5ad   : > { %v3014_v9 = vpop.eup %3013 }
 0x5ae   : > { %v1073_v11 = vmul.f32 %v3014_v9, %v3006_v50 }
 0x5af   : > { %2729 = vmatmul.mubr.msk.bf16.vlgmr.msra.gmra.mxu1 %vm691_vm1, %v1195_v7 }
 0x5b0   : > { %2740 = vmatprep.mubr.msk.bf16.mxu1 %vm3319_vm0, %v3318_v23 }
 0x5c6   : > { %v1066_v8 = vpop.xlane.xlu1 %1065 }
 0x5c7   : > { %3015 = vrcp.f32 %v1066_v8 }
 0x5ca   : > { %v1248_v13 = vpop.permute.xlu1 %1247 }
 0x5cb   : > { %v1253_v15 = vsel %vm691_vm1, %v1248_v13, 0 }
 0x5ce   : > { %v1246_v16 = vpop.permute.xlu1 %1245 }
 0x5d4   : > { %v3016_v10 = vpop.eup %3015 }
 0x5d5   : > { %v1074_v12 = vmul.f32 %v3016_v10, %v3008_v56 }
 0x5d7   : > { %v1076_v14 = vpack.c.bf16 %v1074_v12, %v1073_v11 }
 0x5d9   : > { %2723 = vmatmul.mubr.msk.bf16.vlgmr.msra.gmra.mxu0 %vm786_vm2, %v1076_v14 }
 0x5da   : > { %2733 = vmatpush3.bf16.xpose.msra.mxu0 %v1253_v15  ;;  %2734 = vmatprep.mubr.msk.bf16.mxu0 %vm3319_vm0, %v3318_v23 }
 0x5db   : > { %2744 = vmatprep.subr.bf16.mxu0 %v3318_v23 }
 0x5e1   : > { %2735 = vmatmul.mubr.msk.bf16.vlgmr.msra.gmra.mxu0 %vm691_vm1, %v1246_v16 }
 0x5e2   : > { %2746 = vmatprep.mubr.msk.bf16.mxu0 %vm3319_vm0, %v3318_v23 }
 0x667   : > { %v3706_v17 = vpop.f32.mrf.mxu1 }
 0x669   : > { %v2718_v18 = vpop.f32.mrf.mxu1 }
 0x66b   : > { %v3708_v19 = vpop.f32.mrf.mxu1 }
 0x66d   : > { %v2719_v20 = vpop.f32.mrf.mxu1 }
 0x66f   : > { %v1238_v21 = vpop.f32.mrf.mxu1 }
 0x670   : > { %v1296_v22 = vsel %vm786_vm2, %v1238_v21, -inf }
 0x671   : > { %1297 = vmax.xlane.f32.xlu0 %v1296_v22  ;;  %v2730_v24 = vpop.f32.mrf.mxu1 }
 0x673   : > { %v1241_v27 = vpop.f32.mrf.mxu1 }
 0x674   : > { %v1299_v30 = vsel %vm786_vm2, %v1241_v27, -inf }
 0x675   : > { %1300 = vmax.xlane.f32.xlu1 %v1299_v30  ;;  %v2731_v31 = vpop.f32.mrf.mxu1 }
 0x699   : > { %v3712_v32 = vpop.f32.mrf.mxu0 }
 0x69b   : > { %v2724_v34 = vpop.f32.mrf.mxu0 }
 0x69d   : > { %v3714_v35 = vpop.f32.mrf.mxu0 }
 0x69f   : > { %v2725_v36 = vpop.f32.mrf.mxu0 }
 0x6a1   : > { %v1289_v38 = vpop.f32.mrf.mxu0 }
 0x6a2   : > { %v1302_v39 = vsel %vm786_vm2, %v1289_v38, -inf }
 0x6a3   : > { %1303 = vmax.xlane.f32.xlu0 %v1302_v39  ;;  %v2736_v41 = vpop.f32.mrf.mxu0 }
 0x6a5   : > { %v1292_v28 = vpop.f32.mrf.mxu0 }
 0x6a6   : > { %v1305_v43 = vsel %vm786_vm2, %v1292_v28, -inf }
 0x6a7   : > { %1306 = vmax.xlane.f32.xlu0 %v1305_v43  ;;  %v2737_v44 = vpop.f32.mrf.mxu0 }
 0x6fa   : > { %v1298_v45 = vpop.xlane.xlu0 %1297 }
 0x6fb   : > { %v1308_v46 = vsub.f32 %v1238_v21, %v1298_v45 }
 0x6fd   : > { %v1312_v49 = vmul.f32 1.442695, %v1308_v46 }
 0x6fe   : > { %v1301_v50 = vpop.xlane.xlu1 %1300 }
 0x6ff   : > { %3017 = vpow2.f32 %v1312_v49  ;;  %v1309_v51 = vsub.f32 %v1241_v27, %v1301_v50 }
 0x701   : > { %v1314_v53 = vmul.f32 1.442695, %v1309_v51 }
 0x703   : > { %3019 = vpow2.f32 %v1314_v53 }
 0x70c   : > { %v3018_v54 = vpop.eup %3017 }
 0x70d   : > { %v1320_v55 = vsel %vm786_vm2, %v3018_v54, 0.0 }
 0x70e   : > { %1321 = vadd.xlane.f32.xlu0 %v1320_v55 }
 0x710   : > { %v3020_v56 = vpop.eup %3019 }
 0x711   : > { %v1323_v57 = vsel %vm786_vm2, %v3020_v56, 0.0 }
 0x712   : > { %1324 = vadd.xlane.f32.xlu1 %v1323_v57 }
 0x723   : > { %1389 = vrot.lane.b32.xlu1 %v3633_v40, %s3321_s20 }
 0x727   : > { %1459 = vrot.lane.b32.xlu1 %v3592_v37, %s3322_s22 }
 0x72c   : > { %v1304_v58 = vpop.xlane.xlu0 %1303 }
 0x72d   : > { %v1310_v59 = vsub.f32 %v1289_v38, %v1304_v58 }
 0x72f   : > { %v1316_v60 = vmul.f32 1.442695, %v1310_v59 }
 0x730   : > { %v1307_v61 = vpop.xlane.xlu0 %1306 }
 0x731   : > { %3021 = vpow2.f32 %v1316_v60  ;;  %v1311_v62 = vsub.f32 %v1292_v28, %v1307_v61 }
 0x733   : > { %v1318_v63 = vmul.f32 1.442695, %v1311_v62 }
 0x735   : > { %3023 = vpow2.f32 %v1318_v63 }
 0x73e   : > { %v3022_v1 = vpop.eup %3021 }
 0x73f   : > { %v1326_v2 = vsel %vm786_vm2, %v3022_v1, 0.0 }
 0x740   : > { %1327 = vadd.xlane.f32.xlu0 %v1326_v2 }
 0x742   : > { %v3024_v3 = vpop.eup %3023 }
 0x743   : > { %v1329_v4 = vsel %vm786_vm2, %v3024_v3, 0.0 }
 0x74b   : > { %1330 = vadd.xlane.f32.xlu1 %v1329_v4 }
 0x756   : > { %1342 = vrot.lane.b32.xlu0 %v3635_v42, %s3321_s20 }
 0x75a   : > { %1457 = vrot.lane.b32.xlu0 %v3599_v47, %s3322_s22 }
 0x75c   : > { %1510 = vrot.lane.b32.xlu1 %v3601_v48, %s3322_s22 }
 0x760   : > { %1508 = vrot.lane.b32.xlu1 %v3610_v52, %s3322_s22 }
 0x797   : > { %v1322_v6 = vpop.xlane.xlu0 %1321 }
 0x79b   : > { %v1325_v37 = vpop.xlane.xlu1 %1324 }
 0x79c   : > { %3025 = vrcp.f32 %v1325_v37 }
 0x79d   : > { %3027 = vrcp.f32 %v1322_v6 }
 0x79f   : > { %v1390_v5 = vpop.permute.xlu1 %1389 }
 0x7a0   : > { %2745 = vmatpush3.bf16.msra.mxu0 %v1390_v5 }
 0x7a1   : > { %2756 = vmatprep.subr.bf16.mxu0 %v3318_v23 }
 0x7a3   : > { %v1460_v12 = vpop.permute.xlu1 %1459 }
 0x7a4   : > { %v1465_v52 = vsel %vm691_vm1, %v1460_v12, 0 }
 0x7a9   : > { %v3026_v7 = vpop.eup %3025 }
 0x7aa   : > { %v3028_v9 = vpop.eup %3027  ;;  %v1337_v10 = vmul.f32 %v3026_v7, %v3020_v56 }
 0x7ab   : > { %v1336_v47 = vmul.f32 %v3028_v9, %v3018_v54 }
 0x7ad   : > { %v1340_v48 = vpack.c.bf16 %v1337_v10, %v1336_v47 }
 0x7c9   : > { %v1328_v8 = vpop.xlane.xlu0 %1327 }
 0x7ca   : > { %3029 = vrcp.f32 %v1328_v8 }
 0x7cd   : > { %v1343_v11 = vpop.permute.xlu0 %1342 }
 0x7ce   : > { %2739 = vmatpush3.bf16.msra.mxu1 %v1343_v11 }
 0x7cf   : > { %2750 = vmatprep.subr.bf16.mxu1 %v3318_v23 }
 0x7d1   : > { %2741 = vmatmul.mubr.msk.bf16.vlgmr.msra.gmra.mxu1 %vm786_vm2, %v1340_v48  ;;  %v1458_v14 = vpop.permute.xlu0 %1457 }
 0x7d2   : > { %2751 = vmatpush3.bf16.xpose.msra.mxu1 %v1465_v52  ;;  %2752 = vmatprep.mubr.msk.bf16.mxu1 %vm3319_vm0, %v3318_v23 }
 0x7d3   : > { %2762 = vmatprep.subr.bf16.mxu1 %v3318_v23 }
 0x7d4   : > { %v1331_v13 = vpop.xlane.xlu1 %1330 }
 0x7d5   : > { %3031 = vrcp.f32 %v1331_v13 }
 0x7d7   : > { %v3030_v15 = vpop.eup %3029 }
 0x7d8   : > { %v1338_v18 = vmul.f32 %v3030_v15, %v3022_v1  ;;  %v1511_v21 = vpop.permute.xlu1 %1510 }
 0x7d9   : > { %2753 = vmatmul.mubr.msk.bf16.vlgmr.msra.gmra.mxu1 %vm691_vm1, %v1458_v14  ;;  %v1516_v24 = vsel %vm691_vm1, %v1511_v21, 0 }
 0x7da   : > { %2764 = vmatprep.mubr.msk.bf16.mxu1 %vm3319_vm0, %v3318_v23 }
 0x7dc   : > { %v1509_v27 = vpop.permute.xlu1 %1508 }
 0x7e2   : > { %v3032_v16 = vpop.eup %3031 }
 0x7e3   : > { %v1339_v20 = vmul.f32 %v3032_v16, %v3024_v3 }
 0x7e5   : > { %v1341_v22 = vpack.c.bf16 %v1339_v20, %v1338_v18 }
 0x7e7   : > { %2747 = vmatmul.mubr.msk.bf16.vlgmr.msra.gmra.mxu0 %vm786_vm2, %v1341_v22 }
 0x7e8   : > { %2757 = vmatpush3.bf16.xpose.msra.mxu0 %v1516_v24  ;;  %2758 = vmatprep.mubr.msk.bf16.mxu0 %vm3319_vm0, %v3318_v23 }
 0x7e9   : > { %2768 = vmatprep.subr.bf16.mxu0 %v3318_v23 }
 0x7ef   : > { %2759 = vmatmul.mubr.msk.bf16.vlgmr.msra.gmra.mxu0 %vm691_vm1, %v1509_v27 }
 0x7f0   : > { %2770 = vmatprep.mubr.msk.bf16.mxu0 %vm3319_vm0, %v3318_v23 }
 0x891   : > { %v1382_v30 = vpop.f32.mrf.mxu1 }
 0x893   : > { %v2742_v31 = vpop.f32.mrf.mxu1 }
 0x895   : > { %v1385_v34 = vpop.f32.mrf.mxu1 }
 0x897   : > { %v2743_v36 = vpop.f32.mrf.mxu1 }
 0x899   : > { %v1501_v38 = vpop.f32.mrf.mxu1 }
 0x89a   : > { %v1559_v39 = vsel %vm786_vm2, %v1501_v38, -inf }
 0x89b   : > { %1560 = vmax.xlane.f32.xlu0 %v1559_v39  ;;  %v2754_v41 = vpop.f32.mrf.mxu1  ;;  %v2937_v39 = vld [vmem:[#allocation8 + $0x38] sm:$0xff]  }
 0x89c   : > { %v2938_v41 = vld [vmem:[#allocation8 + $0x30] sm:$0xff]  }
 0x89d   : > { %v1504_v28 = vpop.f32.mrf.mxu1 }
 0x89e   : > { %v1562_v43 = vsel %vm786_vm2, %v1504_v28, -inf }
 0x89f   : > { %1563 = vmax.xlane.f32.xlu1 %v1562_v43  ;;  %v2755_v44 = vpop.f32.mrf.mxu1  ;;  %v2940_v43 = vld [vmem:[#allocation8 + $0x20] sm:$0xff]  }
 0x8a0   : > { %v2941_v44 = vld [vmem:[#allocation8 + $0x18] sm:$0xff]  }
 0x8a7   : > { %v1429_v45 = vpop.f32.mrf.mxu0 }
 0x8a9   : > { %v2748_v46 = vpop.f32.mrf.mxu0 }
 0x8ab   : > { %v1432_v49 = vpop.f32.mrf.mxu0 }
 0x8ad   : > { %v2749_v50 = vpop.f32.mrf.mxu0 }
 0x8af   : > { %v1552_v51 = vpop.f32.mrf.mxu0 }
 0x8b0   : > { %v1565_v23 = vsel %vm786_vm2, %v1552_v51, -inf }
 0x8b1   : > { %1566 = vmax.xlane.f32.xlu0 %v1565_v23  ;;  %v2760_v53 = vpop.f32.mrf.mxu0  ;;  %v2943_v23 = vld [vmem:[#allocation8 + $0x8] sm:$0xff]  }
 0x8b2   : > { %v2944_v53 = vld [vmem:[#allocation8] sm:$0xff]  }
 0x8b3   : > { %v1555_v54 = vpop.f32.mrf.mxu0 }
 0x8b4   : > { %v1568_v55 = vsel %vm786_vm2, %v1555_v54, -inf }
 0x8b5   : > { %1569 = vmax.xlane.f32.xlu0 %v1568_v55  ;;  %v2761_v56 = vpop.f32.mrf.mxu0 }
 0x924   : > { %v1561_v57 = vpop.xlane.xlu0 %1560 }
 0x925   : > { %v1571_v58 = vsub.f32 %v1501_v38, %v1561_v57 }
 0x927   : > { %v1575_v59 = vmul.f32 1.442695, %v1571_v58 }
 0x928   : > { %v1564_v60 = vpop.xlane.xlu1 %1563 }
 0x929   : > { %3033 = vpow2.f32 %v1575_v59  ;;  %v1572_v61 = vsub.f32 %v1504_v28, %v1564_v60  ;;  %v2939_v28 = vld [vmem:[#allocation8 + $0x28] sm:$0xff]  }
 0x92b   : > { %v1577_v62 = vmul.f32 1.442695, %v1572_v61 }
 0x92d   : > { %3035 = vpow2.f32 %v1577_v62 }
 0x936   : > { %v3034_v63 = vpop.eup %3033 }
 0x937   : > { %v1583_v1 = vsel %vm786_vm2, %v3034_v63, 0.0 }
 0x938   : > { %1584 = vadd.xlane.f32.xlu0 %v1583_v1 }
 0x93a   : > { %v3036_v2 = vpop.eup %3035  ;;  %v1567_v3 = vpop.xlane.xlu0 %1566 }
 0x93b   : > { %v1573_v4 = vsub.f32 %v1552_v51, %v1567_v3  ;;  %v1586_v37 = vsel %vm786_vm2, %v3036_v2, 0.0 }
 0x93c   : > { %1587 = vadd.xlane.f32.xlu1 %v1586_v37  ;;  %v3794_v37 = vld [vmem:[%s3910_s7] sm:$0x3f] }
 0x93d   : > { %v1579_v5 = vmul.f32 1.442695, %v1573_v4 }
 0x93e   : > { %v1570_v6 = vpop.xlane.xlu0 %1569 }
 0x93f   : > { %3037 = vpow2.f32 %v1579_v5  ;;  %v1574_v7 = vsub.f32 %v1555_v54, %v1570_v6  ;;  %v1745_v6 = vrot.slane %v3794_v37, %v3590_v33 }
 0x941   : > { %v1581_v8 = vmul.f32 1.442695, %v1574_v7 }
 0x943   : > { %3039 = vpow2.f32 %v1581_v8 }
 0x94c   : > { %v3038_v9 = vpop.eup %3037 }
 0x94d   : > { %v1589_v10 = vsel %vm786_vm2, %v3038_v9, 0.0 }
 0x94e   : > { %1590 = vadd.xlane.f32.xlu0 %v1589_v10 }
 0x950   : > { %v3040_v11 = vpop.eup %3039 }
 0x951   : > { %v1592_v47 = vsel %vm786_vm2, %v3040_v11, 0.0 }
 0x952   : > { %1593 = vadd.xlane.f32.xlu1 %v1592_v47 }
 0x963   : > { %1652 = vrot.lane.b32.xlu1 %v3633_v40, %s3322_s22 }
 0x964   : > { %1605 = vrot.lane.b32.xlu0 %v3635_v42, %s3322_s22 }
 0x967   : > { %1177 = vrot.lane.b32.xlu1 %v3706_v17, %s3322_s22 }
 0x968   : > { %1181 = vrot.lane.b32.xlu0 %v3712_v32, %s3322_s22 }
 0x96b   : > { %1179 = vrot.lane.b32.xlu1 %v3708_v19, %s3322_s22 }
 0x96c   : > { %1440 = vrot.lane.b32.xlu0 %v1382_v30, %s3321_s20 }
 0x96f   : > { %1183 = vrot.lane.b32.xlu1 %v3714_v35, %s3322_s22 }
 0x970   : > { %1444 = vrot.lane.b32.xlu0 %v1429_v45, %s3321_s20 }
 0x973   : > { %1442 = vrot.lane.b32.xlu1 %v1385_v34, %s3321_s20 }
 0x977   : > { %1446 = vrot.lane.b32.xlu1 %v1432_v49, %s3321_s20  ;;  %v2942_v49 = vld [vmem:[#allocation8 + $0x10] sm:$0xff]  }
 0x9c1   : > { %v1585_v42 = vpop.xlane.xlu0 %1584 }
 0x9c5   : > { %v1588_v40 = vpop.xlane.xlu1 %1587 }
 0x9c6   : > { %3041 = vrcp.f32 %v1588_v40 }
 0x9c7   : > { %3043 = vrcp.f32 %v1585_v42 }
 0x9d3   : > { %v3042_v17 = vpop.eup %3041 }
 0x9d4   : > { %v3044_v12 = vpop.eup %3043  ;;  %v1600_v48 = vmul.f32 %v3042_v17, %v3036_v2 }
 0x9d5   : > { %v1599_v13 = vmul.f32 %v3044_v12, %v3034_v63 }
 0x9d7   : > { %v1591_v32 = vpop.xlane.xlu0 %1590  ;;  %v1603_v35 = vpack.c.bf16 %v1600_v48, %v1599_v13  ;;  %v3067_v48 = vld [vmem:[%s3547_s15 + $0x10] sm:$0xff] }
 0x9d8   : > { %3045 = vrcp.f32 %v1591_v32  ;;  %v3066_v32 = vld [vmem:[%s3547_s15 + $0x8] sm:$0xff] }
 0x9db   : > { %v1594_v19 = vpop.xlane.xlu1 %1593  ;;  %v1606_v52 = vpop.permute.xlu0 %1605 }
 0x9dc   : > { %3047 = vrcp.f32 %v1594_v19  ;;  %2763 = vmatpush3.bf16.msra.mxu1 %v1606_v52  ;;  %v3068_v52 = vld [vmem:[%s3547_s15 + $0x18] sm:$0xff] }
 0x9dd   : > { %2774 = vmatprep.subr.bf16.mxu1 %v2937_v39 }
 0x9df   : > { %v1653_v14 = vpop.permute.xlu1 %1652  ;;  %2765 = vmatmul.mubr.msk.bf16.vlgmr.msra.gmra.mxu1 %vm786_vm2, %v1603_v35  ;;  %v1182_v15 = vpop.permute.xlu0 %1181  ;;  %v2945_v35 = vld [vmem:[#allocation9 + $0x70] ss:$8 sps:$4 sm:$0xff]  }
 0x9e0   : > { %1192 = vst.msk [vmem:[#allocation2 + $0x10] sm:$0xff] %vm1189_vm3, %v1182_v15  ;;  %2769 = vmatpush3.bf16.msra.mxu0 %v1653_v14  ;;  %2775 = vmatpush3.bf16.msra.mxu1 %v2937_v39  ;;  %v2947_v14 = vld [vmem:[#allocation9 + $0x74] ss:$8 sps:$4 sm:$0xff]  }
 0x9e1   : > { %2776 = vmatprep.subr.bf16.mxu1 %v2938_v41  ;;  %2018 = vmatprep.subr.bf16.mxu0 %v2947_v14 }
 0x9e3   : > { %v1178_v16 = vpop.permute.xlu1 %1177  ;;  %v1441_v18 = vpop.permute.xlu0 %1440 }
 0x9e4   : > { %1190 = vst.msk [vmem:[#allocation2] sm:$0xff] %vm1189_vm3, %v1178_v16  ;;  %2777 = vmatpush3.bf16.msra.mxu1 %v2938_v41 }
 0x9e5   : > { %1453 = vst.msk [vmem:[#allocation2] sm:$0xff] %vm1452_vm4, %v1441_v18  ;;  %v3046_v20 = vpop.eup %3045  ;;  %2778 = vmatprep.subr.bf16.mxu1 %v2939_v28 }
 0x9e6   : > { %v1601_v27 = vmul.f32 %v3046_v20, %v3038_v9 }
 0x9e7   : > { %v1180_v21 = vpop.permute.xlu1 %1179  ;;  %v1445_v22 = vpop.permute.xlu0 %1444 }
 0x9e8   : > { %1191 = vst.msk [vmem:[#allocation2 + $0x8] sm:$0xff] %vm1189_vm3, %v1180_v21  ;;  %2779 = vmatpush3.bf16.msra.mxu1 %v2939_v28 }
 0x9e9   : > { %1455 = vst.msk [vmem:[#allocation2 + $0x10] sm:$0xff] %vm1452_vm4, %v1445_v22  ;;  %v3048_v24 = vpop.eup %3047  ;;  %2780 = vmatprep.subr.bf16.mxu1 %v2940_v43 }
 0x9ea   : > { %v1602_v30 = vmul.f32 %v3048_v24, %v3040_v11  ;;  %v3065_v11 = vld [vmem:[%s3547_s15] sm:$0xff]  ;;  %s2333_s15 = scalar_lea.sflag [#allocation5], %s3541_s1 }
 0x9eb   : > { %v1184_v31 = vpop.permute.xlu1 %1183 }
 0x9ec   : > { %1193 = vst.msk [vmem:[#allocation2 + $0x18] sm:$0xff] %vm1189_vm3, %v1184_v31  ;;  %v1604_v34 = vpack.c.bf16 %v1602_v30, %v1601_v27  ;;  %2781 = vmatpush3.bf16.msra.mxu1 %v2940_v43  ;;  %v2950_v43 = vld [vmem:[#allocation9 + $0x64] ss:$8 sps:$4 sm:$0xff]  }
 0x9ed   : > { %2782 = vmatprep.subr.bf16.mxu1 %v2941_v44 }
 0x9ee   : > { %2771 = vmatmul.mubr.msk.bf16.vlgmr.msra.gmra.mxu0 %vm786_vm2, %v1604_v34 }
 0x9ef   : > { %v1443_v36 = vpop.permute.xlu1 %1442  ;;  %2050 = vmatprep.mubr.bf16.mxu0 %v3317_v0  ;;  %2019 = vmatpush1.bf16.msra.mxu0 %v2945_v35  ;;  %v1903_v35 = vrot.slane %v3794_v37, %v450_v29 }
 0x9f0   : > { %1454 = vst.msk [vmem:[#allocation2 + $0x8] sm:$0xff] %vm1452_vm4, %v1443_v36  ;;  %2783 = vmatpush3.bf16.msra.mxu1 %v2941_v44  ;;  %v2948_v44 = vld [vmem:[#allocation9 + $0x60] ss:$8 sps:$4 sm:$0xff]   ;;  %2020 = vmatprep.subr.bf16.mxu0 %v2950_v43 }
 0x9f1   : > { %2784 = vmatprep.subr.bf16.mxu1 %v2942_v49  ;;  %v2982_v43 = vld [vmem:[#allocation12 + $0x8] sm:$0xff]  }
 0x9f3   : > { %v1447_v38 = vpop.permute.xlu1 %1446  ;;  %2021 = vmatpush1.bf16.msra.mxu0 %v2948_v44  ;;  %v2983_v44 = vld [vmem:[#allocation12 + $0x40] sm:$0xff]  }
 0x9f4   : > { %1456 = vst.msk [vmem:[#allocation2 + $0x18] sm:$0xff] %vm1452_vm4, %v1447_v38  ;;  %2785 = vmatpush3.bf16.msra.mxu1 %v2942_v49  ;;  %v2956_v49 = vld [vmem:[#allocation9 + $0x44] ss:$8 sps:$4 sm:$0xff]  }
 0x9f5   : > { %2786 = vmatprep.subr.bf16.mxu1 %v2943_v23 }
 0x9f8   : > { %2787 = vmatpush3.bf16.msra.mxu1 %v2943_v23  ;;  %v2959_v23 = vld [vmem:[#allocation9 + $0x34] ss:$8 sps:$4 sm:$0xff]  }
 0x9f9   : > { %2788 = vmatprep.subr.bf16.mxu1 %v2944_v53 }
 0x9fc   : > { %2789 = vmatpush3.bf16.msra.mxu1 %v2944_v53  ;;  %v2962_v53 = vld [vmem:[#allocation9 + $0x24] ss:$8 sps:$4 sm:$0xff]  }
 0xa9f   : > { %v1645_v45 = vpop.f32.mrf.mxu1 }
 0xaa0   : > { %1703 = vrot.lane.b32.xlu0 %v1645_v45, %s3320_s9  ;;  %v2953_v45 = vld [vmem:[#allocation9 + $0x54] ss:$8 sps:$4 sm:$0xff]  }
 0xaa1   : > { %v2766_v46 = vpop.f32.mrf.mxu1  ;;  %2022 = vmatprep.subr.bf16.mxu0 %v2953_v45  ;;  %v2984_v45 = vld [vmem:[#allocation12] sm:$0xff]  }
 0xaa2   : > { %v2951_v46 = vld [vmem:[#allocation9 + $0x50] ss:$8 sps:$4 sm:$0xff]  }
 0xaa3   : > { %v1648_v50 = vpop.f32.mrf.mxu1  ;;  %2023 = vmatpush1.bf16.msra.mxu0 %v2951_v46 }
 0xaa4   : > { %1705 = vrot.lane.b32.xlu1 %v1648_v50, %s3320_s9  ;;  %v2954_v50 = vld [vmem:[#allocation9 + $0x40] ss:$8 sps:$4 sm:$0xff]   ;;  %2024 = vmatprep.subr.bf16.mxu0 %v2956_v49 }
 0xaa5   : > { %v2767_v51 = vpop.f32.mrf.mxu1 }
 0xaa6   : > { %v2957_v51 = vld [vmem:[#allocation9 + $0x30] ss:$8 sps:$4 sm:$0xff]  }
 0xaa7   : > { %2025 = vmatpush1.bf16.msra.mxu0 %v2954_v50 }
 0xaa8   : > { %2026 = vmatprep.subr.bf16.mxu0 %v2959_v23 }
 0xaab   : > { %2027 = vmatpush1.bf16.msra.mxu0 %v2957_v51 }
 0xaac   : > { %2028 = vmatprep.subr.bf16.mxu0 %v2962_v53 }
 0xaae   : > { %v1692_v54 = vpop.f32.mrf.mxu0 }
 0xaaf   : > { %1707 = vrot.lane.b32.xlu0 %v1692_v54, %s3320_s9  ;;  %v2960_v54 = vld [vmem:[#allocation9 + $0x20] ss:$8 sps:$4 sm:$0xff]  }
 0xab0   : > { %v2772_v55 = vpop.f32.mrf.mxu0  ;;  %2029 = vmatpush1.bf16.msra.mxu0 %v2960_v54 }
 0xab1   : > { %v2965_v55 = vld [vmem:[#allocation9 + $0x14] ss:$8 sps:$4 sm:$0xff]  }
 0xab2   : > { %v1695_v56 = vpop.f32.mrf.mxu0  ;;  %2030 = vmatprep.subr.bf16.mxu0 %v2965_v55 }
 0xab3   : > { %1709 = vrot.lane.b32.xlu1 %v1695_v56, %s3320_s9  ;;  %v2963_v56 = vld [vmem:[#allocation9 + $0x10] ss:$8 sps:$4 sm:$0xff]   ;;  %s3233_s9 = scalar_lea.vmem %s3232_s25, 1024 }
 0xab4   : > { %v2773_v57 = vpop.f32.mrf.mxu0  ;;  %2031 = vmatpush1.bf16.msra.mxu0 %v2963_v56  ;;  %p3235_p3 = scmp.lt.s32.totalorder %s3233_s9, %s3227_s12 }
 0xab5   : > { %v2968_v57 = vld [vmem:[#allocation9 + $0x4] ss:$8 sps:$4 sm:$0xff]  }
 0xab6   : > { %2032 = vmatprep.subr.bf16.mxu0 %v2968_v57  ;;  %p3236_p1 = por %p3235_p3, %p3234_p12 }
 0xab8   : > { %p3237_p5 = pnand %p3236_p1, %p3230_p9 }
 0xb12   : > { %v1704_v58 = vpop.permute.xlu0 %1703 }
 0xb13   : > { %1716 = vst.msk [vmem:[#allocation2] sm:$0xff] %vm1715_vm5, %v1704_v58  ;;  %v2966_v58 = vld [vmem:[#allocation9] ss:$8 sps:$4 sm:$0xff]  }
 0xb14   : > { %2033 = vmatpush1.bf16.msra.mxu0 %v2966_v58 }
 0xb16   : > { %v1706_v59 = vpop.permute.xlu1 %1705 }
 0xb17   : > { %1717 = vst.msk [vmem:[#allocation2 + $0x8] sm:$0xff] %vm1715_vm5, %v1706_v59  ;;  %v2969_v59 = vld [vmem:[#allocation12 + $0x78] sm:$0xff]  }
 0xb18   : > { %2630 = vmatprep.subr.bf16.mxu1 %v2969_v59 }
 0xb1a   : > { %v1720_v60 = vld [vmem:[#allocation2] sm:$0xff] }
 0xb1e   : > { %v1721_v61 = vld [vmem:[#allocation2 + $0x8] sm:$0xff] }
 0xb1f   : > { %v1724_v62 = vpack.c.bf16 %v1721_v61, %v1720_v60  ;;  %v2970_v60 = vld [vmem:[#allocation12 + $0x38] sm:$0xff]   ;;  %v2971_v61 = vld [vmem:[#allocation12 + $0x70] sm:$0xff]  }
 0xb21   : > { %2790 = vmatprep.mubr.bf16.mxu1 %v1724_v62  ;;  %v1708_v63 = vpop.permute.xlu0 %1707  ;;  %v2972_v62 = vld [vmem:[#allocation12 + $0x30] sm:$0xff]  }
 0xb22   : > { %1718 = vst.msk [vmem:[#allocation2 + $0x10] sm:$0xff] %vm1715_vm5, %v1708_v63  ;;  %v2973_v63 = vld [vmem:[#allocation12 + $0x68] sm:$0xff]  }
 0xb25   : > { %v1710_v1 = vpop.permute.xlu1 %1709 }
 0xb26   : > { %1719 = vst.msk [vmem:[#allocation2 + $0x18] sm:$0xff] %vm1715_vm5, %v1710_v1  ;;  %v2974_v1 = vld [vmem:[#allocation12 + $0x28] sm:$0xff]  }
 0xb29   : > { %v1722_v2 = vld [vmem:[#allocation2 + $0x10] sm:$0xff] }
 0xb2d   : > { %v1723_v3 = vld [vmem:[#allocation2 + $0x18] sm:$0xff] }
 0xb2e   : > { %v1725_v4 = vpack.c.bf16 %v1723_v3, %v1722_v2  ;;  %v2975_v2 = vld [vmem:[#allocation12 + $0x60] sm:$0xff]  }
 0xb2f   : > { %v2976_v3 = vld [vmem:[#allocation12 + $0x20] sm:$0xff]  }
 0xb30   : > { %2791 = vmatmul.mubr.bf16.vlgmr.msra.gmra.mxu1 %v1725_v4  ;;  %v2977_v4 = vld [vmem:[#allocation12 + $0x58] sm:$0xff]  }
 0xb31   : > { %2631 = vmatpush3.bf16.msra.mxu1 %v2970_v60 }
 0xb32   : > { %2632 = vmatprep.subr.bf16.mxu1 %v2971_v61 }
 0xb35   : > { %2633 = vmatpush3.bf16.msra.mxu1 %v2972_v62 }
 0xb36   : > { %2634 = vmatprep.subr.bf16.mxu1 %v2973_v63 }
 0xb39   : > { %2635 = vmatpush3.bf16.msra.mxu1 %v2974_v1 }
 0xb3a   : > { %2636 = vmatprep.subr.bf16.mxu1 %v2975_v2 }
 0xb3d   : > { %2637 = vmatpush3.bf16.msra.mxu1 %v2976_v3 }
 0xb3e   : > { %2638 = vmatprep.subr.bf16.mxu1 %v2977_v4 }
 0xbf0   : > { %v2792_v5 = vpop.f32.mrf.mxu1 }
 0xbf1   : > { %v1837_v10 = vadd.f32 %v2792_v5, %v1745_v6  ;;  %v2978_v5 = vld [vmem:[#allocation12 + $0x18] sm:$0xff]  }
 0xbf2   : > { %v1828_v7 = vpop.f32.mrf.mxu1  ;;  %2639 = vmatpush3.bf16.msra.mxu1 %v2978_v5 }
 0xbf3   : > { %v1829_v8 = vadd.f32 %v1828_v7, %v1745_v6  ;;  %v1845_v19 = vadd.f32 %v3067_v48, %v1837_v10 }
 0xbf4   : > { %v2793_v9 = vpop.f32.mrf.mxu1 }
 0xbf5   : > { %v1843_v47 = vadd.f32 %v3065_v11, %v1829_v8  ;;  %v1840_v17 = vadd.f32 %v2793_v9, %v1745_v6 }
 0xbf6   : > { %v1831_v40 = vpop.f32.mrf.mxu1 }
 0xbf7   : > { %v1832_v42 = vadd.f32 %v1831_v40, %v1745_v6  ;;  %1847 = vadd.xlane.f32.xlu0 %v1843_v47  ;;  %v1846_v13 = vadd.f32 %v3068_v52, %v1840_v17 }
 0xbf9   : > { %v1844_v12 = vadd.f32 %v3066_v32, %v1832_v42 }
 0xbfb   : > { %1849 = vadd.xlane.f32.xlu1 %v1844_v12  ;;  %1851 = vadd.xlane.f32.xlu0 %v1845_v19 }
 0xbff   : > { %1853 = vadd.xlane.f32.xlu0 %v1846_v13 }
 0xc80   : > { %v1848_v15 = vpop.xlane.xlu0 %1847 }
 0xc81   : > { %v1856_v16 = vmul.f32 0.0078125, %v1848_v15 }
 0xc83   : > { %v3802_v18 = vsub.f32 %v1843_v47, %v1856_v16 }
 0xc84   : > { %v1850_v20 = vpop.xlane.xlu1 %1849  ;;  %v1852_v21 = vpop.xlane.xlu0 %1851 }
 0xc85   : > { %v1857_v22 = vmul.f32 0.0078125, %v1850_v20  ;;  %v1858_v24 = vmul.f32 0.0078125, %v1852_v21  ;;  %v1864_v27 = vmul.f32 %v3802_v18, %v3802_v18 }
 0xc87   : > { %v3806_v30 = vsub.f32 %v1844_v12, %v1857_v22  ;;  %v3808_v31 = vsub.f32 %v1845_v19, %v1858_v24  ;;  %1868 = vadd.xlane.f32.xlu0 %v1864_v27  ;;  %v1895_v19 = vrot.slane %v3794_v37, %v3580_v26 }
 0xc88   : > { %v1854_v34 = vpop.xlane.xlu0 %1853 }
 0xc89   : > { %v1859_v36 = vmul.f32 0.0078125, %v1854_v34  ;;  %v1865_v38 = vmul.f32 %v3806_v30, %v3806_v30  ;;  %v1866_v39 = vmul.f32 %v3808_v31, %v3808_v31 }
 0xc8b   : > { %v3814_v41 = vsub.f32 %v1846_v13, %v1859_v36  ;;  %1870 = vadd.xlane.f32.xlu1 %v1865_v38  ;;  %1872 = vadd.xlane.f32.xlu0 %v1866_v39 }
 0xc8d   : > { %v1867_v28 = vmul.f32 %v3814_v41, %v3814_v41 }
 0xc8f   : > { %1874 = vadd.xlane.f32.xlu1 %v1867_v28  ;;  %v2979_v28 = vld [vmem:[#allocation12 + $0x50] sm:$0xff]  }
 0xc90   : > { %2640 = vmatprep.subr.bf16.mxu1 %v2979_v28 }
 0xd10   : > { %v1869_v6 = vpop.xlane.xlu0 %1868 }
 0xd11   : > { %v1876_v7 = vmul.f32 0.0078125, %v1869_v6 }
 0xd13   : > { %v1880_v8 = vadd.f32 1e-05, %v1876_v7 }
 0xd14   : > { %v1871_v9 = vpop.xlane.xlu1 %1870  ;;  %v1873_v10 = vpop.xlane.xlu0 %1872 }
 0xd15   : > { %3049 = vrsqrt.f32 %v1880_v8  ;;  %v1877_v11 = vmul.f32 0.0078125, %v1871_v9  ;;  %v1878_v47 = vmul.f32 0.0078125, %v1873_v10 }
 0xd17   : > { %v1881_v40 = vadd.f32 1e-05, %v1877_v11  ;;  %v1882_v42 = vadd.f32 1e-05, %v1878_v47 }
 0xd18   : > { %v1875_v17 = vpop.xlane.xlu1 %1874 }
 0xd19   : > { %3051 = vrsqrt.f32 %v1881_v40  ;;  %v1879_v32 = vmul.f32 0.0078125, %v1875_v17  ;;  %v2117_v40 = vsub.s32 3, %v3577_v25 }
 0xd1a   : > { %3053 = vrsqrt.f32 %v1882_v42 }
 0xd1b   : > { %v1883_v12 = vadd.f32 1e-05, %v1879_v32  ;;  %v2118_v17 = vrot.slane %v3794_v37, %v2117_v40 }
 0xd1d   : > { %3055 = vrsqrt.f32 %v1883_v12 }
 0xd22   : > { %v3050_v48 = vpop.eup %3049 }
 0xd23   : > { %v1888_v52 = vmul.f32 %v3050_v48, %v3802_v18 }
 0xd25   : > { %v1896_v15 = vmul.f32 %v1895_v19, %v1888_v52 }
 0xd26   : > { %v3052_v13 = vpop.eup %3051 }
 0xd27   : > { %v1889_v14 = vmul.f32 %v3052_v13, %v3806_v30  ;;  %v3054_v16 = vpop.eup %3053  ;;  %v3825_v22 = vadd.f32 %v1903_v35, %v1896_v15 }
 0xd28   : > { %v1890_v27 = vmul.f32 %v3054_v16, %v3808_v31  ;;  %v2980_v31 = vld [vmem:[#allocation12 + $0x10] sm:$0xff]  }
 0xd29   : > { %v1897_v20 = vmul.f32 %v1895_v19, %v1889_v14  ;;  %2641 = vmatpush3.bf16.msra.mxu1 %v2980_v31 }
 0xd2a   : > { %v3056_v21 = vpop.eup %3055  ;;  %v1898_v29 = vmul.f32 %v1895_v19, %v1890_v27 }
 0xd2b   : > { %v3827_v24 = vadd.f32 %v1903_v35, %v1897_v20  ;;  %v1891_v34 = vmul.f32 %v3056_v21, %v3814_v41  ;;  %v2981_v41 = vld [vmem:[#allocation12 + $0x48] sm:$0xff]  }
 0xd2c   : > { %v3836_v38 = vadd.f32 %v1903_v35, %v1898_v29  ;;  %2642 = vmatprep.subr.bf16.mxu1 %v2981_v41 }
 0xd2d   : > { %v1908_v18 = vpack.c.bf16 %v3827_v24, %v3825_v22  ;;  %v1899_v36 = vmul.f32 %v1895_v19, %v1891_v34  ;;  %2643 = vmatpush3.bf16.msra.mxu1 %v2982_v43 }
 0xd2e   : > { %2644 = vmatprep.subr.bf16.mxu1 %v2983_v44 }
 0xd2f   : > { %2051 = vmatmul.mubr.bf16.vlgmr.msra.gmra.mxu0 %v1908_v18  ;;  %v3834_v30 = vadd.f32 %v1903_v35, %v1899_v36 }
 0xd30   : > { %2060 = vmatprep.mubr.bf16.mxu0 %v3317_v0  ;;  %v1926_v0 = vld [vmem:[#allocation11] sm:$0x3] }
 0xd31   : > { %v1909_v39 = vpack.c.bf16 %v3834_v30, %v3836_v38  ;;  %2645 = vmatpush3.bf16.msra.mxu1 %v2984_v45  ;;  %v1935_v49 = vrot.slane %v1926_v0, %v3580_v26  ;;  %v1931_v50 = vrot.slane %v1926_v0, %v3590_v33 }
 0xd37   : > { %2061 = vmatmul.mubr.bf16.gmra.mxu0 %v1909_v39 }
 0xdef   : > { %v2052_v46 = vpop.f32.mrf.mxu0 }
 0xdf0   : > { %v2053_v55 = vadd.f32 %v2052_v46, %v1931_v50 }
 0xdf1   : > { %v2054_v51 = vpop.f32.mrf.mxu0 }
 0xdf2   : > { %v2055_v53 = vadd.f32 %v2054_v51, %v1935_v49  ;;  %v2071_v62 = vmax.f32 %v2053_v55, 0.0 }
 0xdf3   : > { %v2056_v23 = vpop.f32.mrf.mxu0 }
 0xdf4   : > { %v2057_v54 = vadd.f32 %v2056_v23, %v1931_v50  ;;  %v2072_v60 = vmax.f32 %v2055_v53, 0.0 }
 0xdf5   : > { %v2058_v56 = vpop.f32.mrf.mxu0 }
 0xdf6   : > { %v2059_v57 = vadd.f32 %v2058_v56, %v1935_v49  ;;  %v2073_v58 = vmax.f32 %v2057_v54, 0.0 }
 0xdf7   : > { %v2062_v59 = vpop.f32.mrf.mxu0 }
 0xdf8   : > { %v2074_v61 = vmax.f32 %v2059_v57, 0.0  ;;  %v2079_v2 = vpack.c.bf16 %v2073_v58, %v2071_v62  ;;  %v2063_v33 = vadd.f32 %v2062_v59, %v1931_v50 }
 0xdf9   : > { %v2064_v63 = vpop.f32.mrf.mxu0 }
 0xdfa   : > { %v2080_v1 = vpack.c.bf16 %v2074_v61, %v2072_v60  ;;  %v2065_v4 = vadd.f32 %v2064_v63, %v1935_v49  ;;  %v2075_v10 = vmax.f32 %v2063_v33, 0.0 }
 0xdfb   : > { %v2066_v3 = vpop.f32.mrf.mxu0 }
 0xdfc   : > { %v2067_v26 = vadd.f32 %v2066_v3, %v1931_v50  ;;  %2247 = vmatprep.mubr.bf16.mxu1 %v2080_v1  ;;  %v2076_v8 = vmax.f32 %v2065_v4, 0.0  ;;  %v2314_v1 = vsub.s32 4, %v3577_v25  ;;  %v2322_v3 = vsub.s32 5, %v3577_v25 }
 0xdfd   : > { %v2068_v5 = vpop.f32.mrf.mxu0  ;;  %2248 = vmatmul.mubr.bf16.vlgmr.msra.gmra.mxu1 %v2079_v2 }
 0xdfe   : > { %v2069_v6 = vadd.f32 %v2068_v5, %v1935_v49  ;;  %v2077_v7 = vmax.f32 %v2067_v26, 0.0  ;;  %v2315_v26 = vrot.slane %v3794_v37, %v2314_v1  ;;  %v2323_v5 = vrot.slane %v3794_v37, %v2322_v3 }
 0xe00   : > { %v2078_v9 = vmax.f32 %v2069_v6, 0.0  ;;  %v2081_v47 = vpack.c.bf16 %v2077_v7, %v2075_v10 }
 0xe02   : > { %v2082_v11 = vpack.c.bf16 %v2078_v9, %v2076_v8 }
 0xe04   : > { %2255 = vmatprep.mubr.bf16.mxu1 %v2082_v11 }
 0xe05   : > { %2256 = vmatmul.mubr.bf16.gmra.mxu1 %v2081_v47 }
 0xebd   : > { %v2646_v42 = vpop.f32.mrf.mxu1 }
 0xebf   : > { %v2647_v32 = vpop.f32.mrf.mxu1 }
 0xec0   : > { %v2648_v12 = vadd.f32 %v2647_v32, %v2646_v42 }
 0xec1   : > { %v2649_v48 = vpop.f32.mrf.mxu1 }
 0xec2   : > { %v2250_v19 = vadd.f32 %v2648_v12, %v2118_v17 }
 0xec3   : > { %v2650_v52 = vpop.f32.mrf.mxu1 }
 0xec4   : > { %v2651_v13 = vadd.f32 %v2650_v52, %v2649_v48  ;;  %v2264_v35 = vadd.f32 %v2250_v19, %v3825_v22 }
 0xec5   : > { %v2652_v14 = vpop.f32.mrf.mxu1 }
 0xec6   : > { %v2253_v15 = vadd.f32 %v2651_v13, %v2118_v17  ;;  %2268 = vadd.xlane.f32.xlu0 %v2264_v35 }
 0xec7   : > { %v2653_v16 = vpop.f32.mrf.mxu1 }
 0xec8   : > { %v2654_v20 = vadd.f32 %v2653_v16, %v2652_v14  ;;  %v2265_v21 = vadd.f32 %v2253_v15, %v3827_v24 }
 0xec9   : > { %v2655_v27 = vpop.f32.mrf.mxu1 }
 0xeca   : > { %v2258_v34 = vadd.f32 %v2654_v20, %v2118_v17  ;;  %2270 = vadd.xlane.f32.xlu1 %v2265_v21 }
 0xecb   : > { %v2656_v18 = vpop.f32.mrf.mxu1 }
 0xecc   : > { %v2657_v36 = vadd.f32 %v2656_v18, %v2655_v27  ;;  %v2266_v29 = vadd.f32 %v2258_v34, %v3836_v38 }
 0xece   : > { %v2261_v39 = vadd.f32 %v2657_v36, %v2118_v17  ;;  %2272 = vadd.xlane.f32.xlu0 %v2266_v29 }
 0xed0   : > { %v2267_v28 = vadd.f32 %v2261_v39, %v3834_v30 }
 0xed2   : > { %2274 = vadd.xlane.f32.xlu1 %v2267_v28 }
 0xf4f   : > { %v2269_v22 = vpop.xlane.xlu0 %2268 }
 0xf50   : > { %v2276_v31 = vmul.f32 0.0078125, %v2269_v22 }
 0xf52   : > { %v2280_v41 = vsub.f32 %v2264_v35, %v2276_v31 }
 0xf53   : > { %v2271_v43 = vpop.xlane.xlu1 %2270 }
 0xf54   : > { %v2277_v44 = vmul.f32 0.0078125, %v2271_v43  ;;  %v2284_v45 = vmul.f32 %v2280_v41, %v2280_v41 }
 0xf56   : > { %v2281_v0 = vsub.f32 %v2265_v21, %v2277_v44  ;;  %2288 = vadd.xlane.f32.xlu0 %v2284_v45 }
 0xf57   : > { %v2273_v24 = vpop.xlane.xlu0 %2272 }
 0xf58   : > { %v2278_v46 = vmul.f32 0.0078125, %v2273_v24  ;;  %v2285_v49 = vmul.f32 %v2281_v0, %v2281_v0 }
 0xf5a   : > { %v2282_v50 = vsub.f32 %v2266_v29, %v2278_v46  ;;  %2290 = vadd.xlane.f32.xlu1 %v2285_v49 }
 0xf5b   : > { %v2275_v51 = vpop.xlane.xlu1 %2274 }
 0xf5c   : > { %v2279_v38 = vmul.f32 0.0078125, %v2275_v51  ;;  %v2286_v23 = vmul.f32 %v2282_v50, %v2282_v50 }
 0xf5e   : > { %v2283_v53 = vsub.f32 %v2267_v28, %v2279_v38  ;;  %2292 = vadd.xlane.f32.xlu0 %v2286_v23 }
 0xf60   : > { %v2287_v30 = vmul.f32 %v2283_v53, %v2283_v53 }
 0xf62   : > { %2294 = vadd.xlane.f32.xlu1 %v2287_v30 }
 0xfdf   : > { %v2289_v54 = vpop.xlane.xlu0 %2288 }
 0xfe0   : > { %v2296_v55 = vmul.f32 0.0078125, %v2289_v54 }
 0xfe2   : > { %v2300_v56 = vadd.f32 1e-05, %v2296_v55 }
 0xfe3   : > { %v2291_v57 = vpop.xlane.xlu1 %2290 }
 0xfe4   : > { %3057 = vrsqrt.f32 %v2300_v56  ;;  %v2297_v58 = vmul.f32 0.0078125, %v2291_v57 }
 0xfe6   : > { %v2301_v59 = vadd.f32 1e-05, %v2297_v58 }
 0xfe7   : > { %v2293_v60 = vpop.xlane.xlu0 %2292 }
 0xfe8   : > { %3059 = vrsqrt.f32 %v2301_v59  ;;  %v2298_v61 = vmul.f32 0.0078125, %v2293_v60 }
 0xfea   : > { %v2302_v62 = vadd.f32 1e-05, %v2298_v61 }
 0xfeb   : > { %v2295_v63 = vpop.xlane.xlu1 %2294 }
 0xfec   : > { %3061 = vrsqrt.f32 %v2302_v62  ;;  %v2299_v2 = vmul.f32 0.0078125, %v2295_v63 }
 0xfee   : > { %v2303_v4 = vadd.f32 1e-05, %v2299_v2 }
 0xff0   : > { %3063 = vrsqrt.f32 %v2303_v4 }
 0xff1   : > { %v3058_v33 = vpop.eup %3057 }
 0xff2   : > { %v2308_v6 = vmul.f32 %v3058_v33, %v2280_v41 }
 0xff4   : > { %v2316_v7 = vmul.f32 %v2315_v26, %v2308_v6 }
 0xff5   : > { %v3060_v8 = vpop.eup %3059 }
 0xff6   : > { %v2324_v9 = vadd.f32 %v2323_v5, %v2316_v7  ;;  %v2309_v10 = vmul.f32 %v3060_v8, %v2281_v0 }
 0xff8   : > { %2328 = vst [vmem:[%s395_s19] sm:$0xff] %v2324_v9  ;;  %v2317_v11 = vmul.f32 %v2315_v26, %v2309_v10 }
 0xff9   : > { %v3062_v47 = vpop.eup %3061 }
 0xffa   : > { %v2325_v25 = vadd.f32 %v2323_v5, %v2317_v11  ;;  %v2310_v40 = vmul.f32 %v3062_v47, %v2282_v50 }
 0xffc   : > { %2329 = vst [vmem:[%s395_s19 + $0x8] sm:$0xff] %v2325_v25  ;;  %v2318_v42 = vmul.f32 %v2315_v26, %v2310_v40 }
 0xffd   : > { %v3064_v17 = vpop.eup %3063 }
 0xffe   : > { %v2326_v32 = vadd.f32 %v2323_v5, %v2318_v42  ;;  %v2311_v37 = vmul.f32 %v3064_v17, %v2283_v53 }
0x1000   : > { %2330 = vst [vmem:[%s395_s19 + $0x10] sm:$0xff] %v2326_v32  ;;  %v2319_v12 = vmul.f32 %v2315_v26, %v2311_v37 }
0x1002   : > { %v2327_v48 = vadd.f32 %v2323_v5, %v2319_v12 }
0x1004   : > { %2331 = vst [vmem:[%s395_s19 + $0x18] sm:$0xff] %v2327_v48 }
0x1005   : > { %3240 = shalt.err (!%p3237_p5)
}
0x1006   : > { %s3241_s20 = scalar_lea.hbm %s3858_s3, 512  ;;  %s3245_s21 = scalar_lea.hbm %s3911_s8, 1024 }
0x1007   : > { %p3242_p6 = scmp.ne.s32.totalorder %s3858_s3, %s3241_s20  ;;  %p3246_p4 = scmp.lt.s32.totalorder %s3858_s3, %s3911_s8 }
0x1008   : > { %p3247_p7 = scmp.lt.s32.totalorder %s3245_s21, %s3241_s20 }
0x1009   : > { %p3243_p10 = pnand %p3242_p6, %p3940_p2 }
0x100a   : > { %p3248_p13 = por %p3247_p7, %p3246_p4 }
0x100b   : > { %p3244_p11 = pneg %p3243_p10 }
0x100d   : > { %p3249_p0 = pnand %p3248_p13, %p3244_p11 }
0x100f   : > { %3252 = shalt.err (!%p3249_p0)
}
0x1010   : > { %s3324_s17 = smov 128   ;;  %s3325_s10 = smov 8  }
0x1011   : > { %2816 = dma.vmem_to_hbm [thread:$0]  (%p3940_p2), %s3860_s26, 512, %s3858_s3, %s2333_s15, %s3324_s17, %s3324_s17, %s3325_s10  }
0x1012 PF: > { %s2362_s12 = sand.u32 1, %s3291_s27   ;;  %p3941_p8 = scmp.ne.s32.totalorder %s3928_s24, 0 }
0x1013   : > { %p3942_p9 = scmp.ge.s32.totalorder %s3303_s30, 2  ;;  %s2363_s11 = scalar_lea.sflag [#allocation5], %s2362_s12 }
0x1015   : > { %p2839_p12 = pnand %p3942_p9, %p3941_p8 }
0x1017   : > { %p2840_p3 = pneg %p2839_p12 }
0x1019   : > { %3286 = dma.done.wait (%p2840_p3), %s2363_s11, 512  }
0x101a   : > { %3288 = vsyncadd (%p2840_p3), %s2363_s11, 4294966784  ;;  %p24_p1 = scmp.ge.s32.totalorder %s3472_s18, 4   ;;  %s3943_s27 = smov %s3295_s28 }
0x101b   : > { %s3944_s28 = smov %s3299_s29  ;;  %s3945_s29 = smov %s3484_s23 }
0x101c   : > { %s3946_s30 = smov %s3472_s18  ;;  %26 = sbr.rel (!%p24_p1) target bundleno = 11 (0xb), region = 117 }
0x1021   :  { %2368 = vsyncpa [#allocation4], 1 }
0x1022   :  { %2370 = vsyncpa [#allocation4 + $0x1], 1 }
0x1023   :  { %2371 = vsyncpa [#allocation7], 1 }
0x1024   :  { %2372 = vsyncpa [#allocation10], 1 }
0x1025   :  { %2373 = vsyncpa [#allocation13], 1 }
0x1026   :  { %2374 = vsyncpa [#allocation5], 1 }
0x1027   :  { %2376 = vsyncpa [#allocation5 + $0x1], 1 }

// kernel: tpu_custom_call.1
= control target key start
LH: loop header
LB: loop body
LE: loop exit
PB: predicated region body
PF: predicated region fallthrough
CT: control target
= control target key end

     0   :  { %s3903_s0 = inlined_call_operand.hbm [shape: f32[4,16,128], index: 0, kind: input, shape index: {}]   ;;  %s3904_s1 = inlined_call_operand.hbm [shape: bf16[128,384], index: 1, kind: input, shape index: {}]   ;;  %s3905_s2 = inlined_call_operand.vmem [shape: f32[1,384], index: 2, kind: input, shape index: {}]   ;;  %s3906_s3 = inlined_call_operand.hbm [shape: bf16[128,128], index: 3, kind: input, shape index: {}]   ;;  %s3907_s4 = inlined_call_operand.hbm [shape: bf16[128,256], index: 4, kind: input, shape index: {}]   ;;  %s3908_s5 = inlined_call_operand.hbm [shape: f32[1,256], index: 5, kind: input, shape index: {}]   ;;  %s3909_s6 = inlined_call_operand.hbm [shape: bf16[256,128], index: 6, kind: input, shape index: {}]   ;;  %s3910_s7 = inlined_call_operand.vmem [shape: f32[6,128], index: 7, kind: input, shape index: {}]   ;;  %s3911_s8 = inlined_call_operand.hbm [shape: f32[4,16,128], index: 8, kind: output, shape index: {}]  }
   0x1   :  { %3918 = sst [smem:[#allocation20_spill]] %s3904_s1 }
   0x2   :  { %3919 = sst [smem:[#allocation21_spill]] %s3906_s3 }
   0x3   :  { %13 = vsyncpa [#allocation4], 0 }
   0x4   :  { %15 = vsyncpa [#allocation4 + $0x1], 0 }
   0x5   :  { %16 = vsyncpa [#allocation7], 0 }
   0x6   :  { %17 = vsyncpa [#allocation10], 0 }
   0x7   :  { %18 = vsyncpa [#allocation13], 0 }
   0x8   :  { %19 = vsyncpa [#allocation5], 0 }
   0x9   :  { %21 = vsyncpa [#allocation5 + $0x1], 0  ;;  %s3371_s27 = smov 0   ;;  %s3373_s28 = smov 0  }
   0xa   :  { %s3375_s29 = smov 0   ;;  %s3377_s30 = smov 0  }
   0xb LB: > { %s3305_s9 = smov [#allocation6]   ;;  %s3392_s11 = sadd.s32 4294967295, %s3303_s30   ;;  %s3303_s30 = sphi %s3377_s30, %s3946_s30   ;;  %s3299_s29 = sphi %s3375_s29, %s3945_s29   ;;  %s3295_s28 = sphi %s3373_s28, %s3944_s28   ;;  %s3291_s27 = sphi %s3371_s27, %s3943_s27  }
   0xc   : > { %s243_s10 = sshll.u32 %s3305_s9, 4  ;;  %p2469_p0 = scmp.ge.s32.totalorder %s3303_s30, 1  ;;  %s244_s10 = int_to_ptr.vmem [resolvable:$true] %s243_s10 }
   0xd   : > { %p3912_p1 = scmp.eq.s32.totalorder %s3392_s11, 0  ;;  %p231_p2 = scmp.lt.s32.totalorder %s3303_s30, 3 }
   0xe   : > { %s3306_s13 = smov [#allocation9]   ;;  %s3307_s16 = smov [#allocation8]  }
   0xf   : > { %p3397_p3 = pnand %p2469_p0, %p231_p2  ;;  %s272_s14 = sshll.u32 %s3306_s13, 4  ;;  %s3410_s14 = int_to_ptr.vmem [resolvable:$true] %s272_s14 }
  0x10   : > { %s3412_s17 = sshll.u32 %s3307_s16, 4  ;;  %s3080_s19 = scalar_lea.vmem %s244_s10, 3072  ;;  %s260_s17 = int_to_ptr.vmem [resolvable:$true] %s3412_s17 }
  0x11   : > { %s3920_s12 = scalar_select %p3397_p3, 1, 0 }
  0x12   : > { %p2818_p5 = pneg %p3397_p3  ;;  %p3081_p8 = scmp.ne.s32.totalorder %s244_s10, %s3080_s19 }
  0x13   : > { %p3088_p11 = scmp.lt.s32.totalorder %s244_s10, %s244_s10  ;;  %p3089_p12 = scmp.lt.s32.totalorder %s3080_s19, %s3080_s19 }
  0x14   : > { %p3406_p6 = pnand %p2818_p5, %p3912_p1 }
  0x15   : > { %p3090_p13 = por %p3089_p12, %p3088_p11 }
  0x16   : > { %p3416_p7 = pneg %p3406_p6 }
  0x18   : > { %p3083_p9 = pnand %p3081_p8, %p3416_p7 }
  0x1a   : > { %p3084_p10 = pneg %p3083_p9 }
  0x1c   : > { %p3091_p0 = pnand %p3090_p13, %p3084_p10 }
  0x1e   : > { %3094 = shalt.err (!%p3091_p0)
}
  0x1f   : > { %s3308_s20 = smov 192   ;;  %s3309_s21 = smov 12  }
  0x20   : > { %s3923_s1 = sld [smem:[#allocation20_spill]]  ;;  %s3106_s24 = scalar_lea.vmem %s3410_s14, 2048 }
  0x21   : > { %p3107_p2 = scmp.ne.s32.totalorder %s3410_s14, %s3106_s24  ;;  %p3114_p9 = scmp.lt.s32.totalorder %s3410_s14, %s3410_s14 }
  0x22   : > { %p3115_p10 = scmp.lt.s32.totalorder %s3106_s24, %s3106_s24 }
  0x23   : > { %p3109_p5 = pnand %p3107_p2, %p3416_p7 }
  0x24   : > { %p3116_p11 = por %p3115_p10, %p3114_p9 }
  0x25   : > { %p3110_p8 = pneg %p3109_p5 }
  0x26   : > { %2821 = dma.hbm_to_vmem [thread:$0]  (!%p3406_p6), %s3923_s1, 3072, %s244_s10, [#allocation7], %s3308_s20, %s3308_s20, %s3309_s21  }
  0x27   : > { %p3117_p12 = pnand %p3116_p11, %p3110_p8 }
  0x29   : > { %3120 = shalt.err (!%p3117_p12)
}
  0x2a   : > { %s3914_s25 = smov 128   ;;  %s3915_s26 = smov 8  }
  0x2b   : > { %2827 = dma.hbm_to_vmem [thread:$0]  (!%p3406_p6), %s3907_s4, 2048, %s3410_s14, [#allocation10], %s3914_s25, %s3914_s25, %s3915_s26  }
  0x2c   : > { %s3132_s13 = scalar_lea.vmem %s260_s17, 1024  ;;  %p3140_p5 = scmp.lt.s32.totalorder %s260_s17, %s260_s17 }
  0x2d   : > { %p3133_p13 = scmp.ne.s32.totalorder %s260_s17, %s3132_s13  ;;  %p3141_p8 = scmp.lt.s32.totalorder %s3132_s13, %s3132_s13 }
  0x2f   : > { %p3135_p0 = pnand %p3133_p13, %p3416_p7  ;;  %p3142_p9 = por %p3141_p8, %p3140_p5 }
  0x31   : > { %p3136_p2 = pneg %p3135_p0 }
  0x33   : > { %p3143_p10 = pnand %p3142_p9, %p3136_p2 }
  0x35   : > { %3146 = shalt.err (!%p3143_p10)
}
  0x36   : > { %s3312_s16 = smov 64   ;;  %s3313_s19 = smov 4  }
  0x37   : > { %s3924_s3 = sld [smem:[#allocation21_spill]]  ;;  %s3314_s21 = smov [#allocation11]  }
  0x38   : > { %s286_s22 = sshll.u32 %s3314_s21, 4  ;;  %s3315_s23 = smov [#allocation12]   ;;  %s287_s22 = int_to_ptr.vmem [resolvable:$true] %s286_s22 }
  0x39   : > { %s296_s24 = sshll.u32 %s3315_s23, 4  ;;  %s3158_s9 = scalar_lea.vmem %s287_s22, 32  ;;  %s297_s24 = int_to_ptr.vmem [resolvable:$true] %s296_s24 }
  0x3a   : > { %p3159_p11 = scmp.ne.s32.totalorder %s287_s22, %s3158_s9  ;;  %p3166_p0 = scmp.lt.s32.totalorder %s287_s22, %s287_s22 }
  0x3b   : > { %p3167_p2 = scmp.lt.s32.totalorder %s3158_s9, %s3158_s9 }
  0x3c   : > { %p3161_p12 = pnand %p3159_p11, %p3416_p7 }
  0x3d   : > { %2824 = dma.hbm_to_vmem [thread:$0]  (!%p3406_p6), %s3924_s3, 1024, %s260_s17, [#allocation7], %s3312_s16, %s3312_s16, %s3313_s19  }
  0x3e   : > { %p3162_p13 = pneg %p3161_p12  ;;  %p3168_p5 = por %p3167_p2, %p3166_p0 }
  0x40   : > { %p3169_p8 = pnand %p3168_p5, %p3162_p13 }
  0x42   : > { %3172 = shalt.err (!%p3169_p8)
}
  0x43   : > { %2830 = dma.hbm_to_vmem [thread:$0]  (!%p3406_p6), %s3908_s5, 32, %s287_s22, [#allocation10]  }
  0x44   : > { %s3184_s17 = scalar_lea.vmem %s297_s24, 2048  ;;  %p3192_p11 = scmp.lt.s32.totalorder %s297_s24, %s297_s24 }
  0x45   : > { %p3185_p9 = scmp.ne.s32.totalorder %s297_s24, %s3184_s17  ;;  %p3193_p12 = scmp.lt.s32.totalorder %s3184_s17, %s3184_s17 }
  0x47   : > { %p3187_p10 = pnand %p3185_p9, %p3416_p7  ;;  %p3194_p1 = por %p3193_p12, %p3192_p11 }
  0x49   : > { %p3188_p4 = pneg %p3187_p10 }
  0x4b   : > { %p3195_p3 = pnand %p3194_p1, %p3188_p4 }
  0x4d   : > { %3198 = shalt.err (!%p3195_p3)
}
  0x4e   : > { %2833 = dma.hbm_to_vmem [thread:$0]  (!%p3406_p6), %s3909_s6, 2048, %s297_s24, [#allocation13], %s3312_s16, %s3312_s16, %s3313_s19  }
  0x4f   : > { %s2468_s15 = sadd.s32 4294967294, %s3303_s30   ;;  %s3472_s18 = sadd.s32 1, %s3303_s30  }
  0x50   : > { %s34_s21 = sadd.s32 1, %s3299_s29  ;;  %s31_s22 = ssub.s32 %s3303_s30, %s3472_s18 }
  0x51   : > { %p41_p1 = scmp.ne.s32.totalorder %s3299_s29, %s3295_s28  ;;  %p32_p3 = scmp.eq.s32.totalorder %s31_s22, 0 }
  0x52   : > { %p42_p4 = scmp.eq.s32.totalorder %s3303_s30, 0  ;;  %p47_p7 = scmp.ne.s32.totalorder %s3295_s28, %s3291_s27 }
  0x53   : > { %p218_p13 = scmp.eq.s32.totalorder %s3392_s11, 1  ;;  %p3925_p2 = scmp.eq.s32.totalorder %s3392_s11, 0 }
  0x54   : > { %s3484_s23 = scalar_select %p32_p3, %s3299_s29, %s34_s21  }
  0x55   : > { %p43_p0 = por %p42_p4, %p41_p1  ;;  %p3488_p5 = por %p3925_p2, %p47_p7 }
  0x56   : > { %p3492_p6 = por %p218_p13, %p41_p1  ;;  %p224_p8 = scmp.eq.s32.totalorder %s2468_s15, 1 }
  0x57   : > { %s3926_s9 = scalar_select %p3488_p5, 1, 0 }
  0x58   : > { %s3927_s16 = scalar_select %p3492_p6, 1, 0 }
  0x59   : > { %p2847_p9 = scmp.lt.s32.totalorder %s3303_s30, 2  ;;  %s313_s19 = sand.u32 1, %s3299_s29  }
  0x5a   : > { %p3498_p10 = por %p224_p8, %p47_p7  ;;  %s2476_s10 = sshll.u32 %s313_s19, 5 }
  0x5b   : > { %s2575_s13 = sshll.u32 %s3303_s30, 9  ;;  %s317_s21 = scalar_lea.vmem [#allocation3], %s2476_s10 }
  0x5c   : > { %s3928_s24 = scalar_select %p3498_p10, 1, 0 }
  0x5d   : > { %s3506_s20 = scalar_lea.hbm %s3903_s0, %s2575_s13  ;;  %s325_s22 = sshll.u32 %s317_s21, 4  ;;  %s3512_s22 = int_to_ptr.vmem [resolvable:$true] %s325_s22 }
  0x5e   : > { %p3508_p11 = pnand %p2847_p9, %p43_p0  ;;  %s3514_s25 = scalar_lea.sflag [#allocation4], %s313_s19 }
  0x5f   : > { %s3199_s26 = scalar_lea.hbm %s3506_s20, 512  ;;  %s3204_s10 = scalar_lea.hbm %s3903_s0, 1024 }
  0x60   : > { %p3200_p12 = scmp.ne.s32.totalorder %s3506_s20, %s3199_s26  ;;  %p3201_p1 = pneg %p3508_p11 }
  0x61   : > { %p3205_p7 = scmp.lt.s32.totalorder %s3506_s20, %s3903_s0  ;;  %p3206_p13 = scmp.lt.s32.totalorder %s3204_s10, %s3199_s26 }
  0x62   : > { %p3202_p3 = pnand %p3201_p1, %p3200_p12 }
  0x63   : > { %p3207_p0 = por %p3206_p13, %p3205_p7 }
  0x64   : > { %p3203_p4 = pneg %p3202_p3 }
  0x66   : > { %p3208_p2 = pnand %p3207_p0, %p3203_p4 }
  0x68   : > { %3211 = shalt.err (!%p3208_p2)
}
  0x69   : > { %s3212_s19 = scalar_lea.vmem %s3512_s22, 512  ;;  %s3316_s1 = smov [#allocation3]  }
  0x6a   : > { %p3213_p8 = scmp.ne.s32.totalorder %s3512_s22, %s3212_s19  ;;  %s3217_s3 = sshll.u32 %s3316_s1, 4  ;;  %s3218_s3 = int_to_ptr.vmem [resolvable:$false] %s3217_s3 }
  0x6b   : > { %s3219_s13 = scalar_lea.vmem %s3218_s3, 1024  ;;  %p3220_p3 = scmp.lt.s32.totalorder %s3512_s22, %s3218_s3 }
  0x6c   : > { %p3215_p9 = pnand %p3213_p8, %p3201_p1  ;;  %p3221_p10 = scmp.lt.s32.totalorder %s3219_s13, %s3212_s19 }
  0x6e   : > { %p3216_p12 = pneg %p3215_p9  ;;  %p3222_p6 = por %p3221_p10, %p3220_p3 }
  0x70   : > { %p3223_p5 = pnand %p3222_p6, %p3216_p12 }
  0x72   : > { %3226 = shalt.err (!%p3223_p5)
}
  0x73   : > { %s3930_s26 = smov 8   ;;  %s3931_s17 = smov 128  }
  0x74   : > { %2837 = dma.hbm_to_vmem [thread:$0]  (!%p3508_p11), %s3506_s20, 512, %s3512_s22, %s3514_s25, %s3931_s17, %s3931_s17, %s3930_s26  }
  0x75   : > { %p3932_p1 = scmp.ne.s32.totalorder %s3920_s12, 0 }
  0x76   : > { %s3541_s1 = sand.u32 (!%p3932_p1), 1, %s3295_s28   ;;  %p3933_p5 = scmp.ne.s32.totalorder (!%p3932_p1), %s3926_s9, 0 }
  0x77   : > { %337 = sbr.rel (%p3932_p1) target bundleno = 4114 (0x1012), region = 52  ;;  %s2481_s3 = sshll.u32 (!%p3932_p1), %s3541_s1, 5 }
  0x78   : > { %s340_s10 = scalar_lea.sflag (!%p3932_p1), [#allocation4], %s3541_s1  ;;  %s3547_s15 = scalar_lea.vmem (!%p3932_p1), [#allocation3], %s2481_s3 }
  0x7c   : > { %3270 = dma.done.wait (%p3933_p5), %s340_s10, 512  }
  0x7d   : > { %3272 = vsyncadd (%p3933_p5), %s340_s10, 4294966784  ;;  %p3934_p6 = scmp.eq.s32.totalorder %s3392_s11, 0 }
  0x7f   : > { %3274 = dma.done.wait (%p3934_p6), [#allocation7], 4096   ;;  %p3935_p10 = pmov %p3934_p6 }
  0x80   : > { %p3936_p11 = pmov %p3934_p6 }
  0x81   : > { %3276 = vsyncadd (%p3935_p10), [#allocation7], 4294963200 }
  0x82   : > { %3278 = dma.done.wait (%p3936_p11), [#allocation10], 2080   ;;  %p3937_p4 = pmov %p3934_p6 }
  0x84   : > { %3280 = vsyncadd (%p3937_p4), [#allocation10], 4294965216  ;;  %p3938_p7 = pmov %p3937_p4 }
  0x85   : > { %p3939_p13 = pmov %p3937_p4 }
  0x86   : > { %3282 = dma.done.wait (%p3938_p7), [#allocation13], 2048  }
  0x87   : > { %3284 = vsyncadd (%p3939_p13), [#allocation13], 4294965248  ;;  %v3317_v0 = vmov 0   ;;  %v2905_v1 = vld [vmem:[#allocation6 + $0xac] ss:$12 sps:$4 sm:$0xff]   ;;  %v400_v8 = vld [vmem:[%s3547_s15] sm:$0xff]  ;;  %v440_v24 = vlaneseq }
  0x88   : > { %615 = vmatprep.mubr.bf16.mxu0 %v3317_v0  ;;  %v2907_v2 = vld [vmem:[#allocation6 + $0xa8] ss:$12 sps:$4 sm:$0xff]   ;;  %583 = vmatprep.subr.bf16.mxu0 %v2905_v1  ;;  %v2910_v4 = vld [vmem:[#allocation6 + $0x90] ss:$12 sps:$4 sm:$0xff]   ;;  %v2913_v6 = vld [vmem:[#allocation6 + $0x78] ss:$12 sps:$4 sm:$0xff]  }
  0x89   : > { %v2908_v3 = vld [vmem:[#allocation6 + $0x94] ss:$12 sps:$4 sm:$0xff]   ;;  %584 = vmatpush1.bf16.msra.mxu0 %v2907_v2  ;;  %v2911_v5 = vld [vmem:[#allocation6 + $0x7c] ss:$12 sps:$4 sm:$0xff]   ;;  %v2914_v7 = vld [vmem:[#allocation6 + $0x64] ss:$12 sps:$4 sm:$0xff]  }
  0x8a   : > { %585 = vmatprep.subr.bf16.mxu0 %v2908_v3  ;;  %v2916_v9 = vld [vmem:[#allocation6 + $0x60] ss:$12 sps:$4 sm:$0xff]   ;;  %v2919_v13 = vld [vmem:[#allocation6 + $0x48] ss:$12 sps:$4 sm:$0xff]   ;;  %v2922_v15 = vld [vmem:[#allocation6 + $0x30] ss:$12 sps:$4 sm:$0xff]  }
  0x8b   : > { %v401_v10 = vld [vmem:[%s3547_s15 + $0x8] sm:$0xff]  ;;  %v2920_v14 = vld [vmem:[#allocation6 + $0x34] ss:$12 sps:$4 sm:$0xff]   ;;  %v2925_v17 = vld [vmem:[#allocation6 + $0x18] ss:$12 sps:$4 sm:$0xff]   ;;  %v3318_v23 = vmov 0.0  }
  0x8c   : > { %v2917_v11 = vld [vmem:[#allocation6 + $0x4c] ss:$12 sps:$4 sm:$0xff]   ;;  %v404_v12 = vpack.c.bf16 %v401_v10, %v400_v8  ;;  %v2923_v16 = vld [vmem:[#allocation6 + $0x1c] ss:$12 sps:$4 sm:$0xff]   ;;  %v2926_v18 = vld [vmem:[#allocation6 + $0x4] ss:$12 sps:$4 sm:$0xff]  }
  0x8d   : > { %586 = vmatpush1.bf16.msra.mxu0 %v2910_v4  ;;  %v2928_v19 = vld [vmem:[#allocation6] ss:$12 sps:$4 sm:$0xff]   ;;  %v402_v20 = vld [vmem:[%s3547_s15 + $0x10] sm:$0xff]  ;;  %v403_v21 = vld [vmem:[%s3547_s15 + $0x18] sm:$0xff]  ;;  %vm3319_vm0 = vmmov 0   ;;  %v3577_v25 = vshrl.u32 %v440_v24, 7 }
  0x8e   : > { %587 = vmatprep.subr.bf16.mxu0 %v2911_v5  ;;  %2674 = vmatprep.mubr.bf16.mxu1 %v404_v12  ;;  %v3571_v22 = vpack.c.bf16 %v403_v21, %v402_v20  ;;  %v3585_v28 = vld [vmem:[%s3905_s2] sm:$0x7]  ;;  %vm691_vm1 = vcmask 261120   ;;  %v2929_v53 = vld [vmem:[#allocation6 + $0xb0] ss:$12 sps:$4 sm:$0xff]   ;;  %vm786_vm2 = vcmask 130048  }
  0x8f   : > { %v3580_v26 = vsub.s32 1, %v3577_v25  ;;  %v3590_v33 = vsub.s32 0, %v3577_v25  ;;  %v2930_v54 = vld [vmem:[#allocation6 + $0x98] ss:$12 sps:$4 sm:$0xff]   ;;  %2658 = vmatprep.subr.bf16.mxu1 %v2929_v53  ;;  %v2931_v55 = vld [vmem:[#allocation6 + $0x80] ss:$12 sps:$4 sm:$0xff]  }
  0x90   : > { %2659 = vmatpush3.bf16.msra.mxu1 %v2929_v53  ;;  %v2932_v56 = vld [vmem:[#allocation6 + $0x68] ss:$12 sps:$4 sm:$0xff]   ;;  %v2933_v57 = vld [vmem:[#allocation6 + $0x50] ss:$12 sps:$4 sm:$0xff]   ;;  %v2934_v58 = vld [vmem:[#allocation6 + $0x38] ss:$12 sps:$4 sm:$0xff]  }
  0x91   : > { %588 = vmatpush1.bf16.msra.mxu0 %v2913_v6  ;;  %v447_v30 = vrot.slane %v3585_v28, %v3580_v26  ;;  %v443_v39 = vrot.slane %v3585_v28, %v3590_v33  ;;  %2660 = vmatprep.subr.bf16.mxu1 %v2930_v54  ;;  %v2935_v59 = vld [vmem:[#allocation6 + $0x20] ss:$12 sps:$4 sm:$0xff]   ;;  %v2936_v60 = vld [vmem:[#allocation6 + $0x8] ss:$12 sps:$4 sm:$0xff]   ;;  %s3320_s9 = smov 96   ;;  %s3321_s20 = smov 64  }
  0x92   : > { %589 = vmatprep.subr.bf16.mxu0 %v2914_v7  ;;  %s3322_s22 = smov 32   ;;  %vm1189_vm3 = vcmask 523520   ;;  %vm1452_vm4 = vcmask 785920   ;;  %vm1715_vm5 = vcmask 1048320   ;;  %s395_s19 = scalar_lea.vmem [#allocation14], %s2481_s3 }
  0x93   : > { %s2577_s13 = sshll.u32 %s3392_s11, 9  ;;  %s2347_s26 = sshll.u32 %s395_s19, 4  ;;  %s3860_s26 = int_to_ptr.vmem [resolvable:$true] %s2347_s26 }
  0x94   : > { %2661 = vmatpush3.bf16.msra.mxu1 %v2930_v54  ;;  %s3858_s3 = scalar_lea.hbm %s3911_s8, %s2577_s13  ;;  %s3227_s12 = scalar_lea.vmem %s3860_s26, 512 }
  0x95   : > { %590 = vmatpush1.bf16.msra.mxu0 %v2916_v9  ;;  %2662 = vmatprep.subr.bf16.mxu1 %v2931_v55  ;;  %p3228_p0 = scmp.ne.s32.totalorder %s3860_s26, %s3227_s12  ;;  %p3940_p2 = scmp.ne.s32.totalorder %s3927_s16, 0 }
  0x96   : > { %591 = vmatprep.subr.bf16.mxu0 %v2917_v11  ;;  %s3323_s11 = smov [#allocation14]  }
  0x97   : > { %p3229_p8 = pnand %p3228_p0, %p3940_p2  ;;  %s3231_s25 = sshll.u32 %s3323_s11, 4  ;;  %s3232_s25 = int_to_ptr.vmem [resolvable:$false] %s3231_s25 }
  0x98   : > { %2663 = vmatpush3.bf16.msra.mxu1 %v2931_v55  ;;  %p3234_p12 = scmp.lt.s32.totalorder %s3860_s26, %s3232_s25 }
  0x99   : > { %592 = vmatpush1.bf16.msra.mxu0 %v2919_v13  ;;  %2664 = vmatprep.subr.bf16.mxu1 %v2932_v56  ;;  %p3230_p9 = pneg %p3229_p8 }
  0x9a   : > { %593 = vmatprep.subr.bf16.mxu0 %v2920_v14 }
  0x9c   : > { %2665 = vmatpush3.bf16.msra.mxu1 %v2932_v56 }
  0x9d   : > { %594 = vmatpush1.bf16.msra.mxu0 %v2922_v15  ;;  %2666 = vmatprep.subr.bf16.mxu1 %v2933_v57 }
  0x9e   : > { %595 = vmatprep.subr.bf16.mxu0 %v2923_v16 }
  0xa0   : > { %2667 = vmatpush3.bf16.msra.mxu1 %v2933_v57 }
  0xa1   : > { %596 = vmatpush1.bf16.msra.mxu0 %v2925_v17  ;;  %2668 = vmatprep.subr.bf16.mxu1 %v2934_v58 }
  0xa2   : > { %597 = vmatprep.subr.bf16.mxu0 %v2926_v18 }
  0xa4   : > { %2669 = vmatpush3.bf16.msra.mxu1 %v2934_v58 }
  0xa5   : > { %598 = vmatpush1.bf16.msra.mxu0 %v2928_v19  ;;  %2670 = vmatprep.subr.bf16.mxu1 %v2935_v59 }
  0xa6   : > { %2678 = vmatprep.subr.bf16.mxu0 %v3318_v23 }
  0xa8   : > { %616 = vmatmul.mubr.bf16.vlgmr.msra.gmra.mxu0 %v404_v12  ;;  %2671 = vmatpush3.bf16.msra.mxu1 %v2935_v59 }
  0xa9   : > { %625 = vmatprep.mubr.bf16.mxu0 %v3317_v0  ;;  %2672 = vmatprep.subr.bf16.mxu1 %v2936_v60 }
  0xac   : > { %2673 = vmatpush3.bf16.msra.mxu1 %v2936_v60 }
  0xad   : > { %2690 = vmatprep.subr.bf16.mxu1 %v3318_v23 }
  0xaf   : > { %2675 = vmatmul.mubr.bf16.vlgmr.msra.gmra.mxu1 %v3571_v22 }
  0xb0   : > { %626 = vmatmul.mubr.bf16.gmra.mxu0 %v3571_v22  ;;  %2692 = vmatprep.mubr.msk.bf16.mxu1 %vm3319_vm0, %v3318_v23 }
  0xb1   : > { %2680 = vmatprep.mubr.msk.bf16.mxu0 %vm3319_vm0, %v3318_v23 }
 0x168   : > { %v617_v27 = vpop.f32.mrf.mxu0 }
 0x169   : > { %v618_v45 = vadd.f32 %v617_v27, %v443_v39 }
 0x16a   : > { %v619_v29 = vpop.f32.mrf.mxu0 }
 0x16b   : > { %v620_v34 = vadd.f32 %v619_v29, %v447_v30  ;;  %v450_v29 = vsub.s32 2, %v3577_v25 }
 0x16c   : > { %v621_v31 = vpop.f32.mrf.mxu0 }
 0x16d   : > { %v622_v42 = vadd.f32 %v621_v31, %v443_v39  ;;  %v451_v31 = vrot.slane %v3585_v28, %v450_v29 }
 0x16e   : > { %v623_v32 = vpop.f32.mrf.mxu0 }
 0x16f   : > { %v624_v35 = vadd.f32 %v623_v32, %v447_v30  ;;  %v3599_v47 = vpack.c.bf16 %v622_v42, %v618_v45 }
 0x170   : > { %v627_v36 = vpop.f32.mrf.mxu0 }
 0x171   : > { %v3592_v37 = vpack.c.bf16 %v624_v35, %v620_v34  ;;  %v628_v49 = vadd.f32 %v627_v36, %v443_v39 }
 0x172   : > { %v629_v38 = vpop.f32.mrf.mxu0 }
 0x173   : > { %v696_v40 = vsel %vm691_vm1, %v3592_v37, 0  ;;  %v630_v43 = vadd.f32 %v629_v38, %v447_v30 }
 0x174   : > { %v631_v41 = vpop.f32.mrf.mxu0  ;;  %2679 = vmatpush3.bf16.xpose.msra.mxu0 %v696_v40 }
 0x175   : > { %2684 = vmatprep.subr.bf16.mxu0 %v3318_v23  ;;  %v632_v50 = vadd.f32 %v631_v41, %v443_v39 }
 0x176   : > { %v633_v44 = vpop.f32.mrf.mxu0 }
 0x177   : > { %v634_v46 = vadd.f32 %v633_v44, %v447_v30  ;;  %v3610_v52 = vpack.c.bf16 %v632_v50, %v628_v49  ;;  %v2676_v30 = vpop.f32.mrf.mxu1 }
 0x178   : > { %v679_v34 = vadd.f32 %v2676_v30, %v451_v31 }
 0x179   : > { %v3601_v48 = vpack.c.bf16 %v634_v46, %v630_v43  ;;  %v670_v32 = vpop.f32.mrf.mxu1 }
 0x17a   : > { %v671_v36 = vadd.f32 %v670_v32, %v451_v31 }
 0x17b   : > { %2681 = vmatmul.mubr.msk.bf16.vlgmr.msra.gmra.mxu0 %vm691_vm1, %v3599_v47  ;;  %v743_v51 = vsel %vm691_vm1, %v3601_v48, 0  ;;  %v2677_v35 = vpop.f32.mrf.mxu1 }
 0x17c   : > { %2685 = vmatpush3.bf16.xpose.msra.mxu0 %v743_v51  ;;  %2686 = vmatprep.mubr.msk.bf16.mxu0 %vm3319_vm0, %v3318_v23  ;;  %v682_v38 = vadd.f32 %v2677_v35, %v451_v31 }
 0x17d   : > { %2696 = vmatprep.subr.bf16.mxu0 %v3318_v23  ;;  %v673_v39 = vpop.f32.mrf.mxu1 }
 0x17e   : > { %v3633_v40 = vpack.c.bf16 %v682_v38, %v679_v34  ;;  %v674_v41 = vadd.f32 %v673_v39, %v451_v31 }
 0x180   : > { %v3635_v42 = vpack.c.bf16 %v674_v41, %v671_v36 }
 0x182   : > { %2691 = vmatpush3.bf16.msra.mxu1 %v3635_v42 }
 0x183   : > { %2687 = vmatmul.mubr.msk.bf16.vlgmr.msra.gmra.mxu0 %vm691_vm1, %v3610_v52  ;;  %2702 = vmatprep.subr.bf16.mxu1 %v3318_v23 }
 0x184   : > { %2698 = vmatprep.mubr.msk.bf16.mxu0 %vm3319_vm0, %v3318_v23  ;;  %2697 = vmatpush3.bf16.msra.mxu0 %v3633_v40 }
 0x185   : > { %2708 = vmatprep.subr.bf16.mxu0 %v3318_v23 }
 0x23b   : > { %v732_v61 = vpop.f32.mrf.mxu0 }
 0x23c   : > { %v787_v62 = vsel %vm786_vm2, %v732_v61, -inf }
 0x23d   : > { %788 = vmax.xlane.f32.xlu0 %v787_v62  ;;  %v2682_v63 = vpop.f32.mrf.mxu0 }
 0x23f   : > { %v735_v1 = vpop.f32.mrf.mxu0 }
 0x240   : > { %v790_v2 = vsel %vm786_vm2, %v735_v1, -inf }
 0x241   : > { %791 = vmax.xlane.f32.xlu0 %v790_v2  ;;  %v2683_v3 = vpop.f32.mrf.mxu0 }
 0x243   : > { %v779_v4 = vpop.f32.mrf.mxu0 }
 0x244   : > { %v793_v5 = vsel %vm786_vm2, %v779_v4, -inf }
 0x245   : > { %794 = vmax.xlane.f32.xlu1 %v793_v5  ;;  %v2688_v6 = vpop.f32.mrf.mxu0 }
 0x247   : > { %v782_v7 = vpop.f32.mrf.mxu0 }
 0x248   : > { %v796_v8 = vsel %vm786_vm2, %v782_v7, -inf }
 0x249   : > { %797 = vmax.xlane.f32.xlu1 %v796_v8  ;;  %v2689_v9 = vpop.f32.mrf.mxu0 }
 0x2c6   : > { %v789_v10 = vpop.xlane.xlu0 %788 }
 0x2c7   : > { %v799_v11 = vsub.f32 %v732_v61, %v789_v10 }
 0x2c9   : > { %v803_v12 = vmul.f32 1.442695, %v799_v11 }
 0x2ca   : > { %v792_v13 = vpop.xlane.xlu0 %791 }
 0x2cb   : > { %2985 = vpow2.f32 %v803_v12  ;;  %v800_v14 = vsub.f32 %v735_v1, %v792_v13 }
 0x2cd   : > { %v805_v15 = vmul.f32 1.442695, %v800_v14 }
 0x2ce   : > { %v795_v16 = vpop.xlane.xlu1 %794 }
 0x2cf   : > { %2987 = vpow2.f32 %v805_v15  ;;  %v801_v17 = vsub.f32 %v779_v4, %v795_v16 }
 0x2d1   : > { %v807_v18 = vmul.f32 1.442695, %v801_v17 }
 0x2d2   : > { %v798_v28 = vpop.xlane.xlu1 %797 }
 0x2d3   : > { %2989 = vpow2.f32 %v807_v18  ;;  %v802_v43 = vsub.f32 %v782_v7, %v798_v28 }
 0x2d5   : > { %v809_v44 = vmul.f32 1.442695, %v802_v43 }
 0x2d7   : > { %2991 = vpow2.f32 %v809_v44 }
 0x2d8   : > { %v2986_v19 = vpop.eup %2985 }
 0x2d9   : > { %v811_v20 = vsel %vm786_vm2, %v2986_v19, 0.0 }
 0x2da   : > { %812 = vadd.xlane.f32.xlu0 %v811_v20 }
 0x2dc   : > { %v2988_v21 = vpop.eup %2987 }
 0x2dd   : > { %v814_v22 = vsel %vm786_vm2, %v2988_v21, 0.0 }
 0x2de   : > { %815 = vadd.xlane.f32.xlu1 %v814_v22 }
 0x2e0   : > { %v2990_v24 = vpop.eup %2989 }
 0x2e1   : > { %v817_v27 = vsel %vm786_vm2, %v2990_v24, 0.0 }
 0x2e2   : > { %818 = vadd.xlane.f32.xlu0 %v817_v27 }
 0x2e4   : > { %v2992_v45 = vpop.eup %2991 }
 0x2e5   : > { %v820_v46 = vsel %vm786_vm2, %v2992_v45, 0.0 }
 0x2ef   : > { %982 = vrot.lane.b32.xlu1 %v3601_v48, %s3320_s9 }
 0x2f8   : > { %929 = vrot.lane.b32.xlu0 %v3592_v37, %s3320_s9 }
 0x313   : > { %821 = vadd.xlane.f32.xlu1 %v820_v46 }
 0x324   : > { %926 = vrot.lane.b32.xlu1 %v3599_v47, %s3320_s9 }
 0x328   : > { %979 = vrot.lane.b32.xlu1 %v3610_v52, %s3320_s9 }
 0x363   : > { %v813_v49 = vpop.xlane.xlu0 %812 }
 0x364   : > { %2993 = vrcp.f32 %v813_v49 }
 0x367   : > { %v816_v50 = vpop.xlane.xlu1 %815 }
 0x368   : > { %2995 = vrcp.f32 %v816_v50 }
 0x36b   : > { %v819_v51 = vpop.xlane.xlu0 %818  ;;  %v983_v60 = vpop.permute.xlu1 %982 }
 0x36c   : > { %2997 = vrcp.f32 %v819_v51  ;;  %v988_v5 = vsel %vm691_vm1, %v983_v60, 0 }
 0x36f   : > { %v930_v57 = vpop.permute.xlu0 %929 }
 0x370   : > { %v935_v59 = vsel %vm691_vm1, %v930_v57, 0 }
 0x371   : > { %v2994_v53 = vpop.eup %2993 }
 0x372   : > { %v827_v55 = vmul.f32 %v2994_v53, %v2986_v19 }
 0x375   : > { %v2996_v54 = vpop.eup %2995 }
 0x376   : > { %v828_v56 = vmul.f32 %v2996_v54, %v2988_v21 }
 0x378   : > { %v831_v58 = vpack.c.bf16 %v828_v56, %v827_v55 }
 0x379   : > { %v2998_v63 = vpop.eup %2997 }
 0x37a   : > { %2693 = vmatmul.mubr.msk.bf16.vlgmr.msra.gmra.mxu1 %vm786_vm2, %v831_v58  ;;  %v829_v2 = vmul.f32 %v2998_v63, %v2990_v24 }
 0x37b   : > { %2703 = vmatpush3.bf16.xpose.msra.mxu1 %v935_v59  ;;  %2704 = vmatprep.mubr.msk.bf16.mxu1 %vm3319_vm0, %v3318_v23 }
 0x37c   : > { %2714 = vmatprep.subr.bf16.mxu1 %v3318_v23 }
 0x39c   : > { %v822_v61 = vpop.xlane.xlu1 %821 }
 0x39d   : > { %2999 = vrcp.f32 %v822_v61 }
 0x3a0   : > { %v927_v62 = vpop.permute.xlu1 %926 }
 0x3a1   : > { %2705 = vmatmul.mubr.msk.bf16.vlgmr.msra.gmra.mxu1 %vm691_vm1, %v927_v62 }
 0x3a2   : > { %2716 = vmatprep.mubr.msk.bf16.mxu1 %vm3319_vm0, %v3318_v23 }
 0x3a4   : > { %v980_v6 = vpop.permute.xlu1 %979 }
 0x3aa   : > { %v3000_v1 = vpop.eup %2999 }
 0x3ab   : > { %v830_v3 = vmul.f32 %v3000_v1, %v2992_v45 }
 0x3ad   : > { %v832_v4 = vpack.c.bf16 %v830_v3, %v829_v2 }
 0x3af   : > { %2699 = vmatmul.mubr.msk.bf16.vlgmr.msra.gmra.mxu0 %vm786_vm2, %v832_v4 }
 0x3b0   : > { %2709 = vmatpush3.bf16.xpose.msra.mxu0 %v988_v5  ;;  %2710 = vmatprep.mubr.msk.bf16.mxu0 %vm3319_vm0, %v3318_v23 }
 0x3b1   : > { %2720 = vmatprep.subr.bf16.mxu0 %v3318_v23 }
 0x3b7   : > { %2711 = vmatmul.mubr.msk.bf16.vlgmr.msra.gmra.mxu0 %vm691_vm1, %v980_v6 }
 0x3b8   : > { %2722 = vmatprep.mubr.msk.bf16.mxu0 %vm3319_vm0, %v3318_v23 }
 0x43a   : > { %v870_v7 = vpop.f32.mrf.mxu1 }
 0x43b   : > { %921 = vst.msk [vmem:[#allocation2] sm:$0xff] %vm691_vm1, %v870_v7 }
 0x43c   : > { %v2694_v8 = vpop.f32.mrf.mxu1 }
 0x43e   : > { %v873_v9 = vpop.f32.mrf.mxu1 }
 0x43f   : > { %922 = vst.msk [vmem:[#allocation2 + $0x8] sm:$0xff] %vm691_vm1, %v873_v9 }
 0x440   : > { %v2695_v10 = vpop.f32.mrf.mxu1 }
 0x461   : > { %v971_v11 = vpop.f32.mrf.mxu1 }
 0x462   : > { %v1031_v12 = vsel %vm786_vm2, %v971_v11, -inf }
 0x463   : > { %1032 = vmax.xlane.f32.xlu0 %v1031_v12  ;;  %v2706_v13 = vpop.f32.mrf.mxu1 }
 0x465   : > { %v974_v14 = vpop.f32.mrf.mxu1 }
 0x466   : > { %v1034_v15 = vsel %vm786_vm2, %v974_v14, -inf }
 0x467   : > { %1035 = vmax.xlane.f32.xlu1 %v1034_v15  ;;  %v2707_v16 = vpop.f32.mrf.mxu1 }
 0x46f   : > { %v914_v17 = vpop.f32.mrf.mxu0 }
 0x470   : > { %923 = vst.msk [vmem:[#allocation2 + $0x10] sm:$0xff] %vm691_vm1, %v914_v17 }
 0x471   : > { %v2700_v18 = vpop.f32.mrf.mxu0 }
 0x473   : > { %v917_v19 = vpop.f32.mrf.mxu0 }
 0x474   : > { %924 = vst.msk [vmem:[#allocation2 + $0x18] sm:$0xff] %vm691_vm1, %v917_v19 }
 0x475   : > { %v2701_v20 = vpop.f32.mrf.mxu0 }
 0x477   : > { %v1024_v21 = vpop.f32.mrf.mxu0 }
 0x478   : > { %v1037_v22 = vsel %vm786_vm2, %v1024_v21, -inf }
 0x479   : > { %1038 = vmax.xlane.f32.xlu0 %v1037_v22  ;;  %v2712_v24 = vpop.f32.mrf.mxu0 }
 0x47b   : > { %v1027_v27 = vpop.f32.mrf.mxu0 }
 0x47c   : > { %v1040_v30 = vsel %vm786_vm2, %v1027_v27, -inf }
 0x47d   : > { %1041 = vmax.xlane.f32.xlu0 %v1040_v30  ;;  %v2713_v31 = vpop.f32.mrf.mxu0 }
 0x4ec   : > { %v1033_v32 = vpop.xlane.xlu0 %1032 }
 0x4ed   : > { %v1043_v34 = vsub.f32 %v971_v11, %v1033_v32 }
 0x4ef   : > { %v1047_v35 = vmul.f32 1.442695, %v1043_v34 }
 0x4f0   : > { %v1036_v36 = vpop.xlane.xlu1 %1035 }
 0x4f1   : > { %3001 = vpow2.f32 %v1047_v35  ;;  %v1044_v38 = vsub.f32 %v974_v14, %v1036_v36 }
 0x4f3   : > { %v1049_v39 = vmul.f32 1.442695, %v1044_v38 }
 0x4f5   : > { %3003 = vpow2.f32 %v1049_v39 }
 0x4fe   : > { %v3002_v41 = vpop.eup %3001 }
 0x4ff   : > { %v1055_v28 = vsel %vm786_vm2, %v3002_v41, 0.0 }
 0x500   : > { %1056 = vadd.xlane.f32.xlu0 %v1055_v28 }
 0x502   : > { %v3004_v43 = vpop.eup %3003  ;;  %v1039_v44 = vpop.xlane.xlu0 %1038 }
 0x503   : > { %v1045_v45 = vsub.f32 %v1024_v21, %v1039_v44  ;;  %v1058_v46 = vsel %vm786_vm2, %v3004_v43, 0.0 }
 0x504   : > { %1059 = vadd.xlane.f32.xlu1 %v1058_v46 }
 0x505   : > { %v1051_v49 = vmul.f32 1.442695, %v1045_v45 }
 0x506   : > { %v1042_v53 = vpop.xlane.xlu0 %1041 }
 0x507   : > { %3005 = vpow2.f32 %v1051_v49  ;;  %v1046_v54 = vsub.f32 %v1027_v27, %v1042_v53 }
 0x509   : > { %v1053_v55 = vmul.f32 1.442695, %v1046_v54 }
 0x50b   : > { %3007 = vpow2.f32 %v1053_v55 }
 0x514   : > { %v3006_v50 = vpop.eup %3005 }
 0x515   : > { %1126 = vrot.lane.b32.xlu1 %v3633_v40, %s3320_s9  ;;  %v1061_v51 = vsel %vm786_vm2, %v3006_v50, 0.0 }
 0x516   : > { %1062 = vadd.xlane.f32.xlu0 %v1061_v51 }
 0x518   : > { %v3008_v56 = vpop.eup %3007 }
 0x519   : > { %1196 = vrot.lane.b32.xlu1 %v3592_v37, %s3321_s20  ;;  %v1064_v57 = vsel %vm786_vm2, %v3008_v56, 0.0 }
 0x52c   : > { %1078 = vrot.lane.b32.xlu0 %v3635_v42, %s3320_s9 }
 0x530   : > { %1194 = vrot.lane.b32.xlu0 %v3599_v47, %s3321_s20 }
 0x53d   : > { %1065 = vadd.xlane.f32.xlu1 %v1064_v57 }
 0x54e   : > { %1247 = vrot.lane.b32.xlu1 %v3601_v48, %s3321_s20 }
 0x552   : > { %1245 = vrot.lane.b32.xlu1 %v3610_v52, %s3321_s20 }
 0x589   : > { %v1057_v59 = vpop.xlane.xlu0 %1056 }
 0x58d   : > { %v1060_v58 = vpop.xlane.xlu1 %1059 }
 0x58e   : > { %3009 = vrcp.f32 %v1060_v58 }
 0x58f   : > { %3011 = vrcp.f32 %v1057_v59 }
 0x591   : > { %v1127_v60 = vpop.permute.xlu1 %1126 }
 0x592   : > { %2721 = vmatpush3.bf16.msra.mxu0 %v1127_v60 }
 0x593   : > { %2732 = vmatprep.subr.bf16.mxu0 %v3318_v23 }
 0x595   : > { %v1197_v4 = vpop.permute.xlu1 %1196 }
 0x596   : > { %v1202_v6 = vsel %vm691_vm1, %v1197_v4, 0 }
 0x59b   : > { %v3010_v61 = vpop.eup %3009 }
 0x59c   : > { %v3012_v63 = vpop.eup %3011  ;;  %v1072_v1 = vmul.f32 %v3010_v61, %v3004_v43 }
 0x59d   : > { %v1071_v3 = vmul.f32 %v3012_v63, %v3002_v41 }
 0x59f   : > { %v1063_v62 = vpop.xlane.xlu0 %1062  ;;  %v1075_v5 = vpack.c.bf16 %v1072_v1, %v1071_v3 }
 0x5a0   : > { %3013 = vrcp.f32 %v1063_v62 }
 0x5a3   : > { %v1079_v2 = vpop.permute.xlu0 %1078 }
 0x5a4   : > { %2715 = vmatpush3.bf16.msra.mxu1 %v1079_v2 }
 0x5a5   : > { %2726 = vmatprep.subr.bf16.mxu1 %v3318_v23 }
 0x5a7   : > { %2717 = vmatmul.mubr.msk.bf16.vlgmr.msra.gmra.mxu1 %vm786_vm2, %v1075_v5  ;;  %v1195_v7 = vpop.permute.xlu0 %1194 }
 0x5a8   : > { %2727 = vmatpush3.bf16.xpose.msra.mxu1 %v1202_v6  ;;  %2728 = vmatprep.mubr.msk.bf16.mxu1 %vm3319_vm0, %v3318_v23 }
 0x5a9   : > { %2738 = vmatprep.subr.bf16.mxu1 %v3318_v23 }
 0x5ad   : > { %v3014_v9 = vpop.eup %3013 }
 0x5ae   : > { %v1073_v11 = vmul.f32 %v3014_v9, %v3006_v50 }
 0x5af   : > { %2729 = vmatmul.mubr.msk.bf16.vlgmr.msra.gmra.mxu1 %vm691_vm1, %v1195_v7 }
 0x5b0   : > { %2740 = vmatprep.mubr.msk.bf16.mxu1 %vm3319_vm0, %v3318_v23 }
 0x5c6   : > { %v1066_v8 = vpop.xlane.xlu1 %1065 }
 0x5c7   : > { %3015 = vrcp.f32 %v1066_v8 }
 0x5ca   : > { %v1248_v13 = vpop.permute.xlu1 %1247 }
 0x5cb   : > { %v1253_v15 = vsel %vm691_vm1, %v1248_v13, 0 }
 0x5ce   : > { %v1246_v16 = vpop.permute.xlu1 %1245 }
 0x5d4   : > { %v3016_v10 = vpop.eup %3015 }
 0x5d5   : > { %v1074_v12 = vmul.f32 %v3016_v10, %v3008_v56 }
 0x5d7   : > { %v1076_v14 = vpack.c.bf16 %v1074_v12, %v1073_v11 }
 0x5d9   : > { %2723 = vmatmul.mubr.msk.bf16.vlgmr.msra.gmra.mxu0 %vm786_vm2, %v1076_v14 }
 0x5da   : > { %2733 = vmatpush3.bf16.xpose.msra.mxu0 %v1253_v15  ;;  %2734 = vmatprep.mubr.msk.bf16.mxu0 %vm3319_vm0, %v3318_v23 }
 0x5db   : > { %2744 = vmatprep.subr.bf16.mxu0 %v3318_v23 }
 0x5e1   : > { %2735 = vmatmul.mubr.msk.bf16.vlgmr.msra.gmra.mxu0 %vm691_vm1, %v1246_v16 }
 0x5e2   : > { %2746 = vmatprep.mubr.msk.bf16.mxu0 %vm3319_vm0, %v3318_v23 }
 0x667   : > { %v3706_v17 = vpop.f32.mrf.mxu1 }
 0x669   : > { %v2718_v18 = vpop.f32.mrf.mxu1 }
 0x66b   : > { %v3708_v19 = vpop.f32.mrf.mxu1 }
 0x66d   : > { %v2719_v20 = vpop.f32.mrf.mxu1 }
 0x66f   : > { %v1238_v21 = vpop.f32.mrf.mxu1 }
 0x670   : > { %v1296_v22 = vsel %vm786_vm2, %v1238_v21, -inf }
 0x671   : > { %1297 = vmax.xlane.f32.xlu0 %v1296_v22  ;;  %v2730_v24 = vpop.f32.mrf.mxu1 }
 0x673   : > { %v1241_v27 = vpop.f32.mrf.mxu1 }
 0x674   : > { %v1299_v30 = vsel %vm786_vm2, %v1241_v27, -inf }
 0x675   : > { %1300 = vmax.xlane.f32.xlu1 %v1299_v30  ;;  %v2731_v31 = vpop.f32.mrf.mxu1 }
 0x699   : > { %v3712_v32 = vpop.f32.mrf.mxu0 }
 0x69b   : > { %v2724_v34 = vpop.f32.mrf.mxu0 }
 0x69d   : > { %v3714_v35 = vpop.f32.mrf.mxu0 }
 0x69f   : > { %v2725_v36 = vpop.f32.mrf.mxu0 }
 0x6a1   : > { %v1289_v38 = vpop.f32.mrf.mxu0 }
 0x6a2   : > { %v1302_v39 = vsel %vm786_vm2, %v1289_v38, -inf }
 0x6a3   : > { %1303 = vmax.xlane.f32.xlu0 %v1302_v39  ;;  %v2736_v41 = vpop.f32.mrf.mxu0 }
 0x6a5   : > { %v1292_v28 = vpop.f32.mrf.mxu0 }
 0x6a6   : > { %v1305_v43 = vsel %vm786_vm2, %v1292_v28, -inf }
 0x6a7   : > { %1306 = vmax.xlane.f32.xlu0 %v1305_v43  ;;  %v2737_v44 = vpop.f32.mrf.mxu0 }
 0x6fa   : > { %v1298_v45 = vpop.xlane.xlu0 %1297 }
 0x6fb   : > { %v1308_v46 = vsub.f32 %v1238_v21, %v1298_v45 }
 0x6fd   : > { %v1312_v49 = vmul.f32 1.442695, %v1308_v46 }
 0x6fe   : > { %v1301_v50 = vpop.xlane.xlu1 %1300 }
 0x6ff   : > { %3017 = vpow2.f32 %v1312_v49  ;;  %v1309_v51 = vsub.f32 %v1241_v27, %v1301_v50 }
 0x701   : > { %v1314_v53 = vmul.f32 1.442695, %v1309_v51 }
 0x703   : > { %3019 = vpow2.f32 %v1314_v53 }
 0x70c   : > { %v3018_v54 = vpop.eup %3017 }
 0x70d   : > { %v1320_v55 = vsel %vm786_vm2, %v3018_v54, 0.0 }
 0x70e   : > { %1321 = vadd.xlane.f32.xlu0 %v1320_v55 }
 0x710   : > { %v3020_v56 = vpop.eup %3019 }
 0x711   : > { %v1323_v57 = vsel %vm786_vm2, %v3020_v56, 0.0 }
 0x712   : > { %1324 = vadd.xlane.f32.xlu1 %v1323_v57 }
 0x723   : > { %1389 = vrot.lane.b32.xlu1 %v3633_v40, %s3321_s20 }
 0x727   : > { %1459 = vrot.lane.b32.xlu1 %v3592_v37, %s3322_s22 }
 0x72c   : > { %v1304_v58 = vpop.xlane.xlu0 %1303 }
 0x72d   : > { %v1310_v59 = vsub.f32 %v1289_v38, %v1304_v58 }
 0x72f   : > { %v1316_v60 = vmul.f32 1.442695, %v1310_v59 }
 0x730   : > { %v1307_v61 = vpop.xlane.xlu0 %1306 }
 0x731   : > { %3021 = vpow2.f32 %v1316_v60  ;;  %v1311_v62 = vsub.f32 %v1292_v28, %v1307_v61 }
 0x733   : > { %v1318_v63 = vmul.f32 1.442695, %v1311_v62 }
 0x735   : > { %3023 = vpow2.f32 %v1318_v63 }
 0x73e   : > { %v3022_v1 = vpop.eup %3021 }
 0x73f   : > { %v1326_v2 = vsel %vm786_vm2, %v3022_v1, 0.0 }
 0x740   : > { %1327 = vadd.xlane.f32.xlu0 %v1326_v2 }
 0x742   : > { %v3024_v3 = vpop.eup %3023 }
 0x743   : > { %v1329_v4 = vsel %vm786_vm2, %v3024_v3, 0.0 }
 0x74b   : > { %1330 = vadd.xlane.f32.xlu1 %v1329_v4 }
 0x756   : > { %1342 = vrot.lane.b32.xlu0 %v3635_v42, %s3321_s20 }
 0x75a   : > { %1457 = vrot.lane.b32.xlu0 %v3599_v47, %s3322_s22 }
 0x75c   : > { %1510 = vrot.lane.b32.xlu1 %v3601_v48, %s3322_s22 }
 0x760   : > { %1508 = vrot.lane.b32.xlu1 %v3610_v52, %s3322_s22 }
 0x797   : > { %v1322_v6 = vpop.xlane.xlu0 %1321 }
 0x79b   : > { %v1325_v37 = vpop.xlane.xlu1 %1324 }
 0x79c   : > { %3025 = vrcp.f32 %v1325_v37 }
 0x79d   : > { %3027 = vrcp.f32 %v1322_v6 }
 0x79f   : > { %v1390_v5 = vpop.permute.xlu1 %1389 }
 0x7a0   : > { %2745 = vmatpush3.bf16.msra.mxu0 %v1390_v5 }
 0x7a1   : > { %2756 = vmatprep.subr.bf16.mxu0 %v3318_v23 }
 0x7a3   : > { %v1460_v12 = vpop.permute.xlu1 %1459 }
 0x7a4   : > { %v1465_v52 = vsel %vm691_vm1, %v1460_v12, 0 }
 0x7a9   : > { %v3026_v7 = vpop.eup %3025 }
 0x7aa   : > { %v3028_v9 = vpop.eup %3027  ;;  %v1337_v10 = vmul.f32 %v3026_v7, %v3020_v56 }
 0x7ab   : > { %v1336_v47 = vmul.f32 %v3028_v9, %v3018_v54 }
 0x7ad   : > { %v1340_v48 = vpack.c.bf16 %v1337_v10, %v1336_v47 }
 0x7c9   : > { %v1328_v8 = vpop.xlane.xlu0 %1327 }
 0x7ca   : > { %3029 = vrcp.f32 %v1328_v8 }
 0x7cd   : > { %v1343_v11 = vpop.permute.xlu0 %1342 }
 0x7ce   : > { %2739 = vmatpush3.bf16.msra.mxu1 %v1343_v11 }
 0x7cf   : > { %2750 = vmatprep.subr.bf16.mxu1 %v3318_v23 }
 0x7d1   : > { %2741 = vmatmul.mubr.msk.bf16.vlgmr.msra.gmra.mxu1 %vm786_vm2, %v1340_v48  ;;  %v1458_v14 = vpop.permute.xlu0 %1457 }
 0x7d2   : > { %2751 = vmatpush3.bf16.xpose.msra.mxu1 %v1465_v52  ;;  %2752 = vmatprep.mubr.msk.bf16.mxu1 %vm3319_vm0, %v3318_v23 }
 0x7d3   : > { %2762 = vmatprep.subr.bf16.mxu1 %v3318_v23 }
 0x7d4   : > { %v1331_v13 = vpop.xlane.xlu1 %1330 }
 0x7d5   : > { %3031 = vrcp.f32 %v1331_v13 }
 0x7d7   : > { %v3030_v15 = vpop.eup %3029 }
 0x7d8   : > { %v1338_v18 = vmul.f32 %v3030_v15, %v3022_v1  ;;  %v1511_v21 = vpop.permute.xlu1 %1510 }
 0x7d9   : > { %2753 = vmatmul.mubr.msk.bf16.vlgmr.msra.gmra.mxu1 %vm691_vm1, %v1458_v14  ;;  %v1516_v24 = vsel %vm691_vm1, %v1511_v21, 0 }
 0x7da   : > { %2764 = vmatprep.mubr.msk.bf16.mxu1 %vm3319_vm0, %v3318_v23 }
 0x7dc   : > { %v1509_v27 = vpop.permute.xlu1 %1508 }
 0x7e2   : > { %v3032_v16 = vpop.eup %3031 }
 0x7e3   : > { %v1339_v20 = vmul.f32 %v3032_v16, %v3024_v3 }
 0x7e5   : > { %v1341_v22 = vpack.c.bf16 %v1339_v20, %v1338_v18 }
 0x7e7   : > { %2747 = vmatmul.mubr.msk.bf16.vlgmr.msra.gmra.mxu0 %vm786_vm2, %v1341_v22 }
 0x7e8   : > { %2757 = vmatpush3.bf16.xpose.msra.mxu0 %v1516_v24  ;;  %2758 = vmatprep.mubr.msk.bf16.mxu0 %vm3319_vm0, %v3318_v23 }
 0x7e9   : > { %2768 = vmatprep.subr.bf16.mxu0 %v3318_v23 }
 0x7ef   : > { %2759 = vmatmul.mubr.msk.bf16.vlgmr.msra.gmra.mxu0 %vm691_vm1, %v1509_v27 }
 0x7f0   : > { %2770 = vmatprep.mubr.msk.bf16.mxu0 %vm3319_vm0, %v3318_v23 }
 0x891   : > { %v1382_v30 = vpop.f32.mrf.mxu1 }
 0x893   : > { %v2742_v31 = vpop.f32.mrf.mxu1 }
 0x895   : > { %v1385_v34 = vpop.f32.mrf.mxu1 }
 0x897   : > { %v2743_v36 = vpop.f32.mrf.mxu1 }
 0x899   : > { %v1501_v38 = vpop.f32.mrf.mxu1 }
 0x89a   : > { %v1559_v39 = vsel %vm786_vm2, %v1501_v38, -inf }
 0x89b   : > { %1560 = vmax.xlane.f32.xlu0 %v1559_v39  ;;  %v2754_v41 = vpop.f32.mrf.mxu1  ;;  %v2937_v39 = vld [vmem:[#allocation8 + $0x38] sm:$0xff]  }
 0x89c   : > { %v2938_v41 = vld [vmem:[#allocation8 + $0x30] sm:$0xff]  }
 0x89d   : > { %v1504_v28 = vpop.f32.mrf.mxu1 }
 0x89e   : > { %v1562_v43 = vsel %vm786_vm2, %v1504_v28, -inf }
 0x89f   : > { %1563 = vmax.xlane.f32.xlu1 %v1562_v43  ;;  %v2755_v44 = vpop.f32.mrf.mxu1  ;;  %v2940_v43 = vld [vmem:[#allocation8 + $0x20] sm:$0xff]  }
 0x8a0   : > { %v2941_v44 = vld [vmem:[#allocation8 + $0x18] sm:$0xff]  }
 0x8a7   : > { %v1429_v45 = vpop.f32.mrf.mxu0 }
 0x8a9   : > { %v2748_v46 = vpop.f32.mrf.mxu0 }
 0x8ab   : > { %v1432_v49 = vpop.f32.mrf.mxu0 }
 0x8ad   : > { %v2749_v50 = vpop.f32.mrf.mxu0 }
 0x8af   : > { %v1552_v51 = vpop.f32.mrf.mxu0 }
 0x8b0   : > { %v1565_v23 = vsel %vm786_vm2, %v1552_v51, -inf }
 0x8b1   : > { %1566 = vmax.xlane.f32.xlu0 %v1565_v23  ;;  %v2760_v53 = vpop.f32.mrf.mxu0  ;;  %v2943_v23 = vld [vmem:[#allocation8 + $0x8] sm:$0xff]  }
 0x8b2   : > { %v2944_v53 = vld [vmem:[#allocation8] sm:$0xff]  }
 0x8b3   : > { %v1555_v54 = vpop.f32.mrf.mxu0 }
 0x8b4   : > { %v1568_v55 = vsel %vm786_vm2, %v1555_v54, -inf }
 0x8b5   : > { %1569 = vmax.xlane.f32.xlu0 %v1568_v55  ;;  %v2761_v56 = vpop.f32.mrf.mxu0 }
 0x924   : > { %v1561_v57 = vpop.xlane.xlu0 %1560 }
 0x925   : > { %v1571_v58 = vsub.f32 %v1501_v38, %v1561_v57 }
 0x927   : > { %v1575_v59 = vmul.f32 1.442695, %v1571_v58 }
 0x928   : > { %v1564_v60 = vpop.xlane.xlu1 %1563 }
 0x929   : > { %3033 = vpow2.f32 %v1575_v59  ;;  %v1572_v61 = vsub.f32 %v1504_v28, %v1564_v60  ;;  %v2939_v28 = vld [vmem:[#allocation8 + $0x28] sm:$0xff]  }
 0x92b   : > { %v1577_v62 = vmul.f32 1.442695, %v1572_v61 }
 0x92d   : > { %3035 = vpow2.f32 %v1577_v62 }
 0x936   : > { %v3034_v63 = vpop.eup %3033 }
 0x937   : > { %v1583_v1 = vsel %vm786_vm2, %v3034_v63, 0.0 }
 0x938   : > { %1584 = vadd.xlane.f32.xlu0 %v1583_v1 }
 0x93a   : > { %v3036_v2 = vpop.eup %3035  ;;  %v1567_v3 = vpop.xlane.xlu0 %1566 }
 0x93b   : > { %v1573_v4 = vsub.f32 %v1552_v51, %v1567_v3  ;;  %v1586_v37 = vsel %vm786_vm2, %v3036_v2, 0.0 }
 0x93c   : > { %1587 = vadd.xlane.f32.xlu1 %v1586_v37  ;;  %v3794_v37 = vld [vmem:[%s3910_s7] sm:$0x3f] }
 0x93d   : > { %v1579_v5 = vmul.f32 1.442695, %v1573_v4 }
 0x93e   : > { %v1570_v6 = vpop.xlane.xlu0 %1569 }
 0x93f   : > { %3037 = vpow2.f32 %v1579_v5  ;;  %v1574_v7 = vsub.f32 %v1555_v54, %v1570_v6  ;;  %v1745_v6 = vrot.slane %v3794_v37, %v3590_v33 }
 0x941   : > { %v1581_v8 = vmul.f32 1.442695, %v1574_v7 }
 0x943   : > { %3039 = vpow2.f32 %v1581_v8 }
 0x94c   : > { %v3038_v9 = vpop.eup %3037 }
 0x94d   : > { %v1589_v10 = vsel %vm786_vm2, %v3038_v9, 0.0 }
 0x94e   : > { %1590 = vadd.xlane.f32.xlu0 %v1589_v10 }
 0x950   : > { %v3040_v11 = vpop.eup %3039 }
 0x951   : > { %v1592_v47 = vsel %vm786_vm2, %v3040_v11, 0.0 }
 0x952   : > { %1593 = vadd.xlane.f32.xlu1 %v1592_v47 }
 0x963   : > { %1652 = vrot.lane.b32.xlu1 %v3633_v40, %s3322_s22 }
 0x964   : > { %1605 = vrot.lane.b32.xlu0 %v3635_v42, %s3322_s22 }
 0x967   : > { %1177 = vrot.lane.b32.xlu1 %v3706_v17, %s3322_s22 }
 0x968   : > { %1181 = vrot.lane.b32.xlu0 %v3712_v32, %s3322_s22 }
 0x96b   : > { %1179 = vrot.lane.b32.xlu1 %v3708_v19, %s3322_s22 }
 0x96c   : > { %1440 = vrot.lane.b32.xlu0 %v1382_v30, %s3321_s20 }
 0x96f   : > { %1183 = vrot.lane.b32.xlu1 %v3714_v35, %s3322_s22 }
 0x970   : > { %1444 = vrot.lane.b32.xlu0 %v1429_v45, %s3321_s20 }
 0x973   : > { %1442 = vrot.lane.b32.xlu1 %v1385_v34, %s3321_s20 }
 0x977   : > { %1446 = vrot.lane.b32.xlu1 %v1432_v49, %s3321_s20  ;;  %v2942_v49 = vld [vmem:[#allocation8 + $0x10] sm:$0xff]  }
 0x9c1   : > { %v1585_v42 = vpop.xlane.xlu0 %1584 }
 0x9c5   : > { %v1588_v40 = vpop.xlane.xlu1 %1587 }
 0x9c6   : > { %3041 = vrcp.f32 %v1588_v40 }
 0x9c7   : > { %3043 = vrcp.f32 %v1585_v42 }
 0x9d3   : > { %v3042_v17 = vpop.eup %3041 }
 0x9d4   : > { %v3044_v12 = vpop.eup %3043  ;;  %v1600_v48 = vmul.f32 %v3042_v17, %v3036_v2 }
 0x9d5   : > { %v1599_v13 = vmul.f32 %v3044_v12, %v3034_v63 }
 0x9d7   : > { %v1591_v32 = vpop.xlane.xlu0 %1590  ;;  %v1603_v35 = vpack.c.bf16 %v1600_v48, %v1599_v13  ;;  %v3067_v48 = vld [vmem:[%s3547_s15 + $0x10] sm:$0xff] }
 0x9d8   : > { %3045 = vrcp.f32 %v1591_v32  ;;  %v3066_v32 = vld [vmem:[%s3547_s15 + $0x8] sm:$0xff] }
 0x9db   : > { %v1594_v19 = vpop.xlane.xlu1 %1593  ;;  %v1606_v52 = vpop.permute.xlu0 %1605 }
 0x9dc   : > { %3047 = vrcp.f32 %v1594_v19  ;;  %2763 = vmatpush3.bf16.msra.mxu1 %v1606_v52  ;;  %v3068_v52 = vld [vmem:[%s3547_s15 + $0x18] sm:$0xff] }
 0x9dd   : > { %2774 = vmatprep.subr.bf16.mxu1 %v2937_v39 }
 0x9df   : > { %v1653_v14 = vpop.permute.xlu1 %1652  ;;  %2765 = vmatmul.mubr.msk.bf16.vlgmr.msra.gmra.mxu1 %vm786_vm2, %v1603_v35  ;;  %v1182_v15 = vpop.permute.xlu0 %1181  ;;  %v2945_v35 = vld [vmem:[#allocation9 + $0x70] ss:$8 sps:$4 sm:$0xff]  }
 0x9e0   : > { %1192 = vst.msk [vmem:[#allocation2 + $0x10] sm:$0xff] %vm1189_vm3, %v1182_v15  ;;  %2769 = vmatpush3.bf16.msra.mxu0 %v1653_v14  ;;  %2775 = vmatpush3.bf16.msra.mxu1 %v2937_v39  ;;  %v2947_v14 = vld [vmem:[#allocation9 + $0x74] ss:$8 sps:$4 sm:$0xff]  }
 0x9e1   : > { %2776 = vmatprep.subr.bf16.mxu1 %v2938_v41  ;;  %2018 = vmatprep.subr.bf16.mxu0 %v2947_v14 }
 0x9e3   : > { %v1178_v16 = vpop.permute.xlu1 %1177  ;;  %v1441_v18 = vpop.permute.xlu0 %1440 }
 0x9e4   : > { %1190 = vst.msk [vmem:[#allocation2] sm:$0xff] %vm1189_vm3, %v1178_v16  ;;  %2777 = vmatpush3.bf16.msra.mxu1 %v2938_v41 }
 0x9e5   : > { %1453 = vst.msk [vmem:[#allocation2] sm:$0xff] %vm1452_vm4, %v1441_v18  ;;  %v3046_v20 = vpop.eup %3045  ;;  %2778 = vmatprep.subr.bf16.mxu1 %v2939_v28 }
 0x9e6   : > { %v1601_v27 = vmul.f32 %v3046_v20, %v3038_v9 }
 0x9e7   : > { %v1180_v21 = vpop.permute.xlu1 %1179  ;;  %v1445_v22 = vpop.permute.xlu0 %1444 }
 0x9e8   : > { %1191 = vst.msk [vmem:[#allocation2 + $0x8] sm:$0xff] %vm1189_vm3, %v1180_v21  ;;  %2779 = vmatpush3.bf16.msra.mxu1 %v2939_v28 }
 0x9e9   : > { %1455 = vst.msk [vmem:[#allocation2 + $0x10] sm:$0xff] %vm1452_vm4, %v1445_v22  ;;  %v3048_v24 = vpop.eup %3047  ;;  %2780 = vmatprep.subr.bf16.mxu1 %v2940_v43 }
 0x9ea   : > { %v1602_v30 = vmul.f32 %v3048_v24, %v3040_v11  ;;  %v3065_v11 = vld [vmem:[%s3547_s15] sm:$0xff]  ;;  %s2333_s15 = scalar_lea.sflag [#allocation5], %s3541_s1 }
 0x9eb   : > { %v1184_v31 = vpop.permute.xlu1 %1183 }
 0x9ec   : > { %1193 = vst.msk [vmem:[#allocation2 + $0x18] sm:$0xff] %vm1189_vm3, %v1184_v31  ;;  %v1604_v34 = vpack.c.bf16 %v1602_v30, %v1601_v27  ;;  %2781 = vmatpush3.bf16.msra.mxu1 %v2940_v43  ;;  %v2950_v43 = vld [vmem:[#allocation9 + $0x64] ss:$8 sps:$4 sm:$0xff]  }
 0x9ed   : > { %2782 = vmatprep.subr.bf16.mxu1 %v2941_v44 }
 0x9ee   : > { %2771 = vmatmul.mubr.msk.bf16.vlgmr.msra.gmra.mxu0 %vm786_vm2, %v1604_v34 }
 0x9ef   : > { %v1443_v36 = vpop.permute.xlu1 %1442  ;;  %2050 = vmatprep.mubr.bf16.mxu0 %v3317_v0  ;;  %2019 = vmatpush1.bf16.msra.mxu0 %v2945_v35  ;;  %v1903_v35 = vrot.slane %v3794_v37, %v450_v29 }
 0x9f0   : > { %1454 = vst.msk [vmem:[#allocation2 + $0x8] sm:$0xff] %vm1452_vm4, %v1443_v36  ;;  %2783 = vmatpush3.bf16.msra.mxu1 %v2941_v44  ;;  %v2948_v44 = vld [vmem:[#allocation9 + $0x60] ss:$8 sps:$4 sm:$0xff]   ;;  %2020 = vmatprep.subr.bf16.mxu0 %v2950_v43 }
 0x9f1   : > { %2784 = vmatprep.subr.bf16.mxu1 %v2942_v49  ;;  %v2982_v43 = vld [vmem:[#allocation12 + $0x8] sm:$0xff]  }
 0x9f3   : > { %v1447_v38 = vpop.permute.xlu1 %1446  ;;  %2021 = vmatpush1.bf16.msra.mxu0 %v2948_v44  ;;  %v2983_v44 = vld [vmem:[#allocation12 + $0x40] sm:$0xff]  }
 0x9f4   : > { %1456 = vst.msk [vmem:[#allocation2 + $0x18] sm:$0xff] %vm1452_vm4, %v1447_v38  ;;  %2785 = vmatpush3.bf16.msra.mxu1 %v2942_v49  ;;  %v2956_v49 = vld [vmem:[#allocation9 + $0x44] ss:$8 sps:$4 sm:$0xff]  }
 0x9f5   : > { %2786 = vmatprep.subr.bf16.mxu1 %v2943_v23 }
 0x9f8   : > { %2787 = vmatpush3.bf16.msra.mxu1 %v2943_v23  ;;  %v2959_v23 = vld [vmem:[#allocation9 + $0x34] ss:$8 sps:$4 sm:$0xff]  }
 0x9f9   : > { %2788 = vmatprep.subr.bf16.mxu1 %v2944_v53 }
 0x9fc   : > { %2789 = vmatpush3.bf16.msra.mxu1 %v2944_v53  ;;  %v2962_v53 = vld [vmem:[#allocation9 + $0x24] ss:$8 sps:$4 sm:$0xff]  }
 0xa9f   : > { %v1645_v45 = vpop.f32.mrf.mxu1 }
 0xaa0   : > { %1703 = vrot.lane.b32.xlu0 %v1645_v45, %s3320_s9  ;;  %v2953_v45 = vld [vmem:[#allocation9 + $0x54] ss:$8 sps:$4 sm:$0xff]  }
 0xaa1   : > { %v2766_v46 = vpop.f32.mrf.mxu1  ;;  %2022 = vmatprep.subr.bf16.mxu0 %v2953_v45  ;;  %v2984_v45 = vld [vmem:[#allocation12] sm:$0xff]  }
 0xaa2   : > { %v2951_v46 = vld [vmem:[#allocation9 + $0x50] ss:$8 sps:$4 sm:$0xff]  }
 0xaa3   : > { %v1648_v50 = vpop.f32.mrf.mxu1  ;;  %2023 = vmatpush1.bf16.msra.mxu0 %v2951_v46 }
 0xaa4   : > { %1705 = vrot.lane.b32.xlu1 %v1648_v50, %s3320_s9  ;;  %v2954_v50 = vld [vmem:[#allocation9 + $0x40] ss:$8 sps:$4 sm:$0xff]   ;;  %2024 = vmatprep.subr.bf16.mxu0 %v2956_v49 }
 0xaa5   : > { %v2767_v51 = vpop.f32.mrf.mxu1 }
 0xaa6   : > { %v2957_v51 = vld [vmem:[#allocation9 + $0x30] ss:$8 sps:$4 sm:$0xff]  }
 0xaa7   : > { %2025 = vmatpush1.bf16.msra.mxu0 %v2954_v50 }
 0xaa8   : > { %2026 = vmatprep.subr.bf16.mxu0 %v2959_v23 }
 0xaab   : > { %2027 = vmatpush1.bf16.msra.mxu0 %v2957_v51 }
 0xaac   : > { %2028 = vmatprep.subr.bf16.mxu0 %v2962_v53 }
 0xaae   : > { %v1692_v54 = vpop.f32.mrf.mxu0 }
 0xaaf   : > { %1707 = vrot.lane.b32.xlu0 %v1692_v54, %s3320_s9  ;;  %v2960_v54 = vld [vmem:[#allocation9 + $0x20] ss:$8 sps:$4 sm:$0xff]  }
 0xab0   : > { %v2772_v55 = vpop.f32.mrf.mxu0  ;;  %2029 = vmatpush1.bf16.msra.mxu0 %v2960_v54 }
 0xab1   : > { %v2965_v55 = vld [vmem:[#allocation9 + $0x14] ss:$8 sps:$4 sm:$0xff]  }
 0xab2   : > { %v1695_v56 = vpop.f32.mrf.mxu0  ;;  %2030 = vmatprep.subr.bf16.mxu0 %v2965_v55 }
 0xab3   : > { %1709 = vrot.lane.b32.xlu1 %v1695_v56, %s3320_s9  ;;  %v2963_v56 = vld [vmem:[#allocation9 + $0x10] ss:$8 sps:$4 sm:$0xff]   ;;  %s3233_s9 = scalar_lea.vmem %s3232_s25, 1024 }
 0xab4   : > { %v2773_v57 = vpop.f32.mrf.mxu0  ;;  %2031 = vmatpush1.bf16.msra.mxu0 %v2963_v56  ;;  %p3235_p3 = scmp.lt.s32.totalorder %s3233_s9, %s3227_s12 }
 0xab5   : > { %v2968_v57 = vld [vmem:[#allocation9 + $0x4] ss:$8 sps:$4 sm:$0xff]  }
 0xab6   : > { %2032 = vmatprep.subr.bf16.mxu0 %v2968_v57  ;;  %p3236_p1 = por %p3235_p3, %p3234_p12 }
 0xab8   : > { %p3237_p5 = pnand %p3236_p1, %p3230_p9 }
 0xb12   : > { %v1704_v58 = vpop.permute.xlu0 %1703 }
 0xb13   : > { %1716 = vst.msk [vmem:[#allocation2] sm:$0xff] %vm1715_vm5, %v1704_v58  ;;  %v2966_v58 = vld [vmem:[#allocation9] ss:$8 sps:$4 sm:$0xff]  }
 0xb14   : > { %2033 = vmatpush1.bf16.msra.mxu0 %v2966_v58 }
 0xb16   : > { %v1706_v59 = vpop.permute.xlu1 %1705 }
 0xb17   : > { %1717 = vst.msk [vmem:[#allocation2 + $0x8] sm:$0xff] %vm1715_vm5, %v1706_v59  ;;  %v2969_v59 = vld [vmem:[#allocation12 + $0x78] sm:$0xff]  }
 0xb18   : > { %2630 = vmatprep.subr.bf16.mxu1 %v2969_v59 }
 0xb1a   : > { %v1720_v60 = vld [vmem:[#allocation2] sm:$0xff] }
 0xb1e   : > { %v1721_v61 = vld [vmem:[#allocation2 + $0x8] sm:$0xff] }
 0xb1f   : > { %v1724_v62 = vpack.c.bf16 %v1721_v61, %v1720_v60  ;;  %v2970_v60 = vld [vmem:[#allocation12 + $0x38] sm:$0xff]   ;;  %v2971_v61 = vld [vmem:[#allocation12 + $0x70] sm:$0xff]  }
 0xb21   : > { %2790 = vmatprep.mubr.bf16.mxu1 %v1724_v62  ;;  %v1708_v63 = vpop.permute.xlu0 %1707  ;;  %v2972_v62 = vld [vmem:[#allocation12 + $0x30] sm:$0xff]  }
 0xb22   : > { %1718 = vst.msk [vmem:[#allocation2 + $0x10] sm:$0xff] %vm1715_vm5, %v1708_v63  ;;  %v2973_v63 = vld [vmem:[#allocation12 + $0x68] sm:$0xff]  }
 0xb25   : > { %v1710_v1 = vpop.permute.xlu1 %1709 }
 0xb26   : > { %1719 = vst.msk [vmem:[#allocation2 + $0x18] sm:$0xff] %vm1715_vm5, %v1710_v1  ;;  %v2974_v1 = vld [vmem:[#allocation12 + $0x28] sm:$0xff]  }
 0xb29   : > { %v1722_v2 = vld [vmem:[#allocation2 + $0x10] sm:$0xff] }
 0xb2d   : > { %v1723_v3 = vld [vmem:[#allocation2 + $0x18] sm:$0xff] }
 0xb2e   : > { %v1725_v4 = vpack.c.bf16 %v1723_v3, %v1722_v2  ;;  %v2975_v2 = vld [vmem:[#allocation12 + $0x60] sm:$0xff]  }
 0xb2f   : > { %v2976_v3 = vld [vmem:[#allocation12 + $0x20] sm:$0xff]  }
 0xb30   : > { %2791 = vmatmul.mubr.bf16.vlgmr.msra.gmra.mxu1 %v1725_v4  ;;  %v2977_v4 = vld [vmem:[#allocation12 + $0x58] sm:$0xff]  }
 0xb31   : > { %2631 = vmatpush3.bf16.msra.mxu1 %v2970_v60 }
 0xb32   : > { %2632 = vmatprep.subr.bf16.mxu1 %v2971_v61 }
 0xb35   : > { %2633 = vmatpush3.bf16.msra.mxu1 %v2972_v62 }
 0xb36   : > { %2634 = vmatprep.subr.bf16.mxu1 %v2973_v63 }
 0xb39   : > { %2635 = vmatpush3.bf16.msra.mxu1 %v2974_v1 }
 0xb3a   : > { %2636 = vmatprep.subr.bf16.mxu1 %v2975_v2 }
 0xb3d   : > { %2637 = vmatpush3.bf16.msra.mxu1 %v2976_v3 }
 0xb3e   : > { %2638 = vmatprep.subr.bf16.mxu1 %v2977_v4 }
 0xbf0   : > { %v2792_v5 = vpop.f32.mrf.mxu1 }
 0xbf1   : > { %v1837_v10 = vadd.f32 %v2792_v5, %v1745_v6  ;;  %v2978_v5 = vld [vmem:[#allocation12 + $0x18] sm:$0xff]  }
 0xbf2   : > { %v1828_v7 = vpop.f32.mrf.mxu1  ;;  %2639 = vmatpush3.bf16.msra.mxu1 %v2978_v5 }
 0xbf3   : > { %v1829_v8 = vadd.f32 %v1828_v7, %v1745_v6  ;;  %v1845_v19 = vadd.f32 %v3067_v48, %v1837_v10 }
 0xbf4   : > { %v2793_v9 = vpop.f32.mrf.mxu1 }
 0xbf5   : > { %v1843_v47 = vadd.f32 %v3065_v11, %v1829_v8  ;;  %v1840_v17 = vadd.f32 %v2793_v9, %v1745_v6 }
 0xbf6   : > { %v1831_v40 = vpop.f32.mrf.mxu1 }
 0xbf7   : > { %v1832_v42 = vadd.f32 %v1831_v40, %v1745_v6  ;;  %1847 = vadd.xlane.f32.xlu0 %v1843_v47  ;;  %v1846_v13 = vadd.f32 %v3068_v52, %v1840_v17 }
 0xbf9   : > { %v1844_v12 = vadd.f32 %v3066_v32, %v1832_v42 }
 0xbfb   : > { %1849 = vadd.xlane.f32.xlu1 %v1844_v12  ;;  %1851 = vadd.xlane.f32.xlu0 %v1845_v19 }
 0xbff   : > { %1853 = vadd.xlane.f32.xlu0 %v1846_v13 }
 0xc80   : > { %v1848_v15 = vpop.xlane.xlu0 %1847 }
 0xc81   : > { %v1856_v16 = vmul.f32 0.0078125, %v1848_v15 }
 0xc83   : > { %v3802_v18 = vsub.f32 %v1843_v47, %v1856_v16 }
 0xc84   : > { %v1850_v20 = vpop.xlane.xlu1 %1849  ;;  %v1852_v21 = vpop.xlane.xlu0 %1851 }
 0xc85   : > { %v1857_v22 = vmul.f32 0.0078125, %v1850_v20  ;;  %v1858_v24 = vmul.f32 0.0078125, %v1852_v21  ;;  %v1864_v27 = vmul.f32 %v3802_v18, %v3802_v18 }
 0xc87   : > { %v3806_v30 = vsub.f32 %v1844_v12, %v1857_v22  ;;  %v3808_v31 = vsub.f32 %v1845_v19, %v1858_v24  ;;  %1868 = vadd.xlane.f32.xlu0 %v1864_v27  ;;  %v1895_v19 = vrot.slane %v3794_v37, %v3580_v26 }
 0xc88   : > { %v1854_v34 = vpop.xlane.xlu0 %1853 }
 0xc89   : > { %v1859_v36 = vmul.f32 0.0078125, %v1854_v34  ;;  %v1865_v38 = vmul.f32 %v3806_v30, %v3806_v30  ;;  %v1866_v39 = vmul.f32 %v3808_v31, %v3808_v31 }
 0xc8b   : > { %v3814_v41 = vsub.f32 %v1846_v13, %v1859_v36  ;;  %1870 = vadd.xlane.f32.xlu1 %v1865_v38  ;;  %1872 = vadd.xlane.f32.xlu0 %v1866_v39 }
 0xc8d   : > { %v1867_v28 = vmul.f32 %v3814_v41, %v3814_v41 }
 0xc8f   : > { %1874 = vadd.xlane.f32.xlu1 %v1867_v28  ;;  %v2979_v28 = vld [vmem:[#allocation12 + $0x50] sm:$0xff]  }
 0xc90   : > { %2640 = vmatprep.subr.bf16.mxu1 %v2979_v28 }
 0xd10   : > { %v1869_v6 = vpop.xlane.xlu0 %1868 }
 0xd11   : > { %v1876_v7 = vmul.f32 0.0078125, %v1869_v6 }
 0xd13   : > { %v1880_v8 = vadd.f32 1e-05, %v1876_v7 }
 0xd14   : > { %v1871_v9 = vpop.xlane.xlu1 %1870  ;;  %v1873_v10 = vpop.xlane.xlu0 %1872 }
 0xd15   : > { %3049 = vrsqrt.f32 %v1880_v8  ;;  %v1877_v11 = vmul.f32 0.0078125, %v1871_v9  ;;  %v1878_v47 = vmul.f32 0.0078125, %v1873_v10 }
 0xd17   : > { %v1881_v40 = vadd.f32 1e-05, %v1877_v11  ;;  %v1882_v42 = vadd.f32 1e-05, %v1878_v47 }
 0xd18   : > { %v1875_v17 = vpop.xlane.xlu1 %1874 }
 0xd19   : > { %3051 = vrsqrt.f32 %v1881_v40  ;;  %v1879_v32 = vmul.f32 0.0078125, %v1875_v17  ;;  %v2117_v40 = vsub.s32 3, %v3577_v25 }
 0xd1a   : > { %3053 = vrsqrt.f32 %v1882_v42 }
 0xd1b   : > { %v1883_v12 = vadd.f32 1e-05, %v1879_v32  ;;  %v2118_v17 = vrot.slane %v3794_v37, %v2117_v40 }
 0xd1d   : > { %3055 = vrsqrt.f32 %v1883_v12 }
 0xd22   : > { %v3050_v48 = vpop.eup %3049 }
 0xd23   : > { %v1888_v52 = vmul.f32 %v3050_v48, %v3802_v18 }
 0xd25   : > { %v1896_v15 = vmul.f32 %v1895_v19, %v1888_v52 }
 0xd26   : > { %v3052_v13 = vpop.eup %3051 }
 0xd27   : > { %v1889_v14 = vmul.f32 %v3052_v13, %v3806_v30  ;;  %v3054_v16 = vpop.eup %3053  ;;  %v3825_v22 = vadd.f32 %v1903_v35, %v1896_v15 }
 0xd28   : > { %v1890_v27 = vmul.f32 %v3054_v16, %v3808_v31  ;;  %v2980_v31 = vld [vmem:[#allocation12 + $0x10] sm:$0xff]  }
 0xd29   : > { %v1897_v20 = vmul.f32 %v1895_v19, %v1889_v14  ;;  %2641 = vmatpush3.bf16.msra.mxu1 %v2980_v31 }
 0xd2a   : > { %v3056_v21 = vpop.eup %3055  ;;  %v1898_v29 = vmul.f32 %v1895_v19, %v1890_v27 }
 0xd2b   : > { %v3827_v24 = vadd.f32 %v1903_v35, %v1897_v20  ;;  %v1891_v34 = vmul.f32 %v3056_v21, %v3814_v41  ;;  %v2981_v41 = vld [vmem:[#allocation12 + $0x48] sm:$0xff]  }
 0xd2c   : > { %v3836_v38 = vadd.f32 %v1903_v35, %v1898_v29  ;;  %2642 = vmatprep.subr.bf16.mxu1 %v2981_v41 }
 0xd2d   : > { %v1908_v18 = vpack.c.bf16 %v3827_v24, %v3825_v22  ;;  %v1899_v36 = vmul.f32 %v1895_v19, %v1891_v34  ;;  %2643 = vmatpush3.bf16.msra.mxu1 %v2982_v43 }
 0xd2e   : > { %2644 = vmatprep.subr.bf16.mxu1 %v2983_v44 }
 0xd2f   : > { %2051 = vmatmul.mubr.bf16.vlgmr.msra.gmra.mxu0 %v1908_v18  ;;  %v3834_v30 = vadd.f32 %v1903_v35, %v1899_v36 }
 0xd30   : > { %2060 = vmatprep.mubr.bf16.mxu0 %v3317_v0  ;;  %v1926_v0 = vld [vmem:[#allocation11] sm:$0x3] }
 0xd31   : > { %v1909_v39 = vpack.c.bf16 %v3834_v30, %v3836_v38  ;;  %2645 = vmatpush3.bf16.msra.mxu1 %v2984_v45  ;;  %v1935_v49 = vrot.slane %v1926_v0, %v3580_v26  ;;  %v1931_v50 = vrot.slane %v1926_v0, %v3590_v33 }
 0xd37   : > { %2061 = vmatmul.mubr.bf16.gmra.mxu0 %v1909_v39 }
 0xdef   : > { %v2052_v46 = vpop.f32.mrf.mxu0 }
 0xdf0   : > { %v2053_v55 = vadd.f32 %v2052_v46, %v1931_v50 }
 0xdf1   : > { %v2054_v51 = vpop.f32.mrf.mxu0 }
 0xdf2   : > { %v2055_v53 = vadd.f32 %v2054_v51, %v1935_v49  ;;  %v2071_v62 = vmax.f32 %v2053_v55, 0.0 }
 0xdf3   : > { %v2056_v23 = vpop.f32.mrf.mxu0 }
 0xdf4   : > { %v2057_v54 = vadd.f32 %v2056_v23, %v1931_v50  ;;  %v2072_v60 = vmax.f32 %v2055_v53, 0.0 }
 0xdf5   : > { %v2058_v56 = vpop.f32.mrf.mxu0 }
 0xdf6   : > { %v2059_v57 = vadd.f32 %v2058_v56, %v1935_v49  ;;  %v2073_v58 = vmax.f32 %v2057_v54, 0.0 }
 0xdf7   : > { %v2062_v59 = vpop.f32.mrf.mxu0 }
 0xdf8   : > { %v2074_v61 = vmax.f32 %v2059_v57, 0.0  ;;  %v2079_v2 = vpack.c.bf16 %v2073_v58, %v2071_v62  ;;  %v2063_v33 = vadd.f32 %v2062_v59, %v1931_v50 }
 0xdf9   : > { %v2064_v63 = vpop.f32.mrf.mxu0 }
 0xdfa   : > { %v2080_v1 = vpack.c.bf16 %v2074_v61, %v2072_v60  ;;  %v2065_v4 = vadd.f32 %v2064_v63, %v1935_v49  ;;  %v2075_v10 = vmax.f32 %v2063_v33, 0.0 }
 0xdfb   : > { %v2066_v3 = vpop.f32.mrf.mxu0 }
 0xdfc   : > { %v2067_v26 = vadd.f32 %v2066_v3, %v1931_v50  ;;  %2247 = vmatprep.mubr.bf16.mxu1 %v2080_v1  ;;  %v2076_v8 = vmax.f32 %v2065_v4, 0.0  ;;  %v2314_v1 = vsub.s32 4, %v3577_v25  ;;  %v2322_v3 = vsub.s32 5, %v3577_v25 }
 0xdfd   : > { %v2068_v5 = vpop.f32.mrf.mxu0  ;;  %2248 = vmatmul.mubr.bf16.vlgmr.msra.gmra.mxu1 %v2079_v2 }
 0xdfe   : > { %v2069_v6 = vadd.f32 %v2068_v5, %v1935_v49  ;;  %v2077_v7 = vmax.f32 %v2067_v26, 0.0  ;;  %v2315_v26 = vrot.slane %v3794_v37, %v2314_v1  ;;  %v2323_v5 = vrot.slane %v3794_v37, %v2322_v3 }
 0xe00   : > { %v2078_v9 = vmax.f32 %v2069_v6, 0.0  ;;  %v2081_v47 = vpack.c.bf16 %v2077_v7, %v2075_v10 }
 0xe02   : > { %v2082_v11 = vpack.c.bf16 %v2078_v9, %v2076_v8 }
 0xe04   : > { %2255 = vmatprep.mubr.bf16.mxu1 %v2082_v11 }
 0xe05   : > { %2256 = vmatmul.mubr.bf16.gmra.mxu1 %v2081_v47 }
 0xebd   : > { %v2646_v42 = vpop.f32.mrf.mxu1 }
 0xebf   : > { %v2647_v32 = vpop.f32.mrf.mxu1 }
 0xec0   : > { %v2648_v12 = vadd.f32 %v2647_v32, %v2646_v42 }
 0xec1   : > { %v2649_v48 = vpop.f32.mrf.mxu1 }
 0xec2   : > { %v2250_v19 = vadd.f32 %v2648_v12, %v2118_v17 }
 0xec3   : > { %v2650_v52 = vpop.f32.mrf.mxu1 }
 0xec4   : > { %v2651_v13 = vadd.f32 %v2650_v52, %v2649_v48  ;;  %v2264_v35 = vadd.f32 %v2250_v19, %v3825_v22 }
 0xec5   : > { %v2652_v14 = vpop.f32.mrf.mxu1 }
 0xec6   : > { %v2253_v15 = vadd.f32 %v2651_v13, %v2118_v17  ;;  %2268 = vadd.xlane.f32.xlu0 %v2264_v35 }
 0xec7   : > { %v2653_v16 = vpop.f32.mrf.mxu1 }
 0xec8   : > { %v2654_v20 = vadd.f32 %v2653_v16, %v2652_v14  ;;  %v2265_v21 = vadd.f32 %v2253_v15, %v3827_v24 }
 0xec9   : > { %v2655_v27 = vpop.f32.mrf.mxu1 }
 0xeca   : > { %v2258_v34 = vadd.f32 %v2654_v20, %v2118_v17  ;;  %2270 = vadd.xlane.f32.xlu1 %v2265_v21 }
 0xecb   : > { %v2656_v18 = vpop.f32.mrf.mxu1 }
 0xecc   : > { %v2657_v36 = vadd.f32 %v2656_v18, %v2655_v27  ;;  %v2266_v29 = vadd.f32 %v2258_v34, %v3836_v38 }
 0xece   : > { %v2261_v39 = vadd.f32 %v2657_v36, %v2118_v17  ;;  %2272 = vadd.xlane.f32.xlu0 %v2266_v29 }
 0xed0   : > { %v2267_v28 = vadd.f32 %v2261_v39, %v3834_v30 }
 0xed2   : > { %2274 = vadd.xlane.f32.xlu1 %v2267_v28 }
 0xf4f   : > { %v2269_v22 = vpop.xlane.xlu0 %2268 }
 0xf50   : > { %v2276_v31 = vmul.f32 0.0078125, %v2269_v22 }
 0xf52   : > { %v2280_v41 = vsub.f32 %v2264_v35, %v2276_v31 }
 0xf53   : > { %v2271_v43 = vpop.xlane.xlu1 %2270 }
 0xf54   : > { %v2277_v44 = vmul.f32 0.0078125, %v2271_v43  ;;  %v2284_v45 = vmul.f32 %v2280_v41, %v2280_v41 }
 0xf56   : > { %v2281_v0 = vsub.f32 %v2265_v21, %v2277_v44  ;;  %2288 = vadd.xlane.f32.xlu0 %v2284_v45 }
 0xf57   : > { %v2273_v24 = vpop.xlane.xlu0 %2272 }
 0xf58   : > { %v2278_v46 = vmul.f32 0.0078125, %v2273_v24  ;;  %v2285_v49 = vmul.f32 %v2281_v0, %v2281_v0 }
 0xf5a   : > { %v2282_v50 = vsub.f32 %v2266_v29, %v2278_v46  ;;  %2290 = vadd.xlane.f32.xlu1 %v2285_v49 }
 0xf5b   : > { %v2275_v51 = vpop.xlane.xlu1 %2274 }
 0xf5c   : > { %v2279_v38 = vmul.f32 0.0078125, %v2275_v51  ;;  %v2286_v23 = vmul.f32 %v2282_v50, %v2282_v50 }
 0xf5e   : > { %v2283_v53 = vsub.f32 %v2267_v28, %v2279_v38  ;;  %2292 = vadd.xlane.f32.xlu0 %v2286_v23 }
 0xf60   : > { %v2287_v30 = vmul.f32 %v2283_v53, %v2283_v53 }
 0xf62   : > { %2294 = vadd.xlane.f32.xlu1 %v2287_v30 }
 0xfdf   : > { %v2289_v54 = vpop.xlane.xlu0 %2288 }
 0xfe0   : > { %v2296_v55 = vmul.f32 0.0078125, %v2289_v54 }
 0xfe2   : > { %v2300_v56 = vadd.f32 1e-05, %v2296_v55 }
 0xfe3   : > { %v2291_v57 = vpop.xlane.xlu1 %2290 }
 0xfe4   : > { %3057 = vrsqrt.f32 %v2300_v56  ;;  %v2297_v58 = vmul.f32 0.0078125, %v2291_v57 }
 0xfe6   : > { %v2301_v59 = vadd.f32 1e-05, %v2297_v58 }
 0xfe7   : > { %v2293_v60 = vpop.xlane.xlu0 %2292 }
 0xfe8   : > { %3059 = vrsqrt.f32 %v2301_v59  ;;  %v2298_v61 = vmul.f32 0.0078125, %v2293_v60 }
 0xfea   : > { %v2302_v62 = vadd.f32 1e-05, %v2298_v61 }
 0xfeb   : > { %v2295_v63 = vpop.xlane.xlu1 %2294 }
 0xfec   : > { %3061 = vrsqrt.f32 %v2302_v62  ;;  %v2299_v2 = vmul.f32 0.0078125, %v2295_v63 }
 0xfee   : > { %v2303_v4 = vadd.f32 1e-05, %v2299_v2 }
 0xff0   : > { %3063 = vrsqrt.f32 %v2303_v4 }
 0xff1   : > { %v3058_v33 = vpop.eup %3057 }
 0xff2   : > { %v2308_v6 = vmul.f32 %v3058_v33, %v2280_v41 }
 0xff4   : > { %v2316_v7 = vmul.f32 %v2315_v26, %v2308_v6 }
 0xff5   : > { %v3060_v8 = vpop.eup %3059 }
 0xff6   : > { %v2324_v9 = vadd.f32 %v2323_v5, %v2316_v7  ;;  %v2309_v10 = vmul.f32 %v3060_v8, %v2281_v0 }
 0xff8   : > { %2328 = vst [vmem:[%s395_s19] sm:$0xff] %v2324_v9  ;;  %v2317_v11 = vmul.f32 %v2315_v26, %v2309_v10 }
 0xff9   : > { %v3062_v47 = vpop.eup %3061 }
 0xffa   : > { %v2325_v25 = vadd.f32 %v2323_v5, %v2317_v11  ;;  %v2310_v40 = vmul.f32 %v3062_v47, %v2282_v50 }
 0xffc   : > { %2329 = vst [vmem:[%s395_s19 + $0x8] sm:$0xff] %v2325_v25  ;;  %v2318_v42 = vmul.f32 %v2315_v26, %v2310_v40 }
 0xffd   : > { %v3064_v17 = vpop.eup %3063 }
 0xffe   : > { %v2326_v32 = vadd.f32 %v2323_v5, %v2318_v42  ;;  %v2311_v37 = vmul.f32 %v3064_v17, %v2283_v53 }
0x1000   : > { %2330 = vst [vmem:[%s395_s19 + $0x10] sm:$0xff] %v2326_v32  ;;  %v2319_v12 = vmul.f32 %v2315_v26, %v2311_v37 }
0x1002   : > { %v2327_v48 = vadd.f32 %v2323_v5, %v2319_v12 }
0x1004   : > { %2331 = vst [vmem:[%s395_s19 + $0x18] sm:$0xff] %v2327_v48 }
0x1005   : > { %3240 = shalt.err (!%p3237_p5)
}
0x1006   : > { %s3241_s20 = scalar_lea.hbm %s3858_s3, 512  ;;  %s3245_s21 = scalar_lea.hbm %s3911_s8, 1024 }
0x1007   : > { %p3242_p6 = scmp.ne.s32.totalorder %s3858_s3, %s3241_s20  ;;  %p3246_p4 = scmp.lt.s32.totalorder %s3858_s3, %s3911_s8 }
0x1008   : > { %p3247_p7 = scmp.lt.s32.totalorder %s3245_s21, %s3241_s20 }
0x1009   : > { %p3243_p10 = pnand %p3242_p6, %p3940_p2 }
0x100a   : > { %p3248_p13 = por %p3247_p7, %p3246_p4 }
0x100b   : > { %p3244_p11 = pneg %p3243_p10 }
0x100d   : > { %p3249_p0 = pnand %p3248_p13, %p3244_p11 }
0x100f   : > { %3252 = shalt.err (!%p3249_p0)
}
0x1010   : > { %s3324_s17 = smov 128   ;;  %s3325_s10 = smov 8  }
0x1011   : > { %2816 = dma.vmem_to_hbm [thread:$0]  (%p3940_p2), %s3860_s26, 512, %s3858_s3, %s2333_s15, %s3324_s17, %s3324_s17, %s3325_s10  }
0x1012 PF: > { %s2362_s12 = sand.u32 1, %s3291_s27   ;;  %p3941_p8 = scmp.ne.s32.totalorder %s3928_s24, 0 }
0x1013   : > { %p3942_p9 = scmp.ge.s32.totalorder %s3303_s30, 2  ;;  %s2363_s11 = scalar_lea.sflag [#allocation5], %s2362_s12 }
0x1015   : > { %p2839_p12 = pnand %p3942_p9, %p3941_p8 }
0x1017   : > { %p2840_p3 = pneg %p2839_p12 }
0x1019   : > { %3286 = dma.done.wait (%p2840_p3), %s2363_s11, 512  }
0x101a   : > { %3288 = vsyncadd (%p2840_p3), %s2363_s11, 4294966784  ;;  %p24_p1 = scmp.ge.s32.totalorder %s3472_s18, 4   ;;  %s3943_s27 = smov %s3295_s28 }
0x101b   : > { %s3944_s28 = smov %s3299_s29  ;;  %s3945_s29 = smov %s3484_s23 }
0x101c   : > { %s3946_s30 = smov %s3472_s18  ;;  %26 = sbr.rel (!%p24_p1) target bundleno = 11 (0xb), region = 117 }
0x1021   :  { %2368 = vsyncpa [#allocation4], 1 }
0x1022   :  { %2370 = vsyncpa [#allocation4 + $0x1], 1 }
0x1023   :  { %2371 = vsyncpa [#allocation7], 1 }
0x1024   :  { %2372 = vsyncpa [#allocation10], 1 }
0x1025   :  { %2373 = vsyncpa [#allocation13], 1 }
0x1026   :  { %2374 = vsyncpa [#allocation5], 1 }
0x1027   :  { %2376 = vsyncpa [#allocation5 + $0x1], 1 }

</bundles_post_ra>
